<compile_context>
chip_gen: v5e
topology: v5e:2x2
jax: 0.10.0
libtpu: 0.0.40
codegen_flags: <defaults>
</compile_context>

<pallas_src>
import functools
import math

import jax
import jax.numpy as jnp
from jax.experimental import pallas as pl
from jax.experimental.pallas import tpu as pltpu


def _han_semantic_attn_kernel(z_ref, w1_ref, b1_ref, w2_ref, e_ref, s_ref,
                              o_ref, *, groups, m_sem, d_in, low_precision,
                              prec):
    """One grid step over a (tile_rows, groups*M*D) slab of packed nodes.

    z_ref : (T, g*M*D)  g nodes per row, each node's (M, D) features lane-contiguous
    w1_ref: (M*D, M*H)  block-diagonal first Linear weight (native dtype)
    b1_ref: (1,  M*H)   first Linear bias tiled M times (f32)
    w2_ref: (M*H, M)    block-diagonal second Linear weight (native dtype)
    e_ref : (M,  M*D)   0/1 lane-broadcast matrix, E[m, m*D:(m+1)*D] = 1 (f32)
    s_ref : (M*D, D)    stacked-identity fold matrix, S[m*D+j, j] = 1 (f32)
    o_ref : (T, g*D)    packed, lane-dense output block
    """
    md = m_sem * d_in
    w1 = w1_ref[...]
    b1 = b1_ref[...].astype(jnp.float32)
    w2 = w2_ref[...]
    e_mat = e_ref[...]
    s_mat = s_ref[...]

    # Unrolled over the small static node-packing factor.  All lane slices
    # below start at multiples of M*D / D -- no sublane concat, no relayout.
    for p in range(groups):
        z_p = z_ref[:, p * md:(p + 1) * md]                       # (T, M*D) native

        # (1) All M per-semantic projections as ONE MXU matmul against the
        #     block-diagonal weight (K = M*D instead of D), f32 accumulation.
        acc = jnp.dot(z_p, w1, preferred_element_type=jnp.float32,
                      precision=prec) + b1                         # (T, M*H) f32
        # bf16 tanh on the bf16 path halves EUP occupancy (v6e/v7x bf16 EUP).
        h = jnp.tanh(acc.astype(jnp.bfloat16) if low_precision else acc)

        # (2) 1-wide second projection, block-diagonal -> lane-dense logits.
        logits = jnp.dot(h, w2, preferred_element_type=jnp.float32,
                         precision=prec)                           # (T, M) f32

        # (3) Softmax over the semantic axis (M lanes per row).
        l_max = jnp.max(logits, axis=-1, keepdims=True)
        exps = jnp.exp(logits - l_max)
        denom = jnp.sum(exps, axis=-1, keepdims=True)
        if low_precision:
            beta = exps * pl.reciprocal(denom, approx=True)        # bf16: approx OK
        else:
            beta = exps / denom                                    # f32: exact

        # (4) Weighted sum over semantics: broadcast beta over each semantic's
        #     D lanes (matmul with E), multiply, then fold the M lane-blocks
        #     with the stacked identity S.
        beta_b = jnp.dot(beta, e_mat, preferred_element_type=jnp.float32,
                         precision=prec)                           # (T, M*D) f32
        weighted = beta_b * z_p.astype(jnp.float32)
        out_p = jnp.dot(weighted, s_mat, preferred_element_type=jnp.float32,
                        precision=prec)                            # (T, D) f32

        o_ref[:, p * d_in:(p + 1) * d_in] = out_p.astype(o_ref.dtype)


def _vmem_capacity_bytes():
    try:
        info = pltpu.get_tpu_info()
        cap = getattr(info, "vmem_capacity_bytes", None)
        if cap:
            return int(cap)
    except Exception:
        pass
    return 64 * 1024 * 1024          # conservative (v7x-sized) fallback


def _plan(n, m, d, h, itemsize, tile_rows=None):
    """Pick (node-packing factor g, row tile, vmem_limit) per TPU generation."""
    cap = _vmem_capacity_bytes()
    budget = (cap * 5) // 16         # ~40 MiB on 128 MiB parts (v5e/v6e), ~20 MiB on v7x

    # Packing factor so both the input and the output slabs are lane-dense
    # (g*D is a multiple of 128).
    g = 1 if d % 128 == 0 else 128 // math.gcd(d, 128)
    if n % g:
        g = 1  # TODO(synk): in-kernel tail masking would keep packing for ragged N.
    rows = n // g

    # Per-packed-row VMEM bytes.  Includes the f32 temporaries of all g
    # unrolled sub-steps (python loops do not bound live ranges) and no longer
    # charges the removed concat copy.
    per_row = 2 * g * (m * d + d) * itemsize               # double-buffered in/out blocks
    per_row += g * m * d * itemsize                        # native z_p slice copies
    per_row += g * (m * h + 3 * m * d + d + 16) * 4        # f32 h / beta_bcast / weighted / out
    weights = 2 * ((m * d * m * h + m * h + m * h * m) * itemsize
                   + (m * m * d + m * d * d) * 4)          # resident small matrices

    if tile_rows is None:
        tile = max(8, (budget - weights) // max(per_row, 1))
    else:
        tile = max(1, int(tile_rows))

    if cap <= 64 * 1024 * 1024 and rows >= 16:
        # v7x-class part (64 MiB VMEM, 2 TensorCores): never collapse to a
        # single grid block -- keep >=2 "parallel" blocks so both cores get work.
        half = (((rows + 1) // 2) + 7) // 8 * 8
        tile = min(tile, half)

    if tile >= rows:
        tile = rows
    else:
        tile = max(8, (tile // 8) * 8)   # keep the sublane (second-minor) dim aligned

    est = tile * per_row + weights
    vmem_limit = int(min(max(2 * est, 32 * 1024 * 1024), (cap * 5) // 8))
    return g, tile, vmem_limit


def han_semantic_attn(z, w1, b1, w2, *, tile_rows=None, packed_output=False,
                      interpret=False):
    """HAN semantic-attention forward.

    z : (N, M, D)  node x semantic x feature   (float32 or bfloat16)
    w1: (D, H)     first Linear weight, math convention (x @ w1 + b1)
    b1: (1, H)     first Linear bias
    w2: (1, H)     Linear(H, 1, bias=False) weight
    Returns (N, D) in z.dtype, or the lane-dense packed (N/g, g*D) slab if
    packed_output=True (preferred for downstream kernels: avoids a caller-side
    relayout back into the lane-padded (N, D) HBM layout).
    """
    n, m, d = z.shape
    d2, h = w1.shape
    assert d2 == d and b1.shape == (1, h) and w2.shape == (1, h)
    assert z.dtype in (jnp.float32, jnp.bfloat16)

    g, tile, vmem_limit = _plan(n, m, d, h, z.dtype.itemsize, tile_rows)
    rows = n // g

    # Lane-dense packed layout: row r holds nodes g*r .. g*r+g-1, each M*D wide.
    # Pure row-major relabel of (N, M, D); producers that can emit z already in
    # this flat layout make the reshape a no-op (the 3-D (N, M, D) tiled HBM
    # layout is mostly padding for small M, D).
    z_flat = z.reshape(rows, g * m * d)

    # Block-diagonal / broadcast / fold matrices (tiny, resident in VMEM).
    w1_blk = jnp.kron(jnp.eye(m, dtype=w1.dtype), w1)                 # (M*D, M*H)
    b1_t = jnp.tile(b1.astype(jnp.float32), (1, m))                   # (1, M*H)
    w2_blk = jnp.kron(jnp.eye(m, dtype=w2.dtype), w2.T)               # (M*H, M)
    e_mat = jnp.kron(jnp.eye(m, dtype=jnp.float32),
                     jnp.ones((1, d), jnp.float32))                   # (M, M*D)
    s_mat = jnp.tile(jnp.eye(d, dtype=jnp.float32), (m, 1))           # (M*D, D)

    low_precision = z.dtype == jnp.bfloat16
    # f32 path: HIGHEST-precision MXU passes (review correctness item); for very
    # large dim_hidden this trades some MXU headroom -- the kernel stays
    # HBM-bound at the module's default H=256 for the bf16 path and default
    # precision, and at small/medium H for f32/HIGHEST.
    prec = None if low_precision else jax.lax.Precision.HIGHEST

    kernel = functools.partial(
        _han_semantic_attn_kernel, groups=g, m_sem=m, d_in=d,
        low_precision=low_precision, prec=prec)

    grid = (pl.cdiv(rows, tile),)   # no jnp.pad: partial last block handled by Pallas

    out_packed = pl.pallas_call(
        kernel,
        out_shape=jax.ShapeDtypeStruct((rows, g * d), z.dtype),
        grid_spec=pltpu.PrefetchScalarGridSpec(
            num_scalar_prefetch=0,
            grid=grid,
            in_specs=[
                # TODO(synk): on v7x, if per-step DMA is still exposed at block
                # boundaries, try pipeline_mode=pl.Buffered(3) on this spec.
                pl.BlockSpec((tile, g * m * d), lambda i: (i, 0)),
                pl.BlockSpec((m * d, m * h), lambda i: (0, 0)),       # resident weights
                pl.BlockSpec((1, m * h), lambda i: (0, 0)),
                pl.BlockSpec((m * h, m), lambda i: (0, 0)),
                pl.BlockSpec((m, m * d), lambda i: (0, 0)),
                pl.BlockSpec((m * d, d), lambda i: (0, 0)),
            ],
            out_specs=pl.BlockSpec((tile, g * d), lambda i: (i, 0)),
        ),
        compiler_params=pltpu.CompilerParams(
            dimension_semantics=("parallel",),
            vmem_limit_bytes=vmem_limit,
        ),
        interpret=interpret,
    )(z_flat, w1_blk, b1_t, w2_blk, e_mat, s_mat)

    if packed_output:
        return out_packed
    # Row-major reinterpretation back to the module's (N, D) output.
    return out_packed.reshape(n, d)


def _reference(z, w1, b1, w2):
    hp = jax.lax.Precision.HIGHEST
    h = jnp.tanh(jnp.einsum('nmd,dh->nmh', z, w1, precision=hp) + b1)
    logits = jnp.einsum('nmh,h->nm', h, w2[0], precision=hp)[..., None]
    beta = jax.nn.softmax(logits, axis=1)
    return jnp.sum(beta * z, axis=1)


if __name__ == "__main__":
    # Small shapes consistent with the module: N nodes, M semantics, D features,
    # H hidden.  (N=16, D=32 -> packing factor g=4, single lane-dense block.)
    N, M, D, H = 16, 4, 32, 32

    key = jax.random.PRNGKey(0)
    kz, kw1, kw2 = jax.random.split(key, 3)

    z = jax.random.normal(kz, (N, M, D), dtype=jnp.float32)

    # Deterministic init mirroring reset_parameters(): xavier_normal with relu
    # gain on both linears, zero bias on the first.
    gain = 2.0 ** 0.5
    w1 = (gain * (2.0 / (D + H)) ** 0.5) * jax.random.normal(kw1, (D, H), dtype=jnp.float32)
    b1 = jnp.zeros((1, H), dtype=jnp.float32)
    w2 = (gain * (2.0 / (H + 1)) ** 0.5) * jax.random.normal(kw2, (1, H), dtype=jnp.float32)

    # f32 path: HIGHEST-precision matmuls + exact softmax division -> tight
    # tolerance (residual slack only for EUP tanh/exp approximations).
    out = jax.block_until_ready(han_semantic_attn(z, w1, b1, w2))
    ref = _reference(z, w1, b1, w2)
    assert out.shape == (N, D)
    assert jnp.allclose(out, ref, atol=5e-3, rtol=5e-3), "f32 mismatch vs reference"

    # Native-bf16 path: inputs stay bf16 end-to-end (halves HBM traffic, the
    # binding resource); f32 MXU accumulation, bf16 tanh, approx EUP reciprocal.
    zb = z.astype(jnp.bfloat16)
    w1b = w1.astype(jnp.bfloat16)
    w2b = w2.astype(jnp.bfloat16)
    out_bf16 = jax.block_until_ready(han_semantic_attn(zb, w1b, b1, w2b))
    ref_bf16 = _reference(zb.astype(jnp.float32), w1b.astype(jnp.float32), b1,
                          w2b.astype(jnp.float32))
    assert out_bf16.dtype == jnp.bfloat16
    assert jnp.allclose(out_bf16.astype(jnp.float32), ref_bf16, atol=1e-1, rtol=1e-1), \
        "bf16 mismatch vs reference"

    print("KERNEL_OK")
</pallas_src>

<mosaic_0001>
module attributes {stable_mosaic.version = 11 : i64} {
  func.func @_han_semantic_attn_kernel(%arg0: i32, %arg1: memref<4x512xf32, #tpu.memory_space<vmem>>, %arg2: memref<128x128xf32, #tpu.memory_space<vmem>>, %arg3: memref<1x128xf32, #tpu.memory_space<vmem>>, %arg4: memref<128x4xf32, #tpu.memory_space<vmem>>, %arg5: memref<4x128xf32, #tpu.memory_space<vmem>>, %arg6: memref<128x32xf32, #tpu.memory_space<vmem>>, %arg7: memref<4x128xf32, #tpu.memory_space<vmem>>) attributes {dimension_semantics = [#tpu.dimension_semantics<parallel>], iteration_bounds = array<i64: 1>, scalar_prefetch = 0 : i64, scratch_operands = 0 : i64, tpu.core_type = #tpu.core_type<tc>, window_params = [{transform_indices = @transform_0, window_bounds = array<i64: 4, 512>}, {pipeline_mode = #tpu.pipeline_mode<synchronous>, transform_indices = @transform_1, window_bounds = array<i64: 128, 128>}, {pipeline_mode = #tpu.pipeline_mode<synchronous>, transform_indices = @transform_2, window_bounds = array<i64: 1, 128>}, {pipeline_mode = #tpu.pipeline_mode<synchronous>, transform_indices = @transform_3, window_bounds = array<i64: 128, 4>}, {pipeline_mode = #tpu.pipeline_mode<synchronous>, transform_indices = @transform_4, window_bounds = array<i64: 4, 128>}, {pipeline_mode = #tpu.pipeline_mode<synchronous>, transform_indices = @transform_5, window_bounds = array<i64: 128, 32>}, {transform_indices = @transform_6, window_bounds = array<i64: 4, 128>}]} {
    %c0 = arith.constant 0 : index
    %c0_0 = arith.constant 0 : index
    %0 = vector.load %arg2[%c0, %c0_0] : memref<128x128xf32, #tpu.memory_space<vmem>>, vector<128x128xf32>
    %c0_1 = arith.constant 0 : index
    %c0_2 = arith.constant 0 : index
    %1 = vector.load %arg3[%c0_1, %c0_2] : memref<1x128xf32, #tpu.memory_space<vmem>>, vector<1x128xf32>
    %c0_3 = arith.constant 0 : index
    %c0_4 = arith.constant 0 : index
    %2 = vector.load %arg4[%c0_3, %c0_4] : memref<128x4xf32, #tpu.memory_space<vmem>>, vector<128x4xf32>
    %c0_5 = arith.constant 0 : index
    %c0_6 = arith.constant 0 : index
    %3 = vector.load %arg5[%c0_5, %c0_6] : memref<4x128xf32, #tpu.memory_space<vmem>>, vector<4x128xf32>
    %c0_7 = arith.constant 0 : index
    %c0_8 = arith.constant 0 : index
    %4 = vector.load %arg6[%c0_7, %c0_8] : memref<128x32xf32, #tpu.memory_space<vmem>>, vector<128x32xf32>
    %c0_9 = arith.constant 0 : index
    %c0_10 = arith.constant 0 : index
    %5 = vector.load %arg1[%c0_9, %c0_10] : memref<4x512xf32, #tpu.memory_space<vmem>>, vector<4x128xf32>
    %cst = arith.constant dense<0.000000e+00> : vector<4x128xf32>
    %6 = tpu.matmul %5, %0, %cst {dimension_numbers = #tpu.dot_dimension_numbers<[1], [0], [0], [1], [0, 0, 1, 1], [], []>, precision = #tpu.contract_precision<fp32>} : vector<4x128xf32>, vector<128x128xf32>, vector<4x128xf32> -> vector<4x128xf32>
    %7 = vector.broadcast %1 : vector<1x128xf32> to vector<4x128xf32>
    %8 = arith.addf %6, %7 : vector<4x128xf32>
    %9 = math.tanh %8 : vector<4x128xf32>
    %cst_11 = arith.constant dense<0.000000e+00> : vector<4x4xf32>
    %10 = tpu.matmul %9, %2, %cst_11 {dimension_numbers = #tpu.dot_dimension_numbers<[1], [0], [0], [1], [0, 0, 1, 1], [], []>, precision = #tpu.contract_precision<fp32>} : vector<4x128xf32>, vector<128x4xf32>, vector<4x4xf32> -> vector<4x4xf32>
    %cst_12 = arith.constant dense<0xFF800000> : vector<4xf32>
    %11 = vector.multi_reduction <maximumf>, %10, %cst_12 [1] : vector<4x4xf32> to vector<4xf32>
    %12 = vector.shape_cast %11 : vector<4xf32> to vector<4x1xf32>
    %13 = vector.broadcast %12 : vector<4x1xf32> to vector<4x4xf32>
    %14 = arith.subf %10, %13 : vector<4x4xf32>
    %15 = math.exp %14 : vector<4x4xf32>
    %cst_13 = arith.constant dense<0.000000e+00> : vector<4xf32>
    %16 = vector.multi_reduction <add>, %15, %cst_13 [1] : vector<4x4xf32> to vector<4xf32>
    %17 = vector.shape_cast %16 : vector<4xf32> to vector<4x1xf32>
    %18 = vector.broadcast %17 : vector<4x1xf32> to vector<4x4xf32>
    %19 = arith.divf %15, %18 : vector<4x4xf32>
    %cst_14 = arith.constant dense<0.000000e+00> : vector<4x128xf32>
    %20 = tpu.matmul %19, %3, %cst_14 {dimension_numbers = #tpu.dot_dimension_numbers<[1], [0], [0], [1], [0, 0, 1, 1], [], []>, precision = #tpu.contract_precision<fp32>} : vector<4x4xf32>, vector<4x128xf32>, vector<4x128xf32> -> vector<4x128xf32>
    %21 = arith.mulf %20, %5 : vector<4x128xf32>
    %cst_15 = arith.constant dense<0.000000e+00> : vector<4x32xf32>
    %22 = tpu.matmul %21, %4, %cst_15 {dimension_numbers = #tpu.dot_dimension_numbers<[1], [0], [0], [1], [0, 0, 1, 1], [], []>, precision = #tpu.contract_precision<fp32>} : vector<4x128xf32>, vector<128x32xf32>, vector<4x32xf32> -> vector<4x32xf32>
    %c0_16 = arith.constant 0 : index
    %c0_17 = arith.constant 0 : index
    %23 = vector.load %arg7[%c0_16, %c0_17] : memref<4x128xf32, #tpu.memory_space<vmem>>, vector<4x32xf32>
    tpu.vector_store %arg7[%c0_16, %c0_17], %22 {strides = array<i32>} : memref<4x128xf32, #tpu.memory_space<vmem>>, vector<4x32xf32>,
    %c0_18 = arith.constant 0 : index
    %c128 = arith.constant 128 : index
    %24 = vector.load %arg1[%c0_18, %c128] : memref<4x512xf32, #tpu.memory_space<vmem>>, vector<4x128xf32>
    %cst_19 = arith.constant dense<0.000000e+00> : vector<4x128xf32>
    %25 = tpu.matmul %24, %0, %cst_19 {dimension_numbers = #tpu.dot_dimension_numbers<[1], [0], [0], [1], [0, 0, 1, 1], [], []>, precision = #tpu.contract_precision<fp32>} : vector<4x128xf32>, vector<128x128xf32>, vector<4x128xf32> -> vector<4x128xf32>
    %26 = vector.broadcast %1 : vector<1x128xf32> to vector<4x128xf32>
    %27 = arith.addf %25, %26 : vector<4x128xf32>
    %28 = math.tanh %27 : vector<4x128xf32>
    %cst_20 = arith.constant dense<0.000000e+00> : vector<4x4xf32>
    %29 = tpu.matmul %28, %2, %cst_20 {dimension_numbers = #tpu.dot_dimension_numbers<[1], [0], [0], [1], [0, 0, 1, 1], [], []>, precision = #tpu.contract_precision<fp32>} : vector<4x128xf32>, vector<128x4xf32>, vector<4x4xf32> -> vector<4x4xf32>
    %cst_21 = arith.constant dense<0xFF800000> : vector<4xf32>
    %30 = vector.multi_reduction <maximumf>, %29, %cst_21 [1] : vector<4x4xf32> to vector<4xf32>
    %31 = vector.shape_cast %30 : vector<4xf32> to vector<4x1xf32>
    %32 = vector.broadcast %31 : vector<4x1xf32> to vector<4x4xf32>
    %33 = arith.subf %29, %32 : vector<4x4xf32>
    %34 = math.exp %33 : vector<4x4xf32>
    %cst_22 = arith.constant dense<0.000000e+00> : vector<4xf32>
    %35 = vector.multi_reduction <add>, %34, %cst_22 [1] : vector<4x4xf32> to vector<4xf32>
    %36 = vector.shape_cast %35 : vector<4xf32> to vector<4x1xf32>
    %37 = vector.broadcast %36 : vector<4x1xf32> to vector<4x4xf32>
    %38 = arith.divf %34, %37 : vector<4x4xf32>
    %cst_23 = arith.constant dense<0.000000e+00> : vector<4x128xf32>
    %39 = tpu.matmul %38, %3, %cst_23 {dimension_numbers = #tpu.dot_dimension_numbers<[1], [0], [0], [1], [0, 0, 1, 1], [], []>, precision = #tpu.contract_precision<fp32>} : vector<4x4xf32>, vector<4x128xf32>, vector<4x128xf32> -> vector<4x128xf32>
    %40 = arith.mulf %39, %24 : vector<4x128xf32>
    %cst_24 = arith.constant dense<0.000000e+00> : vector<4x32xf32>
    %41 = tpu.matmul %40, %4, %cst_24 {dimension_numbers = #tpu.dot_dimension_numbers<[1], [0], [0], [1], [0, 0, 1, 1], [], []>, precision = #tpu.contract_precision<fp32>} : vector<4x128xf32>, vector<128x32xf32>, vector<4x32xf32> -> vector<4x32xf32>
    %c0_25 = arith.constant 0 : index
    %c32 = arith.constant 32 : index
    %42 = vector.load %arg7[%c0_25, %c32] : memref<4x128xf32, #tpu.memory_space<vmem>>, vector<4x32xf32>
    tpu.vector_store %arg7[%c0_25, %c32], %41 {strides = array<i32>} : memref<4x128xf32, #tpu.memory_space<vmem>>, vector<4x32xf32>,
    %c0_26 = arith.constant 0 : index
    %c256 = arith.constant 256 : index
    %43 = vector.load %arg1[%c0_26, %c256] : memref<4x512xf32, #tpu.memory_space<vmem>>, vector<4x128xf32>
    %cst_27 = arith.constant dense<0.000000e+00> : vector<4x128xf32>
    %44 = tpu.matmul %43, %0, %cst_27 {dimension_numbers = #tpu.dot_dimension_numbers<[1], [0], [0], [1], [0, 0, 1, 1], [], []>, precision = #tpu.contract_precision<fp32>} : vector<4x128xf32>, vector<128x128xf32>, vector<4x128xf32> -> vector<4x128xf32>
    %45 = vector.broadcast %1 : vector<1x128xf32> to vector<4x128xf32>
    %46 = arith.addf %44, %45 : vector<4x128xf32>
    %47 = math.tanh %46 : vector<4x128xf32>
    %cst_28 = arith.constant dense<0.000000e+00> : vector<4x4xf32>
    %48 = tpu.matmul %47, %2, %cst_28 {dimension_numbers = #tpu.dot_dimension_numbers<[1], [0], [0], [1], [0, 0, 1, 1], [], []>, precision = #tpu.contract_precision<fp32>} : vector<4x128xf32>, vector<128x4xf32>, vector<4x4xf32> -> vector<4x4xf32>
    %cst_29 = arith.constant dense<0xFF800000> : vector<4xf32>
    %49 = vector.multi_reduction <maximumf>, %48, %cst_29 [1] : vector<4x4xf32> to vector<4xf32>
    %50 = vector.shape_cast %49 : vector<4xf32> to vector<4x1xf32>
    %51 = vector.broadcast %50 : vector<4x1xf32> to vector<4x4xf32>
    %52 = arith.subf %48, %51 : vector<4x4xf32>
    %53 = math.exp %52 : vector<4x4xf32>
    %cst_30 = arith.constant dense<0.000000e+00> : vector<4xf32>
    %54 = vector.multi_reduction <add>, %53, %cst_30 [1] : vector<4x4xf32> to vector<4xf32>
    %55 = vector.shape_cast %54 : vector<4xf32> to vector<4x1xf32>
    %56 = vector.broadcast %55 : vector<4x1xf32> to vector<4x4xf32>
    %57 = arith.divf %53, %56 : vector<4x4xf32>
    %cst_31 = arith.constant dense<0.000000e+00> : vector<4x128xf32>
    %58 = tpu.matmul %57, %3, %cst_31 {dimension_numbers = #tpu.dot_dimension_numbers<[1], [0], [0], [1], [0, 0, 1, 1], [], []>, precision = #tpu.contract_precision<fp32>} : vector<4x4xf32>, vector<4x128xf32>, vector<4x128xf32> -> vector<4x128xf32>
    %59 = arith.mulf %58, %43 : vector<4x128xf32>
    %cst_32 = arith.constant dense<0.000000e+00> : vector<4x32xf32>
    %60 = tpu.matmul %59, %4, %cst_32 {dimension_numbers = #tpu.dot_dimension_numbers<[1], [0], [0], [1], [0, 0, 1, 1], [], []>, precision = #tpu.contract_precision<fp32>} : vector<4x128xf32>, vector<128x32xf32>, vector<4x32xf32> -> vector<4x32xf32>
    %c0_33 = arith.constant 0 : index
    %c64 = arith.constant 64 : index
    %61 = vector.load %arg7[%c0_33, %c64] : memref<4x128xf32, #tpu.memory_space<vmem>>, vector<4x32xf32>
    tpu.vector_store %arg7[%c0_33, %c64], %60 {strides = array<i32>} : memref<4x128xf32, #tpu.memory_space<vmem>>, vector<4x32xf32>,
    %c0_34 = arith.constant 0 : index
    %c384 = arith.constant 384 : index
    %62 = vector.load %arg1[%c0_34, %c384] : memref<4x512xf32, #tpu.memory_space<vmem>>, vector<4x128xf32>
    %cst_35 = arith.constant dense<0.000000e+00> : vector<4x128xf32>
    %63 = tpu.matmul %62, %0, %cst_35 {dimension_numbers = #tpu.dot_dimension_numbers<[1], [0], [0], [1], [0, 0, 1, 1], [], []>, precision = #tpu.contract_precision<fp32>} : vector<4x128xf32>, vector<128x128xf32>, vector<4x128xf32> -> vector<4x128xf32>
    %64 = vector.broadcast %1 : vector<1x128xf32> to vector<4x128xf32>
    %65 = arith.addf %63, %64 : vector<4x128xf32>
    %66 = math.tanh %65 : vector<4x128xf32>
    %cst_36 = arith.constant dense<0.000000e+00> : vector<4x4xf32>
    %67 = tpu.matmul %66, %2, %cst_36 {dimension_numbers = #tpu.dot_dimension_numbers<[1], [0], [0], [1], [0, 0, 1, 1], [], []>, precision = #tpu.contract_precision<fp32>} : vector<4x128xf32>, vector<128x4xf32>, vector<4x4xf32> -> vector<4x4xf32>
    %cst_37 = arith.constant dense<0xFF800000> : vector<4xf32>
    %68 = vector.multi_reduction <maximumf>, %67, %cst_37 [1] : vector<4x4xf32> to vector<4xf32>
    %69 = vector.shape_cast %68 : vector<4xf32> to vector<4x1xf32>
    %70 = vector.broadcast %69 : vector<4x1xf32> to vector<4x4xf32>
    %71 = arith.subf %67, %70 : vector<4x4xf32>
    %72 = math.exp %71 : vector<4x4xf32>
    %cst_38 = arith.constant dense<0.000000e+00> : vector<4xf32>
    %73 = vector.multi_reduction <add>, %72, %cst_38 [1] : vector<4x4xf32> to vector<4xf32>
    %74 = vector.shape_cast %73 : vector<4xf32> to vector<4x1xf32>
    %75 = vector.broadcast %74 : vector<4x1xf32> to vector<4x4xf32>
    %76 = arith.divf %72, %75 : vector<4x4xf32>
    %cst_39 = arith.constant dense<0.000000e+00> : vector<4x128xf32>
    %77 = tpu.matmul %76, %3, %cst_39 {dimension_numbers = #tpu.dot_dimension_numbers<[1], [0], [0], [1], [0, 0, 1, 1], [], []>, precision = #tpu.contract_precision<fp32>} : vector<4x4xf32>, vector<4x128xf32>, vector<4x128xf32> -> vector<4x128xf32>
    %78 = arith.mulf %77, %62 : vector<4x128xf32>
    %cst_40 = arith.constant dense<0.000000e+00> : vector<4x32xf32>
    %79 = tpu.matmul %78, %4, %cst_40 {dimension_numbers = #tpu.dot_dimension_numbers<[1], [0], [0], [1], [0, 0, 1, 1], [], []>, precision = #tpu.contract_precision<fp32>} : vector<4x128xf32>, vector<128x32xf32>, vector<4x32xf32> -> vector<4x32xf32>
    %c0_41 = arith.constant 0 : index
    %c96 = arith.constant 96 : index
    %80 = vector.load %arg7[%c0_41, %c96] : memref<4x128xf32, #tpu.memory_space<vmem>>, vector<4x32xf32>
    tpu.vector_store %arg7[%c0_41, %c96], %79 {strides = array<i32>} : memref<4x128xf32, #tpu.memory_space<vmem>>, vector<4x32xf32>,
    return
  }
  func.func @transform_0(%arg0: i32) -> (i32, i32) {
    %c0_i32 = arith.constant 0 : i32
    %c0_i32_0 = arith.constant 0 : i32
    return %arg0, %c0_i32 : i32, i32
  }
  func.func @transform_1(%arg0: i32) -> (i32, i32) {
    %c0_i32 = arith.constant 0 : i32
    %c0_i32_0 = arith.constant 0 : i32
    %c0_i32_1 = arith.constant 0 : i32
    return %c0_i32, %c0_i32_0 : i32, i32
  }
  func.func @transform_2(%arg0: i32) -> (i32, i32) {
    %c0_i32 = arith.constant 0 : i32
    %c0_i32_0 = arith.constant 0 : i32
    %c0_i32_1 = arith.constant 0 : i32
    return %c0_i32, %c0_i32_0 : i32, i32
  }
  func.func @transform_3(%arg0: i32) -> (i32, i32) {
    %c0_i32 = arith.constant 0 : i32
    %c0_i32_0 = arith.constant 0 : i32
    %c0_i32_1 = arith.constant 0 : i32
    return %c0_i32, %c0_i32_0 : i32, i32
  }
  func.func @transform_4(%arg0: i32) -> (i32, i32) {
    %c0_i32 = arith.constant 0 : i32
    %c0_i32_0 = arith.constant 0 : i32
    %c0_i32_1 = arith.constant 0 : i32
    return %c0_i32, %c0_i32_0 : i32, i32
  }
  func.func @transform_5(%arg0: i32) -> (i32, i32) {
    %c0_i32 = arith.constant 0 : i32
    %c0_i32_0 = arith.constant 0 : i32
    %c0_i32_1 = arith.constant 0 : i32
    return %c0_i32, %c0_i32_0 : i32, i32
  }
  func.func @transform_6(%arg0: i32) -> (i32, i32) {
    %c0_i32 = arith.constant 0 : i32
    %c0_i32_0 = arith.constant 0 : i32
    return %arg0, %c0_i32 : i32, i32
  }
}

</mosaic_0001>

<bundles_post_ra>
// kernel: tpu_custom_call.1
= control target key start
LH: loop header
LB: loop body
LE: loop exit
PB: predicated region body
PF: predicated region fallthrough
CT: control target
= control target key end

     0   :  { %s7022_s0 = inlined_call_operand.vmem [shape: f32[4,512], index: 0, kind: input, shape index: {}]   ;;  %s7023_s1 = inlined_call_operand.vmem [shape: f32[128,128], index: 1, kind: input, shape index: {}]   ;;  %s7024_s2 = inlined_call_operand.vmem [shape: f32[1,128], index: 2, kind: input, shape index: {}]   ;;  %s7025_s3 = inlined_call_operand.vmem [shape: f32[128,4], index: 3, kind: input, shape index: {}]   ;;  %s7026_s4 = inlined_call_operand.vmem [shape: f32[4,128], index: 4, kind: input, shape index: {}]   ;;  %s7027_s5 = inlined_call_operand.vmem [shape: f32[128,32], index: 5, kind: input, shape index: {}]   ;;  %s7028_s6 = inlined_call_operand.hbm [shape: f32[4,128], index: 6, kind: output, shape index: {}]  }
   0x1   :  { %v39_v0 = vld [vmem:[%s7023_s1 + $0x78] sm:$0xff]  ;;  %v38_v1 = vld [vmem:[%s7023_s1 + $0x70] sm:$0xff]  ;;  %v37_v2 = vld [vmem:[%s7023_s1 + $0x68] sm:$0xff] }
   0x2   :  { %v5021_v3 = vand.u32 4294901760, %v39_v0  ;;  %v5023_v4 = vand.u32 4294901760, %v38_v1  ;;  %v5025_v5 = vand.u32 4294901760, %v37_v2  ;;  %v36_v6 = vld [vmem:[%s7023_s1 + $0x60] sm:$0xff]  ;;  %v35_v7 = vld [vmem:[%s7023_s1 + $0x58] sm:$0xff]  ;;  %v34_v8 = vld [vmem:[%s7023_s1 + $0x50] sm:$0xff] }
   0x3   :  { %v5036_v9 = vand.u32 4294901760, %v36_v6  ;;  %v5038_v10 = vand.u32 4294901760, %v35_v7  ;;  %v5040_v11 = vand.u32 4294901760, %v34_v8  ;;  %v33_v12 = vld [vmem:[%s7023_s1 + $0x48] sm:$0xff]  ;;  %v32_v13 = vld [vmem:[%s7023_s1 + $0x40] sm:$0xff]  ;;  %v31_v21 = vld [vmem:[%s7023_s1 + $0x38] sm:$0xff] }
   0x4   :  { %7399 = vst [vmem:[#allocation5_spill] sm:$0xff] %v5025_v5  ;;  %79 = vmatpush.msra.mxu0 %v5021_v3  ;;  %v5050_v14 = vsub.f32 %v39_v0, %v5021_v3  ;;  %v5053_v15 = vsub.f32 %v38_v1, %v5023_v4  ;;  %v5056_v16 = vsub.f32 %v37_v2, %v5025_v5  ;;  %v5058_v17 = vand.u32 4294901760, %v33_v12 }
   0x5   :  { %7400 = vst [vmem:[#allocation6_spill] sm:$0xff] %v5036_v9  ;;  %275 = vmatpush.msra.mxu3 %v5021_v3  ;;  %v5062_v18 = vsub.f32 %v36_v6, %v5036_v9  ;;  %v5065_v19 = vsub.f32 %v35_v7, %v5038_v10  ;;  %v5067_v20 = vand.u32 4294901760, %v32_v13  ;;  %v5083_v25 = vsub.f32 %v34_v8, %v5040_v11 }
   0x6   :  { %7401 = vst [vmem:[#allocation7_spill] sm:$0xff] %v5038_v10  ;;  %81 = vmatpush.msra.mxu0 %v5023_v4  ;;  %v5074_v22 = vand.u32 4294901760, %v5050_v14  ;;  %v5077_v23 = vand.u32 4294901760, %v5053_v15  ;;  %v5080_v24 = vand.u32 4294901760, %v5056_v16  ;;  %222 = vmatpush.msra.mxu2 %v5050_v14  ;;  %v5093_v28 = vsub.f32 %v33_v12, %v5058_v17 }
   0x7   :  { %7402 = vst [vmem:[#allocation8_spill] sm:$0xff] %v5040_v11  ;;  %v5087_v26 = vand.u32 4294901760, %v5062_v18  ;;  %v5090_v27 = vand.u32 4294901760, %v5065_v19  ;;  %277 = vmatpush.msra.mxu3 %v5023_v4 }
   0x8   :  { %7403 = vst [vmem:[#allocation9_spill] sm:$0xff] %v5050_v14 }
   0x9   :  { %7404 = vst [vmem:[#allocation10_spill] sm:$0xff] %v5053_v15 }
   0xa   :  { %7405 = vst [vmem:[#allocation11_spill] sm:$0xff] %v5056_v16 }
   0xb   :  { %7406 = vst [vmem:[#allocation12_spill] sm:$0xff] %v5058_v17 }
   0xc   :  { %7407 = vst [vmem:[#allocation13_spill] sm:$0xff] %v5062_v18 }
   0xd   :  { %7408 = vst [vmem:[#allocation14_spill] sm:$0xff] %v5065_v19 }
   0xe   :  { %7409 = vst [vmem:[#allocation15_spill] sm:$0xff] %v5067_v20 }
   0xf   :  { %7410 = vst [vmem:[#allocation16_spill] sm:$0xff] %v5074_v22 }
  0x10   :  { %7411 = vst [vmem:[#allocation17_spill] sm:$0xff] %v5077_v23 }
  0x11   :  { %7412 = vst [vmem:[#allocation18_spill] sm:$0xff] %v5080_v24 }
  0x12   :  { %7413 = vst [vmem:[#allocation19_spill] sm:$0xff] %v5083_v25 }
  0x13   :  { %7414 = vst [vmem:[#allocation20_spill] sm:$0xff] %v5087_v26 }
  0x14   :  { %7415 = vst [vmem:[#allocation21_spill] sm:$0xff] %v5090_v27 }
  0x15   :  { %7416 = vst [vmem:[#allocation22_spill] sm:$0xff] %v5093_v28 }
  0x16   :  { %11 = vsyncpa [#allocation3], 0  ;;  %v122_v29 = vsub.f32 %v5050_v14, %v5074_v22  ;;  %83 = vmatpush.msra.mxu0 %v5025_v5  ;;  %v128_v30 = vsub.f32 %v5053_v15, %v5077_v23  ;;  %v134_v31 = vsub.f32 %v5056_v16, %v5080_v24  ;;  %v5103_v32 = vand.u32 4294901760, %v31_v21  ;;  %225 = vmatpush.msra.mxu2 %v5053_v15  ;;  %v30_v34 = vld [vmem:[%s7023_s1 + $0x30] sm:$0xff]  ;;  %v29_v35 = vld [vmem:[%s7023_s1 + $0x28] sm:$0xff]  ;;  %s4973_s27 = smov 32  }
  0x17   :  { %v5107_v33 = vsub.f32 %v32_v13, %v5067_v20  ;;  %279 = vmatpush.msra.mxu3 %v5025_v5  ;;  %v140_v38 = vsub.f32 %v5062_v18, %v5087_v26  ;;  %v5124_v39 = vand.u32 4294901760, %v5083_v25  ;;  %v146_v40 = vsub.f32 %v5065_v19, %v5090_v27  ;;  %v28_v42 = vld [vmem:[%s7023_s1 + $0x20] sm:$0xff]  ;;  %v27_v47 = vld [vmem:[%s7023_s1 + $0x18] sm:$0xff]  ;;  %v26_v53 = vld [vmem:[%s7023_s1 + $0x10] sm:$0xff]  ;;  %s4975_s30 = smov 96   ;;  %s4976_s7 = smov [#allocation2]  }
  0x18   :  { %7417 = vst [vmem:[#allocation23_spill] sm:$0xff] %v5103_v32  ;;  %v5116_v36 = vand.u32 4294901760, %v122_v29  ;;  %v5118_v37 = vand.u32 4294901760, %v128_v30  ;;  %85 = vmatpush.msra.mxu0 %v5036_v9  ;;  %228 = vmatpush.msra.mxu2 %v5056_v16  ;;  %v5130_v41 = vand.u32 4294901760, %v5093_v28  ;;  %v5137_v43 = vand.u32 4294901760, %v134_v31  ;;  %v25_v61 = vld [vmem:[%s7023_s1 + $0x8] sm:$0xff] }
  0x19   :  { %7418 = vst [vmem:[#allocation24_spill] sm:$0xff] %v5107_v33  ;;  %281 = vmatpush.msra.mxu3 %v5036_v9  ;;  %v5140_v44 = vand.u32 4294901760, %v30_v34  ;;  %v5143_v45 = vsub.f32 %v31_v21, %v5103_v32  ;;  %v5145_v46 = vand.u32 4294901760, %v29_v35  ;;  %v5151_v48 = vand.u32 4294901760, %v5107_v33  ;;  %v24_v2 = vld [vmem:[%s7023_s1] sm:$0xff]  ;;  %v50_v16 = vld [vmem:[%s7025_s3 + $0x48] sm:$0xff] }
  0x1a   :  { %7419 = vst [vmem:[#allocation25_spill] sm:$0xff] %v5116_v36  ;;  %124 = vmatpush.msra.mxu1 %v5116_v36  ;;  %87 = vmatpush.msra.mxu0 %v5038_v10  ;;  %v5156_v49 = vand.u32 4294901760, %v140_v38  ;;  %v152_v50 = vsub.f32 %v5083_v25, %v5124_v39  ;;  %v5164_v52 = vand.u32 4294901760, %v28_v42  ;;  %v5169_v54 = vand.u32 4294901760, %v27_v47  ;;  %v74_v29 = vld [vmem:[%s7022_s0] sm:$0xf] }
  0x1b   :  { %7420 = vst [vmem:[#allocation26_spill] sm:$0xff] %v5118_v37  ;;  %231 = vmatpush.msra.mxu2 %v5062_v18  ;;  %283 = vmatpush.msra.mxu3 %v5038_v10  ;;  %v5162_v51 = vsub.f32 %v30_v34, %v5140_v44  ;;  %v5174_v55 = vand.u32 4294901760, %v146_v40  ;;  %v158_v56 = vsub.f32 %v5093_v28, %v5130_v41  ;;  %v5180_v57 = vand.u32 4294901760, %v5143_v45  ;;  %s4904_s8 = sshll.u32 %s4976_s7, 4  ;;  %s4906_s11 = sshll.u32 %s7028_s6, 4  ;;  %s4905_s8 = int_to_ptr.vmem [resolvable:$true] %s4904_s8  ;;  %s4907_s11 = int_to_ptr.hbm [resolvable:$true] %s4906_s11 }
  0x1c   :  { %7421 = vst [vmem:[#allocation27_spill] sm:$0xff] %v5124_v39  ;;  %130 = vmatpush.msra.mxu1 %v5118_v37  ;;  %89 = vmatpush.msra.mxu0 %v5040_v11  ;;  %v5183_v58 = vsub.f32 %v29_v35, %v5145_v46  ;;  %v164_v59 = vsub.f32 %v5107_v33, %v5151_v48  ;;  %v5187_v60 = vand.u32 4294901760, %v26_v53  ;;  %v5195_v62 = vand.u32 4294901760, %v152_v50 }
  0x1d   :  { %7422 = vst [vmem:[#allocation28_spill] sm:$0xff] %v5130_v41  ;;  %234 = vmatpush.msra.mxu2 %v5065_v19  ;;  %285 = vmatpush.msra.mxu3 %v5040_v11  ;;  %v5199_v63 = vand.u32 4294901760, %v5162_v51  ;;  %v5202_v0 = vsub.f32 %v28_v42, %v5164_v52  ;;  %v5205_v1 = vsub.f32 %v27_v47, %v5169_v54  ;;  %v5213_v6 = vand.u32 4294901760, %v158_v56 }
  0x1e   :  { %7423 = vst [vmem:[#allocation29_spill] sm:$0xff] %v5137_v43  ;;  %136 = vmatpush.msra.mxu1 %v5137_v43  ;;  %91 = vmatpush.msra.mxu0 %v5058_v17  ;;  %v170_v7 = vsub.f32 %v5143_v45, %v5180_v57  ;;  %v5219_v8 = vand.u32 4294901760, %v5183_v58  ;;  %v5221_v12 = vand.u32 4294901760, %v25_v61  ;;  %v5223_v13 = vand.u32 4294901760, %v164_v59 }
  0x1f   :  { %7424 = vst [vmem:[#allocation30_spill] sm:$0xff] %v5140_v44  ;;  %237 = vmatpush.msra.mxu2 %v5083_v25  ;;  %287 = vmatpush.msra.mxu3 %v5058_v17  ;;  %v5226_v21 = vsub.f32 %v26_v53, %v5187_v60  ;;  %v176_v30 = vsub.f32 %v5162_v51, %v5199_v63  ;;  %v5238_v31 = vand.u32 4294901760, %v5202_v0  ;;  %v5240_v34 = vand.u32 4294901760, %v24_v2 }
  0x20   :  { %7425 = vst [vmem:[#allocation31_spill] sm:$0xff] %v5143_v45  ;;  %142 = vmatpush.msra.mxu1 %v5156_v49  ;;  %93 = vmatpush.msra.mxu0 %v5067_v20  ;;  %v5242_v35 = vand.u32 4294901760, %v74_v29  ;;  %v5245_v38 = vand.u32 4294901760, %v5205_v1  ;;  %v5250_v40 = vand.u32 4294901760, %v170_v7  ;;  %v182_v42 = vsub.f32 %v5183_v58, %v5219_v8 }
  0x21   :  { %7426 = vst [vmem:[#allocation32_spill] sm:$0xff] %v5151_v48  ;;  %240 = vmatpush.msra.mxu2 %v5093_v28  ;;  %289 = vmatpush.msra.mxu3 %v5067_v20  ;;  %v5256_v47 = vsub.f32 %v25_v61, %v5221_v12  ;;  %v5262_v53 = vand.u32 4294901760, %v176_v30  ;;  %v188_v56 = vsub.f32 %v5202_v0, %v5238_v31  ;;  %v5268_v59 = vand.u32 4294901760, %v5226_v21  ;;  %v51_v28 = vld [vmem:[%s7025_s3 + $0x50] sm:$0xff] }
  0x22   :  { %7427 = vst [vmem:[#allocation33_spill] sm:$0xff] %v5156_v49  ;;  %148 = vmatpush.msra.mxu1 %v5174_v55  ;;  %95 = vmatpush.msra.mxu0 %v5103_v32  ;;  %v111_v50 = vsub.f32 %v74_v29, %v5242_v35  ;;  %v5271_v61 = vsub.f32 %v24_v2, %v5240_v34  ;;  %v5276_v7 = vand.u32 4294901760, %v182_v42  ;;  %v5357_v18 = vand.u32 4294901760, %v51_v28 }
  0x23   :  { %7428 = vst [vmem:[#allocation34_spill] sm:$0xff] %v5162_v51  ;;  %243 = vmatpush.msra.mxu2 %v5107_v33  ;;  %291 = vmatpush.msra.mxu3 %v5103_v32  ;;  %v194_v29 = vsub.f32 %v5205_v1, %v5245_v38  ;;  %v5282_v30 = vand.u32 4294901760, %v5256_v47  ;;  %v5287_v2 = vand.u32 4294901760, %v188_v56  ;;  %v200_v42 = vsub.f32 %v5226_v21, %v5268_v59 }
  0x24   :  { %7429 = vst [vmem:[#allocation35_spill] sm:$0xff] %v5164_v52  ;;  %154 = vmatpush.msra.mxu1 %v5195_v62  ;;  %97 = vmatpush.msra.mxu0 %v5140_v44  ;;  %vm761_vm0 = vcmask 27648   ;;  %vm790_vm1 = vcmask 1043456   ;;  %vm786_vm6 = vcmask 31744   ;;  %vm1282_vm7 = vcmask 257024  }
  0x25   :  { %7430 = vst [vmem:[#allocation36_spill] sm:$0xff] %v5174_v55  ;;  %246 = vmatpush.msra.mxu2 %v5143_v45  ;;  %293 = vmatpush.msra.mxu3 %v5140_v44  ;;  %v206_v56 = vsub.f32 %v5256_v47, %v5282_v30  ;;  %v5306_v33 = vand.u32 4294901760, %v200_v42  ;;  %vm2487_vm12 = vcmask 519424  }
  0x26   :  { %7431 = vst [vmem:[#allocation37_spill] sm:$0xff] %v5180_v57  ;;  %160 = vmatpush.msra.mxu1 %v5213_v6  ;;  %99 = vmatpush.msra.mxu0 %v5145_v46 }
  0x27   :  { %7432 = vst [vmem:[#allocation38_spill] sm:$0xff] %v5183_v58  ;;  %249 = vmatpush.msra.mxu2 %v5162_v51  ;;  %295 = vmatpush.msra.mxu3 %v5145_v46  ;;  %v112_v51 = vand.u32 4294901760, %v111_v50 }
  0x28   :  { %7433 = vst [vmem:[#allocation39_spill] sm:$0xff] %v5195_v62  ;;  %166 = vmatpush.msra.mxu1 %v5223_v13  ;;  %101 = vmatpush.msra.mxu0 %v5164_v52 }
  0x29   :  { %7434 = vst [vmem:[#allocation40_spill] sm:$0xff] %v5199_v63  ;;  %252 = vmatpush.msra.mxu2 %v5183_v58  ;;  %297 = vmatpush.msra.mxu3 %v5164_v52  ;;  %v5293_v58 = vand.u32 4294901760, %v5271_v61  ;;  %v113_v45 = vsub.f32 %v111_v50, %v112_v51 }
  0x2a   :  { %7435 = vst [vmem:[#allocation41_spill] sm:$0xff] %v5202_v0  ;;  %172 = vmatpush.msra.mxu1 %v5250_v40  ;;  %103 = vmatpush.msra.mxu0 %v5169_v54 }
  0x2b   :  { %7436 = vst [vmem:[#allocation42_spill] sm:$0xff] %v5205_v1  ;;  %255 = vmatpush.msra.mxu2 %v5202_v0  ;;  %299 = vmatpush.msra.mxu3 %v5169_v54  ;;  %v5298_v0 = vand.u32 4294901760, %v194_v29  ;;  %v212_v29 = vsub.f32 %v5271_v61, %v5293_v58 }
  0x2c   :  { %7437 = vst [vmem:[#allocation43_spill] sm:$0xff] %v5213_v6  ;;  %178 = vmatpush.msra.mxu1 %v5262_v53  ;;  %105 = vmatpush.msra.mxu0 %v5187_v60 }
  0x2d   :  { %7438 = vst [vmem:[#allocation44_spill] sm:$0xff] %v5219_v8  ;;  %258 = vmatpush.msra.mxu2 %v5205_v1  ;;  %301 = vmatpush.msra.mxu3 %v5187_v60  ;;  %v5314_v1 = vand.u32 4294901760, %v206_v56  ;;  %v5320_v42 = vand.u32 4294901760, %v212_v29  ;;  %v55_v56 = vld [vmem:[%s7025_s3 + $0x70] sm:$0xff] }
  0x2e   :  { %7439 = vst [vmem:[#allocation45_spill] sm:$0xff] %v5223_v13  ;;  %184 = vmatpush.msra.mxu1 %v5276_v7  ;;  %107 = vmatpush.msra.mxu0 %v5221_v12 }
  0x2f   :  { %7440 = vst [vmem:[#allocation46_spill] sm:$0xff] %v5226_v21  ;;  %261 = vmatpush.msra.mxu2 %v5226_v21  ;;  %303 = vmatpush.msra.mxu3 %v5221_v12  ;;  %v114_v21 = vand.u32 4294901760, %v113_v45  ;;  %v56_v45 = vld [vmem:[%s7025_s3 + $0x78] sm:$0xff] }
  0x30   :  { %7441 = vst [vmem:[#allocation47_spill] sm:$0xff] %v5238_v31  ;;  %190 = vmatpush.msra.mxu1 %v5287_v2  ;;  %109 = vmatpush.msra.mxu0 %v5240_v34 }
  0x31   :  { %7442 = vst [vmem:[#allocation48_spill] sm:$0xff] %v5245_v38  ;;  %264 = vmatpush.msra.mxu2 %v5256_v47  ;;  %305 = vmatpush.msra.mxu3 %v5240_v34 }
  0x32   :  { %7443 = vst [vmem:[#allocation49_spill] sm:$0xff] %v5250_v40  ;;  %316 = vmatpush.msrb.mxu0 %v5074_v22  ;;  %196 = vmatpush.msra.mxu1 %v5298_v0 }
  0x33   :  { %7444 = vst [vmem:[#allocation50_spill] sm:$0xff] %v5256_v47  ;;  %267 = vmatpush.msra.mxu2 %v5271_v61  ;;  %309 = vmatmul.f32.vlgmr.msra.gmra.mxu3 %v112_v51  ;;  %v5337_v51 = vand.u32 4294901760, %v56_v45  ;;  %v52_v47 = vld [vmem:[%s7025_s3 + $0x58] sm:$0xff] }
  0x34   :  { %7445 = vst [vmem:[#allocation51_spill] sm:$0xff] %v5262_v53  ;;  %320 = vmatpush.msrb.mxu0 %v5077_v23  ;;  %202 = vmatpush.msra.mxu1 %v5306_v33  ;;  %v5355_v19 = vand.u32 4294901760, %v52_v47 }
  0x35   :  { %7446 = vst [vmem:[#allocation52_spill] sm:$0xff] %v5268_v59  ;;  %270 = vmatmul.f32.vlgmr.msra.gmra.mxu2 %v111_v50  ;;  %115 = vmatmul.f32.vlgmr.msra.gmra.mxu0 %v114_v21  ;;  %v54_v50 = vld [vmem:[%s7025_s3 + $0x68] sm:$0xff]  ;;  %v5339_v21 = vand.u32 4294901760, %v55_v56  ;;  %v5368_v15 = vsub.f32 %v56_v45, %v5337_v51 }
  0x36   :  { %7447 = vst [vmem:[#allocation53_spill] sm:$0xff] %v5271_v61  ;;  %324 = vmatpush.msrb.mxu0 %v5080_v24  ;;  %208 = vmatpush.msra.mxu1 %v5314_v1  ;;  %v5341_v29 = vand.u32 4294901760, %v54_v50  ;;  %v53_v61 = vld [vmem:[%s7025_s3 + $0x60] sm:$0xff]  ;;  %v5376_v24 = vand.u32 4294901760, %v50_v16  ;;  %v5383_v22 = vsub.f32 %v52_v47, %v5355_v19  ;;  %v5403_v47 = vsub.f32 %v51_v28, %v5357_v18  ;;  %v48_v28 = vld [vmem:[%s7025_s3 + $0x38] sm:$0xff] }
  0x37   :  { %7448 = vst [vmem:[#allocation54_spill] sm:$0xff] %v5276_v7  ;;  %v5353_v25 = vand.u32 4294901760, %v53_v61  ;;  %421 = vmatpush.msrb.mxu2 %v5337_v51  ;;  %v5388_v45 = vand.u32 4294901760, %v5368_v15  ;;  %v46_v7 = vld [vmem:[%s7025_s3 + $0x28] sm:$0xff] }
  0x38   :  { %7449 = vst [vmem:[#allocation55_spill] sm:$0xff] %v5282_v30  ;;  %328 = vmatpush.msrb.mxu0 %v5087_v26  ;;  %214 = vmatpush.msra.mxu1 %v5320_v42  ;;  %v5371_v26 = vsub.f32 %v55_v56, %v5339_v21  ;;  %v5374_v14 = vsub.f32 %v54_v50, %v5341_v29  ;;  %v5441_v13 = vand.u32 4294901760, %v5403_v47 }
  0x39   :  { %7450 = vst [vmem:[#allocation56_spill] sm:$0xff] %v5287_v2  ;;  %216 = vmatmul.f32.vlgmr.msra.gmra.mxu1 %v5242_v35  ;;  %v5379_v23 = vsub.f32 %v53_v61, %v5353_v25  ;;  %423 = vmatpush.msrb.mxu2 %v5339_v21 }
  0x3a   :  { %7451 = vst [vmem:[#allocation57_spill] sm:$0xff] %v5293_v58  ;;  %383 = vmatpush.msrb.mxu1 %v5021_v3  ;;  %332 = vmatpush.msrb.mxu0 %v5090_v27  ;;  %v49_v27 = vld [vmem:[%s7025_s3 + $0x40] sm:$0xff]  ;;  %v5391_v56 = vand.u32 4294901760, %v5371_v26  ;;  %v5394_v50 = vand.u32 4294901760, %v5374_v14 }
  0x3b   :  { %7452 = vst [vmem:[#allocation58_spill] sm:$0xff] %v5298_v0  ;;  %v5396_v61 = vand.u32 4294901760, %v49_v27  ;;  %v5417_v0 = vand.u32 4294901760, %v5383_v22  ;;  %425 = vmatpush.msrb.mxu2 %v5341_v29 }
  0x3c   :  { %7453 = vst [vmem:[#allocation59_spill] sm:$0xff] %v5306_v33  ;;  %385 = vmatpush.msrb.mxu1 %v5023_v4  ;;  %336 = vmatpush.msrb.mxu0 %v5124_v39  ;;  %v5399_v39 = vand.u32 4294901760, %v5379_v23  ;;  %v476_v33 = vsub.f32 %v5374_v14, %v5394_v50 }
  0x3d   :  { %7454 = vst [vmem:[#allocation60_spill] sm:$0xff] %v5314_v1  ;;  %v5412_v1 = vsub.f32 %v50_v16, %v5376_v24  ;;  %v5431_v2 = vsub.f32 %v49_v27, %v5396_v61  ;;  %427 = vmatpush.msrb.mxu2 %v5353_v25  ;;  %v488_v62 = vsub.f32 %v5383_v22, %v5417_v0 }
  0x3e   :  { %7455 = vst [vmem:[#allocation61_spill] sm:$0xff] %v5320_v42  ;;  %387 = vmatpush.msrb.mxu1 %v5025_v5  ;;  %340 = vmatpush.msrb.mxu0 %v5130_v41  ;;  %v464_v41 = vsub.f32 %v5368_v15, %v5388_v45  ;;  %v470_v42 = vsub.f32 %v5371_v26, %v5391_v56  ;;  %v5457_v6 = vand.u32 4294901760, %v476_v33  ;;  %v44_v33 = vld [vmem:[%s7025_s3 + $0x18] sm:$0xff] }
  0x3f   :  { %7456 = vst [vmem:[#allocation62_spill] sm:$0xff] %v5339_v21  ;;  %v482_v40 = vsub.f32 %v5379_v23, %v5399_v39  ;;  %v5447_v27 = vand.u32 4294901760, %v5412_v1  ;;  %429 = vmatpush.msrb.mxu2 %v5355_v19 }
  0x40   :  { %7457 = vst [vmem:[#allocation63_spill] sm:$0xff] %v5341_v29  ;;  %389 = vmatpush.msrb.mxu1 %v5036_v9  ;;  %344 = vmatpush.msrb.mxu0 %v5151_v48  ;;  %v47_v48 = vld [vmem:[%s7025_s3 + $0x30] sm:$0xff]  ;;  %v5428_v16 = vand.u32 4294901760, %v464_v41  ;;  %v5436_v53 = vand.u32 4294901760, %v470_v42  ;;  %v5449_v41 = vand.u32 4294901760, %v48_v28  ;;  %v45_v42 = vld [vmem:[%s7025_s3 + $0x20] sm:$0xff] }
  0x41   :  { %7458 = vst [vmem:[#allocation64_spill] sm:$0xff] %v5353_v25  ;;  %431 = vmatpush.msrb.mxu2 %v5357_v18 }
  0x42   :  { %7459 = vst [vmem:[#allocation65_spill] sm:$0xff] %v5355_v19  ;;  %391 = vmatpush.msrb.mxu1 %v5038_v10  ;;  %348 = vmatpush.msrb.mxu0 %v5180_v57  ;;  %v5451_v57 = vand.u32 4294901760, %v47_v48  ;;  %v5470_v55 = vsub.f32 %v48_v28, %v5449_v41  ;;  %v494_v10 = vsub.f32 %v5403_v47, %v5441_v13 }
  0x43   :  { %7460 = vst [vmem:[#allocation66_spill] sm:$0xff] %v5357_v18  ;;  %466 = vmatpush.msrb.mxu3 %v5428_v16  ;;  %v500_v28 = vsub.f32 %v5412_v1, %v5447_v27  ;;  %433 = vmatpush.msrb.mxu2 %v5376_v24 }
  0x44   :  { %7461 = vst [vmem:[#allocation67_spill] sm:$0xff] %v5368_v15  ;;  %393 = vmatpush.msrb.mxu1 %v5040_v11  ;;  %352 = vmatpush.msrb.mxu0 %v5199_v63  ;;  %v5462_v63 = vand.u32 4294901760, %v46_v7  ;;  %v5467_v11 = vand.u32 4294901760, %v5431_v2 }
  0x45   :  { %7462 = vst [vmem:[#allocation68_spill] sm:$0xff] %v5371_v26  ;;  %472 = vmatpush.msrb.mxu3 %v5436_v53  ;;  %435 = vmatpush.msrb.mxu2 %v5396_v61  ;;  %v5526_v9 = vand.u32 4294901760, %v500_v28 }
  0x46   :  { %7463 = vst [vmem:[#allocation69_spill] sm:$0xff] %v5374_v14  ;;  %395 = vmatpush.msrb.mxu1 %v5058_v17  ;;  %356 = vmatpush.msrb.mxu0 %v5219_v8  ;;  %v5482_v8 = vsub.f32 %v47_v48, %v5451_v57  ;;  %v5484_v17 = vand.u32 4294901760, %v45_v42  ;;  %v5497_v48 = vand.u32 4294901760, %v5470_v55  ;;  %v506_v49 = vsub.f32 %v5431_v2, %v5467_v11 }
  0x47   :  { %7464 = vst [vmem:[#allocation70_spill] sm:$0xff] %v5376_v24  ;;  %478 = vmatpush.msrb.mxu3 %v5457_v6  ;;  %437 = vmatpush.msrb.mxu2 %v5449_v41 }
  0x48   :  { %7465 = vst [vmem:[#allocation71_spill] sm:$0xff] %v5379_v23  ;;  %397 = vmatpush.msrb.mxu1 %v5067_v20  ;;  %360 = vmatpush.msrb.mxu0 %v5238_v31  ;;  %v5501_v20 = vsub.f32 %v46_v7, %v5462_v63  ;;  %v5503_v31 = vand.u32 4294901760, %v44_v33  ;;  %v5516_v7 = vand.u32 4294901760, %v5482_v8  ;;  %v5545_v28 = vand.u32 4294901760, %v506_v49 }
  0x49   :  { %7466 = vst [vmem:[#allocation72_spill] sm:$0xff] %v5383_v22  ;;  %439 = vmatpush.msrb.mxu2 %v5451_v57 }
  0x4a   :  { %7467 = vst [vmem:[#allocation73_spill] sm:$0xff] %v5388_v45  ;;  %399 = vmatpush.msrb.mxu1 %v5103_v32  ;;  %364 = vmatpush.msrb.mxu0 %v5245_v38  ;;  %v5520_v32 = vsub.f32 %v45_v42, %v5484_v17  ;;  %v5535_v42 = vand.u32 4294901760, %v5501_v20 }
  0x4b   :  { %7468 = vst [vmem:[#allocation74_spill] sm:$0xff] %v5391_v56  ;;  %441 = vmatpush.msrb.mxu2 %v5462_v63 }
  0x4c   :  { %7469 = vst [vmem:[#allocation75_spill] sm:$0xff] %v5394_v50  ;;  %401 = vmatpush.msrb.mxu1 %v5140_v44  ;;  %368 = vmatpush.msrb.mxu0 %v5268_v59  ;;  %v5539_v44 = vsub.f32 %v44_v33, %v5503_v31  ;;  %v5551_v5 = vand.u32 4294901760, %v5520_v32 }
  0x4d   :  { %7470 = vst [vmem:[#allocation76_spill] sm:$0xff] %v5396_v61  ;;  %443 = vmatpush.msrb.mxu2 %v5484_v17 }
  0x4e   :  { %7471 = vst [vmem:[#allocation77_spill] sm:$0xff] %v5399_v39  ;;  %403 = vmatpush.msrb.mxu1 %v5145_v46  ;;  %372 = vmatpush.msrb.mxu0 %v5282_v30  ;;  %v5568_v30 = vand.u32 4294901760, %v5539_v44 }
  0x4f   :  { %7472 = vst [vmem:[#allocation78_spill] sm:$0xff] %v5403_v47  ;;  %445 = vmatpush.msrb.mxu2 %v5503_v31 }
  0x50   :  { %7473 = vst [vmem:[#allocation79_spill] sm:$0xff] %v5412_v1  ;;  %405 = vmatpush.msrb.mxu1 %v5164_v52  ;;  %376 = vmatpush.msrb.mxu0 %v5293_v58 }
  0x51   :  { %7474 = vst [vmem:[#allocation80_spill] sm:$0xff] %v5417_v0  ;;  %378 = vmatmul.f32.vlgmr.msrb.gmra.mxu0 %v5242_v35 }
  0x52   :  { %7475 = vst [vmem:[#allocation81_spill] sm:$0xff] %v5428_v16  ;;  %v5476_v16 = vand.u32 4294901760, %v482_v40  ;;  %v43_v40 = vld [vmem:[%s7025_s3 + $0x10] sm:$0xff]  ;;  %407 = vmatpush.msrb.mxu1 %v5169_v54  ;;  %564 = vmatpush.msra.mxu0 %v5368_v15 }
  0x53   :  { %7476 = vst [vmem:[#allocation82_spill] sm:$0xff] %v5431_v2  ;;  %v5522_v38 = vand.u32 4294901760, %v43_v40 }
  0x54   :  { %7477 = vst [vmem:[#allocation83_spill] sm:$0xff] %v5436_v53  ;;  %v5494_v53 = vand.u32 4294901760, %v488_v62  ;;  %v42_v62 = vld [vmem:[%s7025_s3 + $0x8] sm:$0xff]  ;;  %484 = vmatpush.msrb.mxu3 %v5476_v16  ;;  %409 = vmatpush.msrb.mxu1 %v5187_v60 }
  0x55   :  { %7478 = vst [vmem:[#allocation84_spill] sm:$0xff] %v5441_v13  ;;  %v5541_v59 = vand.u32 4294901760, %v42_v62  ;;  %v5555_v33 = vsub.f32 %v43_v40, %v5522_v38  ;;  %567 = vmatpush.msra.mxu0 %v5371_v26  ;;  %447 = vmatpush.msrb.mxu2 %v5522_v38 }
  0x56   :  { %7479 = vst [vmem:[#allocation85_spill] sm:$0xff] %v5447_v27  ;;  %490 = vmatpush.msrb.mxu3 %v5494_v53  ;;  %411 = vmatpush.msrb.mxu1 %v5221_v12 }
  0x57   :  { %7480 = vst [vmem:[#allocation86_spill] sm:$0xff] %v5449_v41  ;;  %v5571_v40 = vsub.f32 %v42_v62, %v5541_v59  ;;  %570 = vmatpush.msra.mxu0 %v5374_v14  ;;  %449 = vmatpush.msrb.mxu2 %v5541_v59 }
  0x58   :  { %7481 = vst [vmem:[#allocation87_spill] sm:$0xff] %v5451_v57  ;;  %413 = vmatpush.msrb.mxu1 %v5240_v34 }
  0x59   :  { %7482 = vst [vmem:[#allocation88_spill] sm:$0xff] %v5457_v6  ;;  %v5513_v6 = vand.u32 4294901760, %v494_v10  ;;  %v41_v10 = vld [vmem:[%s7025_s3] sm:$0xff]  ;;  %573 = vmatpush.msra.mxu0 %v5379_v23  ;;  %415 = vmatmul.f32.vlgmr.msrb.gmra.mxu1 %v5242_v35 }
  0x5a   :  { %7483 = vst [vmem:[#allocation89_spill] sm:$0xff] %v5462_v63  ;;  %v5557_v43 = vand.u32 4294901760, %v41_v10  ;;  %617 = vmatpush.msra.mxu1 %v5337_v51 }
  0x5b   :  { %7484 = vst [vmem:[#allocation90_spill] sm:$0xff] %v5467_v11  ;;  %496 = vmatpush.msrb.mxu3 %v5513_v6  ;;  %576 = vmatpush.msra.mxu0 %v5383_v22 }
  0x5c   :  { %7485 = vst [vmem:[#allocation91_spill] sm:$0xff] %v5470_v55  ;;  %v5585_v52 = vsub.f32 %v41_v10, %v5557_v43  ;;  %619 = vmatpush.msra.mxu1 %v5339_v21  ;;  %451 = vmatpush.msrb.mxu2 %v5557_v43 }
  0x5d   :  { %7486 = vst [vmem:[#allocation92_spill] sm:$0xff] %v5476_v16  ;;  %v512_v16 = vsub.f32 %v5470_v55, %v5497_v48  ;;  %502 = vmatpush.msrb.mxu3 %v5526_v9  ;;  %579 = vmatpush.msra.mxu0 %v5403_v47 }
  0x5e   :  { %7487 = vst [vmem:[#allocation93_spill] sm:$0xff] %v5482_v8  ;;  %621 = vmatpush.msra.mxu1 %v5341_v29  ;;  %658 = vmatpush.msra.mxu2 %v5388_v45 }
  0x5f   :  { %7488 = vst [vmem:[#allocation94_spill] sm:$0xff] %v5484_v17  ;;  %v5563_v49 = vand.u32 4294901760, %v512_v16  ;;  %508 = vmatpush.msrb.mxu3 %v5545_v28  ;;  %v530_v16 = vsub.f32 %v5520_v32, %v5551_v5  ;;  %582 = vmatpush.msra.mxu0 %v5412_v1 }
  0x60   :  { %7489 = vst [vmem:[#allocation95_spill] sm:$0xff] %v5494_v53  ;;  %v518_v53 = vsub.f32 %v5482_v8, %v5516_v7  ;;  %623 = vmatpush.msra.mxu1 %v5353_v25  ;;  %662 = vmatpush.msra.mxu2 %v5391_v56 }
  0x61   :  { %7490 = vst [vmem:[#allocation96_spill] sm:$0xff] %v5497_v48  ;;  %514 = vmatpush.msrb.mxu3 %v5563_v49  ;;  %v5601_v10 = vand.u32 4294901760, %v530_v16  ;;  %585 = vmatpush.msra.mxu0 %v5431_v2 }
  0x62   :  { %7491 = vst [vmem:[#allocation97_spill] sm:$0xff] %v5501_v20  ;;  %v5576_v58 = vand.u32 4294901760, %v518_v53  ;;  %v536_v53 = vsub.f32 %v5539_v44, %v5568_v30  ;;  %625 = vmatpush.msra.mxu1 %v5355_v19  ;;  %666 = vmatpush.msra.mxu2 %v5394_v50 }
  0x63   :  { %7492 = vst [vmem:[#allocation98_spill] sm:$0xff] %v5503_v31  ;;  %588 = vmatpush.msra.mxu0 %v5470_v55 }
  0x64   :  { %7493 = vst [vmem:[#allocation99_spill] sm:$0xff] %v5513_v6  ;;  %v524_v6 = vsub.f32 %v5501_v20, %v5535_v42  ;;  %520 = vmatpush.msrb.mxu3 %v5576_v58  ;;  %v5613_v14 = vand.u32 4294901760, %v536_v53  ;;  %627 = vmatpush.msra.mxu1 %v5357_v18 }
  0x65   :  { %7494 = vst [vmem:[#allocation100_spill] sm:$0xff] %v5516_v7  ;;  %591 = vmatpush.msra.mxu0 %v5482_v8  ;;  %670 = vmatpush.msra.mxu2 %v5399_v39 }
  0x66   :  { %7495 = vst [vmem:[#allocation101_spill] sm:$0xff] %v5520_v32  ;;  %v5590_v62 = vand.u32 4294901760, %v524_v6  ;;  %629 = vmatpush.msra.mxu1 %v5376_v24 }
  0x67   :  { %7496 = vst [vmem:[#allocation102_spill] sm:$0xff] %v5522_v38  ;;  %594 = vmatpush.msra.mxu0 %v5501_v20  ;;  %674 = vmatpush.msra.mxu2 %v5417_v0 }
  0x68   :  { %7497 = vst [vmem:[#allocation103_spill] sm:$0xff] %v5526_v9  ;;  %v5581_v9 = vand.u32 4294901760, %v5555_v33  ;;  %526 = vmatpush.msrb.mxu3 %v5590_v62  ;;  %631 = vmatpush.msra.mxu1 %v5396_v61 }
  0x69   :  { %7498 = vst [vmem:[#allocation104_spill] sm:$0xff] %v5535_v42  ;;  %597 = vmatpush.msra.mxu0 %v5520_v32  ;;  %678 = vmatpush.msra.mxu2 %v5441_v13 }
  0x6a   :  { %7499 = vst [vmem:[#allocation105_spill] sm:$0xff] %v5539_v44  ;;  %v542_v6 = vsub.f32 %v5555_v33, %v5581_v9  ;;  %532 = vmatpush.msrb.mxu3 %v5601_v10  ;;  %633 = vmatpush.msra.mxu1 %v5449_v41 }
  0x6b   :  { %7500 = vst [vmem:[#allocation106_spill] sm:$0xff] %v5541_v59  ;;  %600 = vmatpush.msra.mxu0 %v5539_v44  ;;  %682 = vmatpush.msra.mxu2 %v5447_v27 }
  0x6c   :  { %7501 = vst [vmem:[#allocation107_spill] sm:$0xff] %v5545_v28  ;;  %v5595_v28 = vand.u32 4294901760, %v5571_v40  ;;  %538 = vmatpush.msrb.mxu3 %v5613_v14  ;;  %635 = vmatpush.msra.mxu1 %v5451_v57 }
  0x6d   :  { %7502 = vst [vmem:[#allocation108_spill] sm:$0xff] %v5551_v5  ;;  %603 = vmatpush.msra.mxu0 %v5555_v33  ;;  %686 = vmatpush.msra.mxu2 %v5467_v11 }
  0x6e   :  { %7503 = vst [vmem:[#allocation109_spill] sm:$0xff] %v5555_v33  ;;  %v548_v16 = vsub.f32 %v5571_v40, %v5595_v28  ;;  %637 = vmatpush.msra.mxu1 %v5462_v63 }
  0x6f   :  { %7504 = vst [vmem:[#allocation110_spill] sm:$0xff] %v5557_v43  ;;  %606 = vmatpush.msra.mxu0 %v5571_v40  ;;  %690 = vmatpush.msra.mxu2 %v5497_v48 }
  0x70   :  { %7505 = vst [vmem:[#allocation111_spill] sm:$0xff] %v5563_v49  ;;  %v5606_v49 = vand.u32 4294901760, %v5585_v52  ;;  %v5628_v35 = vand.u32 4294901760, %v548_v16  ;;  %639 = vmatpush.msra.mxu1 %v5484_v17 }
  0x71   :  { %7506 = vst [vmem:[#allocation112_spill] sm:$0xff] %v5568_v30  ;;  %609 = vmatpush.msra.mxu0 %v5585_v52  ;;  %694 = vmatpush.msra.mxu2 %v5516_v7 }
  0x72   :  { %7507 = vst [vmem:[#allocation113_spill] sm:$0xff] %v5571_v40  ;;  %v554_v23 = vsub.f32 %v5585_v52, %v5606_v49  ;;  %641 = vmatpush.msra.mxu1 %v5503_v31 }
  0x73   :  { %7508 = vst [vmem:[#allocation114_spill] sm:$0xff] %v5576_v58  ;;  %v5620_v58 = vand.u32 4294901760, %v542_v6  ;;  %698 = vmatpush.msra.mxu2 %v5535_v42 }
  0x74   :  { %7509 = vst [vmem:[#allocation115_spill] sm:$0xff] %v5581_v9  ;;  %v5634_v53 = vand.u32 4294901760, %v554_v23  ;;  %643 = vmatpush.msra.mxu1 %v5522_v38  ;;  %v4919_v23 = vld [vmem:[%s7024_s2] ss:$0 sm:$0xff] }
  0x75   :  { %7510 = vst [vmem:[#allocation116_spill] sm:$0xff] %v5585_v52  ;;  %544 = vmatpush.msrb.mxu3 %v5620_v58  ;;  %702 = vmatpush.msra.mxu2 %v5551_v5  ;;  %v68_v52 = vld [vmem:[%s7027_s5 + $0x50] sm:$0xff] }
  0x76   :  { %7511 = vst [vmem:[#allocation117_spill] sm:$0xff] %v5590_v62  ;;  %645 = vmatpush.msra.mxu1 %v5541_v59 }
  0x77   :  { %7512 = vst [vmem:[#allocation118_spill] sm:$0xff] %v5595_v28  ;;  %550 = vmatpush.msrb.mxu3 %v5628_v35  ;;  %706 = vmatpush.msra.mxu2 %v5568_v30 }
  0x78   :  { %7513 = vst [vmem:[#allocation119_spill] sm:$0xff] %v5601_v10  ;;  %647 = vmatpush.msra.mxu1 %v5557_v43 }
  0x79   :  { %7514 = vst [vmem:[#allocation120_spill] sm:$0xff] %v5606_v49  ;;  %556 = vmatpush.msrb.mxu3 %v5634_v53  ;;  %710 = vmatpush.msra.mxu2 %v5581_v9 }
  0x7a   :  { %7515 = vst [vmem:[#allocation121_spill] sm:$0xff] %v5613_v14  ;;  %v63_v14 = vld [vmem:[%s7027_s5 + $0x28] sm:$0xff] }
  0x7b   :  { %7516 = vst [vmem:[#allocation122_spill] sm:$0xff] %v5620_v58  ;;  %725 = vmatpush.msra.mxu3 %v5337_v51  ;;  %714 = vmatpush.msra.mxu2 %v5595_v28 }
  0x7c   :  { %7517 = vst [vmem:[#allocation123_spill] sm:$0xff] %v5628_v35  ;;  %v64_v35 = vld [vmem:[%s7027_s5 + $0x30] sm:$0xff] }
  0x7d   :  { %7518 = vst [vmem:[#allocation124_spill] sm:$0xff] %v5634_v53  ;;  %727 = vmatpush.msra.mxu3 %v5339_v21  ;;  %718 = vmatpush.msra.mxu2 %v5606_v49  ;;  %v65_v53 = vld [vmem:[%s7027_s5 + $0x38] sm:$0xff]  ;;  %v5842_v8 = vand.u32 4294901760, %v64_v35 }
  0x7e   :  { %v5825_v58 = vand.u32 4294901760, %v65_v53 }
  0x7f   :  { %729 = vmatpush.msra.mxu3 %v5341_v29 }
  0x81   :  { %731 = vmatpush.msra.mxu3 %v5353_v25 }
  0x83   :  { %733 = vmatpush.msra.mxu3 %v5355_v19 }
  0x85   :  { %735 = vmatpush.msra.mxu3 %v5357_v18 }
  0x87   :  { %737 = vmatpush.msra.mxu3 %v5376_v24 }
  0x89   :  { %739 = vmatpush.msra.mxu3 %v5396_v61 }
  0x8b   :  { %741 = vmatpush.msra.mxu3 %v5449_v41 }
  0x8d   :  { %743 = vmatpush.msra.mxu3 %v5451_v57  ;;  %v5857_v57 = vand.u32 4294901760, %v63_v14 }
  0x8f   :  { %745 = vmatpush.msra.mxu3 %v5462_v63 }
  0x91   :  { %747 = vmatpush.msra.mxu3 %v5484_v17 }
  0x93   :  { %749 = vmatpush.msra.mxu3 %v5503_v31 }
  0x95   :  { %751 = vmatpush.msra.mxu3 %v5522_v38 }
  0x97   :  { %753 = vmatpush.msra.mxu3 %v5541_v59  ;;  %v66_v59 = vld [vmem:[%s7027_s5 + $0x40] sm:$0xff] }
  0x98   :  { %v5807_v44 = vand.u32 4294901760, %v66_v59 }
  0x99   :  { %755 = vmatpush.msra.mxu3 %v5557_v43 }
  0xb2   :  { %v116_v6 = vpop.f32.mrf.mxu0 }
  0xb3   :  { %v117_v16 = vadd.f32 %v4919_v23, %v116_v6 }
  0xb6   :  { %v217_v30 = vpop.f32.mrf.mxu1  ;;  %v310_v7 = vpop.f32.mrf.mxu3 }
  0xb7   :  { %v218_v9 = vadd.f32 %v217_v30, %v117_v16 }
  0xb8   :  { %v271_v5 = vpop.f32.mrf.mxu2 }
  0xb9   :  { %v272_v42 = vadd.f32 %v271_v5, %v218_v9 }
  0xbb   :  { %v311_v28 = vadd.f32 %v310_v7, %v272_v42 }
  0xce   :  { %v379_v48 = vpop.f32.mrf.mxu0 }
  0xcf   :  { %v380_v11 = vadd.f32 %v379_v48, %v311_v28 }
  0xd6   :  { %v416_v27 = vpop.f32.mrf.mxu1 }
  0xd7   :  { %v417_v49 = vadd.f32 %v416_v27, %v380_v11 }
  0xd9   :  { %4920 = vtanh.f32 %v417_v49 }
  0xdf   :  { %v4921_v13 = vpop.eup %4920 }
  0xe0   :  { %v452_v0 = vand.u32 4294901760, %v4921_v13 }
  0xe2   :  { %558 = vmatmul.f32.vlgmr.msrb.gmra.mxu3 %v452_v0  ;;  %v453_v39 = vsub.f32 %v4921_v13, %v452_v0 }
  0xe4   :  { %612 = vmatmul.f32.vlgmr.msra.gmra.mxu0 %v453_v39  ;;  %v454_v50 = vand.u32 4294901760, %v453_v39 }
  0xe6   :  { %651 = vmatmul.f32.vlgmr.msra.gmra.mxu1 %v454_v50  ;;  %v455_v56 = vsub.f32 %v453_v39, %v454_v50 }
  0xe8   :  { %v456_v23 = vand.u32 4294901760, %v455_v56 }
  0xea   :  { %457 = vmatmul.f32.vlgmr.msrb.gmra.mxu2 %v456_v23  ;;  %757 = vmatmul.f32.vlgmr.msra.gmra.mxu3 %v452_v0  ;;  %v57_v23 = vld [vmem:[%s7026_s4] sm:$0xf] }
  0xf2   :  { %720 = vmatmul.f32.vlgmr.msra.gmra.mxu2 %v452_v0 }
 0x161   :  { %v613_v7 = vpop.f32.mrf.mxu0 }
 0x163   :  { %v652_v42 = vpop.f32.mrf.mxu1 }
 0x165   :  { %v559_v5 = vpop.f32.mrf.mxu3 }
 0x16d   :  { %v458_v9 = vpop.f32.mrf.mxu2  ;;  %v758_v49 = vpop.f32.mrf.mxu3 }
 0x16e   :  { %v560_v30 = vadd.f32 %v559_v5, %v458_v9  ;;  %v792_v5 = vsel %vm790_vm1, %v57_v23, 0  ;;  %v72_v23 = vld [vmem:[%s7027_s5 + $0x70] sm:$0xff] }
 0x16f   :  { %v5701_v9 = vand.u32 4294901760, %v792_v5 }
 0x170   :  { %v614_v48 = vadd.f32 %v613_v7, %v560_v30 }
 0x171   :  { %7519 = vst [vmem:[#allocation125_spill] sm:$0xff] %v5701_v9  ;;  %v5704_v30 = vsub.f32 %v792_v5, %v5701_v9  ;;  %810 = vmatpush.msrb.mxu2 %v5701_v9  ;;  %v71_v5 = vld [vmem:[%s7027_s5 + $0x68] sm:$0xff] }
 0x172   :  { %v653_v11 = vadd.f32 %v652_v42, %v614_v48 }
 0x173   :  { %7520 = vst [vmem:[#allocation126_spill] sm:$0xff] %v5704_v30  ;;  %v5708_v7 = vand.u32 4294901760, %v5704_v30  ;;  %863 = vmatpush.msra.mxu2 %v5704_v30 }
 0x175   :  { %v721_v27 = vpop.f32.mrf.mxu2  ;;  %7521 = vst [vmem:[#allocation127_spill] sm:$0xff] %v5708_v7  ;;  %v838_v48 = vsub.f32 %v5704_v30, %v5708_v7 }
 0x176   :  { %v722_v28 = vadd.f32 %v721_v27, %v653_v11 }
 0x177   :  { %v5713_v42 = vand.u32 4294901760, %v838_v48 }
 0x178   :  { %v759_v13 = vadd.f32 %v758_v49, %v722_v28 }
 0x179   :  { %7522 = vst [vmem:[#allocation128_spill] sm:$0xff] %v5713_v42  ;;  %840 = vmatpush.msrb.mxu3 %v5713_v42 }
 0x17a   :  { %v762_v6 = vsel %vm761_vm0, %v759_v13, -inf }
 0x17b   :  { %763 = vmax.xlane.f32.xlu0 %v762_v6  ;;  %886 = vmatpush.msra.mxu3 %v5701_v9 }
 0x1ee   :  { %v764_v39 = vpop.xlane.xlu0 %763 }
 0x1ef   :  { %v765_v56 = vsub.f32 %v759_v13, %v764_v39 }
 0x1f1   :  { %v766_v50 = vmul.f32 1.442695, %v765_v56 }
 0x1f3   :  { %4922 = vpow2.f32 %v766_v50 }
 0x1f9   :  { %v4923_v0 = vpop.eup %4922 }
 0x1fa   :  { %v768_v16 = vsel %vm761_vm0, %v4923_v0, 0.0 }
 0x1fb   :  { %769 = vadd.xlane.f32.xlu0 %v768_v16  ;;  %v73_v16 = vld [vmem:[%s7027_s5 + $0x78] sm:$0xff] }
 0x26e   :  { %v770_v11 = vpop.xlane.xlu0 %769 }
 0x26f   :  { %4924 = vrcp.f32 %v770_v11  ;;  %v780_v13 = vand.u32 2147483647, %v770_v11  ;;  %v782_v6 = vand.u32 2147483648, %v770_v11  ;;  %vm776_vm3 = vweird.f32 %v770_v11 }
 0x271   :  { %vm781_vm5 = vcmp.eq.f32.partialorder %v780_v13, 8.507059e+37  ;;  %v783_v50 = vor.u32 1.1754944e-38, %v782_v6  ;;  %v70_v13 = vld [vmem:[%s7027_s5 + $0x60] sm:$0xff]  ;;  %v69_v6 = vld [vmem:[%s7027_s5 + $0x58] sm:$0xff] }
 0x272   :  { %v5750_v45 = vand.u32 4294901760, %v69_v6 }
 0x274   :  { %v5780_v40 = vsub.f32 %v69_v6, %v5750_v45 }
 0x275   :  { %v4925_v27 = vpop.eup %4924 }
 0x276   :  { %v772_v28 = vmul.f32 %v4925_v27, %v770_v11  ;;  %vm777_vm2 = vweird.f32 %v4925_v27  ;;  %v5728_v11 = vand.u32 4294901760, %v72_v23  ;;  %7529 = vst [vmem:[#allocation135_spill] sm:$0xff] %v5780_v40 }
 0x277   :  { %vm778_vm4 = vmor %vm776_vm3, %vm777_vm2  ;;  %vm3692_vm2 = vcmask 781824  }
 0x278   :  { %v773_v49 = vsub.f32 1.0, %v772_v28  ;;  %v5726_v28 = vand.u32 4294901760, %v73_v16 }
 0x27a   :  { %v774_v39 = vmul.f32 %v4925_v27, %v773_v49  ;;  %v5730_v49 = vand.u32 4294901760, %v71_v5  ;;  %v5739_v42 = vsub.f32 %v73_v16, %v5726_v28  ;;  %1138 = vmatpush.msrb.mxu1 %v5726_v28 }
 0x27c   :  { %v775_v56 = vadd.f32 %v4925_v27, %v774_v39  ;;  %7523 = vst [vmem:[#allocation129_spill] sm:$0xff] %v5739_v42  ;;  %v5757_v16 = vsub.f32 %v71_v5, %v5730_v49  ;;  %1085 = vmatpush.msrb.mxu0 %v5739_v42  ;;  %1140 = vmatpush.msrb.mxu1 %v5728_v11 }
 0x27e   :  { %v779_v48 = vsel %vm778_vm4, %v4925_v27, %v775_v56  ;;  %v5742_v27 = vsub.f32 %v72_v23, %v5728_v11  ;;  %v5744_v56 = vand.u32 4294901760, %v70_v13  ;;  %7526 = vst [vmem:[#allocation132_spill] sm:$0xff] %v5757_v16  ;;  %v5789_v33 = vand.u32 4294901760, %v5757_v16  ;;  %1142 = vmatpush.msrb.mxu1 %v5730_v49 }
 0x27f   :  { %v784_v39 = vsel %vm781_vm5, %v783_v50, %v779_v48  ;;  %v5763_v48 = vand.u32 4294901760, %v68_v52 }
 0x280   :  { %v785_v30 = vmul.f32 %v4923_v0, %v784_v39  ;;  %7524 = vst [vmem:[#allocation130_spill] sm:$0xff] %v5742_v27  ;;  %v5754_v0 = vand.u32 4294901760, %v5739_v42  ;;  %v67_v39 = vld [vmem:[%s7027_s5 + $0x48] sm:$0xff]  ;;  %v5772_v43 = vsub.f32 %v70_v13, %v5744_v56  ;;  %1088 = vmatpush.msrb.mxu0 %v5742_v27  ;;  %1144 = vmatpush.msrb.mxu1 %v5744_v56 }
 0x281   :  { %7530 = vst [vmem:[#allocation136_spill] sm:$0xff] %v5789_v33  ;;  %v5791_v38 = vand.u32 4294901760, %v67_v39  ;;  %v5796_v6 = vsub.f32 %v68_v52, %v5763_v48  ;;  %v5812_v52 = vand.u32 4294901760, %v5780_v40 }
 0x282   :  { %v788_v50 = vsel %vm786_vm6, %v785_v30, 0  ;;  %7525 = vst [vmem:[#allocation131_spill] sm:$0xff] %v5754_v0  ;;  %v5769_v30 = vand.u32 4294901760, %v5742_v27  ;;  %v985_v13 = vsub.f32 %v5739_v42, %v5754_v0  ;;  %1091 = vmatpush.msrb.mxu0 %v5757_v16  ;;  %1146 = vmatpush.msrb.mxu1 %v5750_v45 }
 0x283   :  { %v5761_v23 = vand.u32 4294901760, %v788_v50  ;;  %7528 = vst [vmem:[#allocation134_spill] sm:$0xff] %v5772_v43  ;;  %v5823_v17 = vsub.f32 %v67_v39, %v5791_v38  ;;  %v5829_v63 = vand.u32 4294901760, %v5796_v6 }
 0x284   :  { %7527 = vst [vmem:[#allocation133_spill] sm:$0xff] %v5769_v30  ;;  %v991_v42 = vsub.f32 %v5742_v27, %v5769_v30  ;;  %1094 = vmatpush.msrb.mxu0 %v5772_v43  ;;  %v5818_v32 = vand.u32 4294901760, %v985_v13  ;;  %v997_v27 = vsub.f32 %v5757_v16, %v5789_v33  ;;  %v5840_v16 = vsub.f32 %v66_v59, %v5807_v44 }
 0x285   :  { %v5776_v5 = vsub.f32 %v788_v50, %v5761_v23  ;;  %842 = vmatmul.f32.vlgmr.msrb.gmra.mxu3 %v5761_v23  ;;  %7531 = vst [vmem:[#allocation137_spill] sm:$0xff] %v5796_v6  ;;  %v5855_v59 = vsub.f32 %v65_v53, %v5825_v58  ;;  %1148 = vmatpush.msrb.mxu1 %v5763_v48 }
 0x286   :  { %934 = vmatpush.msrb.mxu3 %v5701_v9  ;;  %v5805_v9 = vand.u32 4294901760, %v5772_v43  ;;  %7533 = vst [vmem:[#allocation139_spill] sm:$0xff] %v5812_v52  ;;  %1097 = vmatpush.msrb.mxu0 %v5780_v40  ;;  %v5835_v13 = vand.u32 4294901760, %v991_v42  ;;  %v5849_v42 = vand.u32 4294901760, %v997_v27  ;;  %v1015_v27 = vsub.f32 %v5796_v6, %v5829_v63 }
 0x287   :  { %v813_v50 = vand.u32 4294901760, %v5776_v5  ;;  %7534 = vst [vmem:[#allocation140_spill] sm:$0xff] %v5818_v32  ;;  %1150 = vmatpush.msrb.mxu1 %v5791_v38 }
 0x288   :  { %7532 = vst [vmem:[#allocation138_spill] sm:$0xff] %v5805_v9  ;;  %v1003_v39 = vsub.f32 %v5772_v43, %v5805_v9  ;;  %1100 = vmatpush.msrb.mxu0 %v5796_v6  ;;  %v5852_v43 = vand.u32 4294901760, %v5823_v17 }
 0x289   :  { %v814_v31 = vsub.f32 %v5776_v5, %v813_v50  ;;  %7535 = vst [vmem:[#allocation141_spill] sm:$0xff] %v5823_v17  ;;  %1152 = vmatpush.msrb.mxu1 %v5807_v44 }
 0x28a   :  { %7536 = vst [vmem:[#allocation142_spill] sm:$0xff] %v5829_v63  ;;  %1103 = vmatpush.msrb.mxu0 %v5823_v17 }
 0x28b   :  { %v815_v20 = vand.u32 4294901760, %v814_v31  ;;  %7537 = vst [vmem:[#allocation143_spill] sm:$0xff] %v5835_v13  ;;  %v1009_v31 = vsub.f32 %v5780_v40, %v5812_v52  ;;  %1154 = vmatpush.msrb.mxu1 %v5825_v58 }
 0x28c   :  { %7538 = vst [vmem:[#allocation144_spill] sm:$0xff] %v5840_v16  ;;  %1106 = vmatpush.msrb.mxu0 %v5840_v16 }
 0x28d   :  { %816 = vmatmul.f32.vlgmr.msrb.gmra.mxu2 %v815_v20  ;;  %890 = vmatmul.f32.vlgmr.msra.gmra.mxu3 %v813_v50  ;;  %7539 = vst [vmem:[#allocation145_spill] sm:$0xff] %v5849_v42  ;;  %v5862_v20 = vand.u32 4294901760, %v1003_v39  ;;  %v5867_v50 = vand.u32 4294901760, %v5840_v16  ;;  %v5875_v53 = vand.u32 4294901760, %v1009_v31  ;;  %v1021_v39 = vsub.f32 %v5823_v17, %v5852_v43  ;;  %v58_v17 = vld [vmem:[%s7027_s5] sm:$0xff] }
 0x28e   :  { %912 = vmatpush.msrb.mxu2 %v5708_v7  ;;  %987 = vmatpush.msra.mxu3 %v5818_v32  ;;  %7540 = vst [vmem:[#allocation146_spill] sm:$0xff] %v5852_v43  ;;  %v5870_v32 = vsub.f32 %v64_v35, %v5842_v8  ;;  %v5883_v7 = vsub.f32 %v63_v14, %v5857_v57  ;;  %v5888_v35 = vand.u32 4294901760, %v1015_v27  ;;  %v6000_v10 = vand.u32 4294901760, %v58_v17 }
 0x28f   :  { %7541 = vst [vmem:[#allocation147_spill] sm:$0xff] %v5855_v59  ;;  %1109 = vmatpush.msrb.mxu0 %v5855_v59  ;;  %v1027_v31 = vsub.f32 %v5840_v16, %v5867_v50  ;;  %v5899_v14 = vand.u32 4294901760, %v1021_v39  ;;  %1156 = vmatpush.msrb.mxu1 %v5842_v8 }
 0x290   :  { %993 = vmatpush.msra.mxu3 %v5835_v13  ;;  %7542 = vst [vmem:[#allocation148_spill] sm:$0xff] %v5862_v20  ;;  %v5880_v13 = vand.u32 4294901760, %v5855_v59 }
 0x291   :  { %7543 = vst [vmem:[#allocation149_spill] sm:$0xff] %v5867_v50  ;;  %1112 = vmatpush.msrb.mxu0 %v5870_v32  ;;  %1158 = vmatpush.msrb.mxu1 %v5857_v57 }
 0x292   :  { %7544 = vst [vmem:[#allocation150_spill] sm:$0xff] %v5870_v32  ;;  %999 = vmatpush.msra.mxu3 %v5849_v42  ;;  %v5893_v42 = vand.u32 4294901760, %v5870_v32  ;;  %v1033_v27 = vsub.f32 %v5855_v59, %v5880_v13 }
 0x293   :  { %7545 = vst [vmem:[#allocation151_spill] sm:$0xff] %v5875_v53  ;;  %1115 = vmatpush.msrb.mxu0 %v5883_v7 }
 0x294   :  { %7546 = vst [vmem:[#allocation152_spill] sm:$0xff] %v5880_v13  ;;  %1005 = vmatpush.msra.mxu3 %v5862_v20  ;;  %v5904_v20 = vand.u32 4294901760, %v5883_v7  ;;  %v1039_v39 = vsub.f32 %v5870_v32, %v5893_v42 }
 0x295   :  { %7547 = vst [vmem:[#allocation153_spill] sm:$0xff] %v5883_v7  ;;  %866 = vmatmul.f32.vlgmr.msra.gmra.mxu2 %v5776_v5  ;;  %936 = vmatmul.f32.vlgmr.msrb.gmra.mxu3 %v5761_v23  ;;  %v5910_v5 = vand.u32 4294901760, %v1027_v31 }
 0x296   :  { %7548 = vst [vmem:[#allocation154_spill] sm:$0xff] %v5888_v35  ;;  %942 = vmatpush.msra.mxu2 %v5726_v28  ;;  %1011 = vmatpush.msra.mxu3 %v5875_v53  ;;  %v5918_v53 = vand.u32 4294901760, %v1033_v27  ;;  %v1045_v59 = vsub.f32 %v5883_v7, %v5904_v20  ;;  %v5925_v31 = vand.u32 4294901760, %v1039_v39  ;;  %v61_v27 = vld [vmem:[%s7027_s5 + $0x18] sm:$0xff] }
 0x297   :  { %7549 = vst [vmem:[#allocation155_spill] sm:$0xff] %v5893_v42 }
 0x298   :  { %7550 = vst [vmem:[#allocation156_spill] sm:$0xff] %v5899_v14  ;;  %944 = vmatpush.msra.mxu2 %v5728_v11  ;;  %1017 = vmatpush.msra.mxu3 %v5888_v35 }
 0x299   :  { %7551 = vst [vmem:[#allocation157_spill] sm:$0xff] %v5904_v20 }
 0x29a   :  { %7552 = vst [vmem:[#allocation158_spill] sm:$0xff] %v5910_v5  ;;  %946 = vmatpush.msra.mxu2 %v5730_v49  ;;  %1023 = vmatpush.msra.mxu3 %v5899_v14  ;;  %v5930_v14 = vand.u32 4294901760, %v1045_v59 }
 0x29b   :  { %7553 = vst [vmem:[#allocation159_spill] sm:$0xff] %v5918_v53 }
 0x29c   :  { %948 = vmatpush.msra.mxu2 %v5744_v56  ;;  %1029 = vmatpush.msra.mxu3 %v5910_v5  ;;  %7554 = vst [vmem:[#allocation160_spill] sm:$0xff] %v5925_v31 }
 0x29d   :  { %914 = vmatmul.f32.vlgmr.msrb.gmra.mxu2 %v5761_v23  ;;  %7555 = vst [vmem:[#allocation161_spill] sm:$0xff] %v5930_v14  ;;  %v62_v23 = vld [vmem:[%s7027_s5 + $0x20] sm:$0xff] }
 0x29e   :  { %950 = vmatpush.msra.mxu2 %v5750_v45  ;;  %1035 = vmatpush.msra.mxu3 %v5918_v53  ;;  %v5943_v59 = vand.u32 4294901760, %v62_v23 }
 0x2a0   :  { %952 = vmatpush.msra.mxu2 %v5763_v48  ;;  %1041 = vmatpush.msra.mxu3 %v5925_v31  ;;  %v5950_v39 = vsub.f32 %v62_v23, %v5943_v59  ;;  %v60_v31 = vld [vmem:[%s7027_s5 + $0x10] sm:$0xff]  ;;  %v59_v23 = vld [vmem:[%s7027_s5 + $0x8] sm:$0xff] }
 0x2a1   :  { %1160 = vmatpush.msrb.mxu1 %v5943_v59  ;;  %v5965_v35 = vand.u32 4294901760, %v60_v31  ;;  %v5981_v16 = vand.u32 4294901760, %v59_v23 }
 0x2a2   :  { %954 = vmatpush.msra.mxu2 %v5791_v38  ;;  %1047 = vmatpush.msra.mxu3 %v5930_v14  ;;  %7556 = vst [vmem:[#allocation162_spill] sm:$0xff] %v5950_v39  ;;  %v5952_v14 = vand.u32 4294901760, %v61_v27  ;;  %v5959_v53 = vand.u32 4294901760, %v5950_v39 }
 0x2a3   :  { %1118 = vmatpush.msrb.mxu0 %v5950_v39 }
 0x2a4   :  { %956 = vmatpush.msra.mxu2 %v5807_v44  ;;  %7557 = vst [vmem:[#allocation163_spill] sm:$0xff] %v5959_v53  ;;  %v5963_v5 = vsub.f32 %v61_v27, %v5952_v14  ;;  %1162 = vmatpush.msrb.mxu1 %v5952_v14  ;;  %v1051_v7 = vsub.f32 %v5950_v39, %v5959_v53 }
 0x2a5   :  { %v5979_v27 = vsub.f32 %v60_v31, %v5965_v35  ;;  %v5997_v31 = vsub.f32 %v59_v23, %v5981_v16  ;;  %v6014_v23 = vsub.f32 %v58_v17, %v6000_v10 }
 0x2a6   :  { %958 = vmatpush.msra.mxu2 %v5825_v58  ;;  %7558 = vst [vmem:[#allocation164_spill] sm:$0xff] %v5963_v5  ;;  %v5975_v32 = vand.u32 4294901760, %v5963_v5  ;;  %1121 = vmatpush.msrb.mxu0 %v5963_v5  ;;  %v5988_v6 = vand.u32 4294901760, %v1051_v7 }
 0x2a7   :  { %7560 = vst [vmem:[#allocation166_spill] sm:$0xff] %v5979_v27  ;;  %1164 = vmatpush.msrb.mxu1 %v5965_v35  ;;  %v5993_v40 = vand.u32 4294901760, %v5979_v27  ;;  %v6009_v55 = vand.u32 4294901760, %v5997_v31 }
 0x2a8   :  { %960 = vmatpush.msra.mxu2 %v5842_v8  ;;  %7559 = vst [vmem:[#allocation165_spill] sm:$0xff] %v5975_v32  ;;  %v1057_v39 = vsub.f32 %v5963_v5, %v5975_v32  ;;  %1124 = vmatpush.msrb.mxu0 %v5979_v27 }
 0x2a9   :  { %7561 = vst [vmem:[#allocation167_spill] sm:$0xff] %v5988_v6  ;;  %1166 = vmatpush.msrb.mxu1 %v5981_v16  ;;  %1053 = vmatpush.msra.mxu3 %v5988_v6  ;;  %v1063_v5 = vsub.f32 %v5979_v27, %v5993_v40  ;;  %v6024_v27 = vand.u32 4294901760, %v6014_v23 }
 0x2aa   :  { %962 = vmatpush.msra.mxu2 %v5857_v57  ;;  %7562 = vst [vmem:[#allocation168_spill] sm:$0xff] %v5993_v40  ;;  %v6004_v7 = vand.u32 4294901760, %v1057_v39  ;;  %1127 = vmatpush.msrb.mxu0 %v5997_v31  ;;  %v1069_v39 = vsub.f32 %v5997_v31, %v6009_v55 }
 0x2ab   :  { %7563 = vst [vmem:[#allocation169_spill] sm:$0xff] %v5997_v31  ;;  %1168 = vmatpush.msrb.mxu1 %v6000_v10  ;;  %v6018_v6 = vand.u32 4294901760, %v1063_v5  ;;  %v1075_v5 = vsub.f32 %v6014_v23, %v6024_v27 }
 0x2ac   :  { %964 = vmatpush.msra.mxu2 %v5943_v59  ;;  %7564 = vst [vmem:[#allocation170_spill] sm:$0xff] %v6004_v7  ;;  %1059 = vmatpush.msra.mxu3 %v6004_v7  ;;  %v6029_v17 = vand.u32 4294901760, %v1069_v39  ;;  %v7572_v39 = vld [vmem:[#allocation5_spill] sm:$0xff]  ;;  %v7580_v7 = vld [vmem:[#allocation43_spill] sm:$0xff] }
 0x2ad   :  { %7565 = vst [vmem:[#allocation171_spill] sm:$0xff] %v6009_v55  ;;  %1130 = vmatpush.msrb.mxu0 %v6014_v23  ;;  %1331 = vmatpush.msra.mxu1 %v5116_v36 }
 0x2ae   :  { %966 = vmatpush.msra.mxu2 %v5952_v14  ;;  %7566 = vst [vmem:[#allocation172_spill] sm:$0xff] %v6014_v23  ;;  %1065 = vmatpush.msra.mxu3 %v6018_v6 }
 0x2af   :  { %7567 = vst [vmem:[#allocation173_spill] sm:$0xff] %v6018_v6  ;;  %1286 = vmatpush.msra.mxu0 %v5021_v3  ;;  %1337 = vmatpush.msra.mxu1 %v5118_v37  ;;  %v7571_v6 = vld [vmem:[#allocation29_spill] sm:$0xff] }
 0x2b0   :  { %968 = vmatpush.msra.mxu2 %v5965_v35  ;;  %7568 = vst [vmem:[#allocation174_spill] sm:$0xff] %v6024_v27  ;;  %1071 = vmatpush.msra.mxu3 %v6029_v17 }
 0x2b1   :  { %7569 = vst [vmem:[#allocation175_spill] sm:$0xff] %v6029_v17  ;;  %1288 = vmatpush.msra.mxu0 %v5023_v4  ;;  %1343 = vmatpush.msra.mxu1 %v7571_v6  ;;  %v7574_v17 = vld [vmem:[#allocation33_spill] sm:$0xff] }
 0x2b2   :  { %970 = vmatpush.msra.mxu2 %v5981_v16 }
 0x2b3   :  { %1290 = vmatpush.msra.mxu0 %v7572_v39  ;;  %1349 = vmatpush.msra.mxu1 %v7574_v17 }
 0x2b4   :  { %972 = vmatpush.msra.mxu2 %v6000_v10 }
 0x2b6   :  { %1179 = vmatpush.msrb.mxu2 %v5754_v0  ;;  %v6038_v0 = vand.u32 4294901760, %v1075_v5  ;;  %v7575_v5 = vld [vmem:[#allocation7_spill] sm:$0xff] }
 0x2b8   :  { %1183 = vmatpush.msrb.mxu2 %v5769_v30  ;;  %7570 = vst [vmem:[#allocation176_spill] sm:$0xff] %v6038_v0  ;;  %1077 = vmatpush.msra.mxu3 %v6038_v0  ;;  %v7573_v30 = vld [vmem:[#allocation6_spill] sm:$0xff]  ;;  %v7578_v0 = vld [vmem:[#allocation39_spill] sm:$0xff] }
 0x2b9   :  { %1292 = vmatpush.msra.mxu0 %v7573_v30 }
 0x2ba   :  { %1187 = vmatpush.msrb.mxu2 %v5789_v33  ;;  %1246 = vmatpush.msrb.mxu3 %v5726_v28  ;;  %v7576_v33 = vld [vmem:[#allocation36_spill] sm:$0xff] }
 0x2bb   :  { %1294 = vmatpush.msra.mxu0 %v7575_v5  ;;  %1355 = vmatpush.msra.mxu1 %v7576_v33  ;;  %v7582_v33 = vld [vmem:[#allocation45_spill] sm:$0xff] }
 0x2bc   :  { %1191 = vmatpush.msrb.mxu2 %v5805_v9  ;;  %1248 = vmatpush.msrb.mxu3 %v5728_v11  ;;  %v7577_v9 = vld [vmem:[#allocation8_spill] sm:$0xff] }
 0x2bd   :  { %1296 = vmatpush.msra.mxu0 %v7577_v9  ;;  %1361 = vmatpush.msra.mxu1 %v7578_v0  ;;  %v7584_v0 = vld [vmem:[#allocation49_spill] sm:$0xff] }
 0x2be   :  { %1195 = vmatpush.msrb.mxu2 %v5812_v52  ;;  %1250 = vmatpush.msrb.mxu3 %v5730_v49  ;;  %v7579_v52 = vld [vmem:[#allocation12_spill] sm:$0xff] }
 0x2bf   :  { %1298 = vmatpush.msra.mxu0 %v7579_v52  ;;  %1367 = vmatpush.msra.mxu1 %v7580_v7  ;;  %v7586_v7 = vld [vmem:[#allocation51_spill] sm:$0xff] }
 0x2c0   :  { %1199 = vmatpush.msrb.mxu2 %v5829_v63  ;;  %1252 = vmatpush.msrb.mxu3 %v5744_v56  ;;  %v7581_v63 = vld [vmem:[#allocation15_spill] sm:$0xff] }
 0x2c1   :  { %1300 = vmatpush.msra.mxu0 %v7581_v63  ;;  %1373 = vmatpush.msra.mxu1 %v7582_v33 }
 0x2c2   :  { %1203 = vmatpush.msrb.mxu2 %v5852_v43  ;;  %1254 = vmatpush.msrb.mxu3 %v5750_v45  ;;  %v7583_v43 = vld [vmem:[#allocation23_spill] sm:$0xff] }
 0x2c3   :  { %1302 = vmatpush.msra.mxu0 %v7583_v43  ;;  %1379 = vmatpush.msra.mxu1 %v7584_v0  ;;  %v7589_v0 = vld [vmem:[#allocation56_spill] sm:$0xff] }
 0x2c4   :  { %1207 = vmatpush.msrb.mxu2 %v5867_v50  ;;  %1256 = vmatpush.msrb.mxu3 %v5763_v48  ;;  %v7585_v50 = vld [vmem:[#allocation30_spill] sm:$0xff] }
 0x2c5   :  { %1304 = vmatpush.msra.mxu0 %v7585_v50  ;;  %1385 = vmatpush.msra.mxu1 %v7586_v7 }
 0x2c6   :  { %1211 = vmatpush.msrb.mxu2 %v5880_v13  ;;  %1258 = vmatpush.msrb.mxu3 %v5791_v38  ;;  %v7587_v13 = vld [vmem:[#allocation54_spill] sm:$0xff] }
 0x2c7   :  { %1306 = vmatpush.msra.mxu0 %v5145_v46  ;;  %1391 = vmatpush.msra.mxu1 %v7587_v13 }
 0x2c8   :  { %1215 = vmatpush.msrb.mxu2 %v5893_v42  ;;  %1260 = vmatpush.msrb.mxu3 %v5807_v44  ;;  %v7588_v42 = vld [vmem:[#allocation35_spill] sm:$0xff] }
 0x2c9   :  { %1308 = vmatpush.msra.mxu0 %v7588_v42  ;;  %1397 = vmatpush.msra.mxu1 %v7589_v0 }
 0x2ca   :  { %1219 = vmatpush.msrb.mxu2 %v5904_v20  ;;  %1262 = vmatpush.msrb.mxu3 %v5825_v58  ;;  %v7590_v20 = vld [vmem:[#allocation58_spill] sm:$0xff] }
 0x2cb   :  { %1310 = vmatpush.msra.mxu0 %v5169_v54  ;;  %1403 = vmatpush.msra.mxu1 %v7590_v20 }
 0x2cc   :  { %1223 = vmatpush.msrb.mxu2 %v5959_v53  ;;  %1264 = vmatpush.msrb.mxu3 %v5842_v8  ;;  %v7591_v53 = vld [vmem:[#allocation59_spill] sm:$0xff] }
 0x2cd   :  { %1312 = vmatpush.msra.mxu0 %v5187_v60  ;;  %1409 = vmatpush.msra.mxu1 %v7591_v53 }
 0x2ce   :  { %1227 = vmatpush.msrb.mxu2 %v5975_v32  ;;  %1266 = vmatpush.msrb.mxu3 %v5857_v57  ;;  %v7592_v32 = vld [vmem:[#allocation60_spill] sm:$0xff] }
 0x2cf   :  { %1314 = vmatpush.msra.mxu0 %v5221_v12  ;;  %1415 = vmatpush.msra.mxu1 %v7592_v32 }
 0x2d0   :  { %1231 = vmatpush.msrb.mxu2 %v5993_v40  ;;  %1268 = vmatpush.msrb.mxu3 %v5943_v59  ;;  %v7593_v40 = vld [vmem:[#allocation61_spill] sm:$0xff] }
 0x2d1   :  { %1316 = vmatpush.msra.mxu0 %v5240_v34  ;;  %1421 = vmatpush.msra.mxu1 %v7593_v40  ;;  %v4944_v40 = vld [vmem:[%s7022_s0] sm:$0xf] }
 0x2d2   :  { %1235 = vmatpush.msrb.mxu2 %v6009_v55  ;;  %1270 = vmatpush.msrb.mxu3 %v5952_v14 }
 0x2d4   :  { %1239 = vmatpush.msrb.mxu2 %v6024_v27  ;;  %1272 = vmatpush.msrb.mxu3 %v5965_v35 }
 0x2d6   :  { %1274 = vmatpush.msrb.mxu3 %v5981_v16 }
 0x2d8   :  { %1276 = vmatpush.msrb.mxu3 %v6000_v10 }
 0x308   :  { %v843_v55 = vpop.f32.mrf.mxu3 }
 0x310   :  { %v817_v53 = vpop.f32.mrf.mxu2  ;;  %v891_v20 = vpop.f32.mrf.mxu3 }
 0x311   :  { %v844_v0 = vadd.f32 %v843_v55, %v817_v53  ;;  %v7594_v55 = vld [vmem:[#allocation16_spill] sm:$0xff]  ;;  %v7599_v53 = vld [vmem:[#allocation10_spill] sm:$0xff] }
 0x318   :  { %v867_v27 = vpop.f32.mrf.mxu2  ;;  %v937_v23 = vpop.f32.mrf.mxu3 }
 0x319   :  { %v868_v13 = vadd.f32 %v867_v27, %v844_v0  ;;  %v7600_v27 = vld [vmem:[#allocation21_spill] sm:$0xff] }
 0x31b   :  { %v892_v7 = vadd.f32 %v891_v20, %v868_v13  ;;  %v6113_v13 = vld [vmem:[%s7022_s0 + $0x4] sm:$0xf] }
 0x31c   :  { %v7597_v20 = vld [vmem:[#allocation9_spill] sm:$0xff] }
 0x320   :  { %v915_v32 = vpop.f32.mrf.mxu2 }
 0x321   :  { %v916_v33 = vadd.f32 %v915_v32, %v892_v7  ;;  %v7602_v7 = vld [vmem:[#allocation27_spill] sm:$0xff] }
 0x323   :  { %v938_v17 = vadd.f32 %v937_v23, %v916_v33  ;;  %v7595_v33 = vld [vmem:[#allocation17_spill] sm:$0xff] }
 0x325   :  { %v940_v31 = vmul.f32 %v4944_v40, %v938_v17  ;;  %v7596_v40 = vld [vmem:[#allocation18_spill] sm:$0xff]  ;;  %v7603_v17 = vld [vmem:[#allocation13_spill] sm:$0xff] }
 0x327   :  { %v973_v6 = vand.u32 4294901760, %v940_v31 }
 0x329   :  { %v974_v37 = vsub.f32 %v940_v31, %v973_v6  ;;  %1079 = vmatmul.f32.vlgmr.msra.gmra.mxu3 %v973_v6  ;;  %v7601_v31 = vld [vmem:[#allocation11_spill] sm:$0xff] }
 0x32a   :  { %1482 = vmatpush.msra.mxu3 %v5021_v3 }
 0x32b   :  { %1133 = vmatmul.f32.vlgmr.msrb.gmra.mxu0 %v974_v37  ;;  %v975_v36 = vand.u32 4294901760, %v974_v37 }
 0x32c   :  { %1484 = vmatpush.msra.mxu3 %v5023_v4  ;;  %1523 = vmatpush.msrb.mxu0 %v7594_v55 }
 0x32d   :  { %1172 = vmatmul.f32.vlgmr.msrb.gmra.mxu1 %v975_v36  ;;  %v976_v32 = vsub.f32 %v974_v37, %v975_v36  ;;  %v7598_v36 = vld [vmem:[#allocation20_spill] sm:$0xff]  ;;  %v6120_v37 = vand.u32 4294901760, %v6113_v13 }
 0x32e   :  { %1486 = vmatpush.msra.mxu3 %v7572_v39  ;;  %1527 = vmatpush.msrb.mxu0 %v7595_v33 }
 0x32f   :  { %v977_v0 = vand.u32 4294901760, %v976_v32  ;;  %1590 = vmatpush.msrb.mxu1 %v5021_v3  ;;  %v1318_v23 = vsub.f32 %v6113_v13, %v6120_v37  ;;  %v7604_v32 = vld [vmem:[#allocation14_spill] sm:$0xff] }
 0x330   :  { %1488 = vmatpush.msra.mxu3 %v7573_v30  ;;  %1531 = vmatpush.msrb.mxu0 %v7596_v40 }
 0x331   :  { %978 = vmatmul.f32.vlgmr.msra.gmra.mxu2 %v977_v0  ;;  %1278 = vmatmul.f32.vlgmr.msrb.gmra.mxu3 %v973_v6  ;;  %v7605_v0 = vld [vmem:[#allocation28_spill] sm:$0xff] }
 0x332   :  { %1429 = vmatpush.msra.mxu2 %v7597_v20  ;;  %1490 = vmatpush.msra.mxu3 %v7575_v5 }
 0x333   :  { %1592 = vmatpush.msrb.mxu1 %v5023_v4  ;;  %1535 = vmatpush.msrb.mxu0 %v7598_v36 }
 0x334   :  { %1432 = vmatpush.msra.mxu2 %v7599_v53  ;;  %1492 = vmatpush.msra.mxu3 %v7577_v9  ;;  %v7614_v53 = vld [vmem:[#allocation34_spill] sm:$0xff] }
 0x335   :  { %1594 = vmatpush.msrb.mxu1 %v7572_v39  ;;  %1539 = vmatpush.msrb.mxu0 %v7600_v27  ;;  %v7607_v27 = vld [vmem:[#allocation32_spill] sm:$0xff] }
 0x336   :  { %1435 = vmatpush.msra.mxu2 %v7601_v31  ;;  %1494 = vmatpush.msra.mxu3 %v7579_v52  ;;  %v1319_v31 = vand.u32 4294901760, %v1318_v23 }
 0x337   :  { %1596 = vmatpush.msrb.mxu1 %v7573_v30  ;;  %1543 = vmatpush.msrb.mxu0 %v7602_v7  ;;  %v7606_v7 = vld [vmem:[#allocation19_spill] sm:$0xff] }
 0x338   :  { %1438 = vmatpush.msra.mxu2 %v7603_v17  ;;  %1496 = vmatpush.msra.mxu3 %v7581_v63  ;;  %v7610_v17 = vld [vmem:[#allocation24_spill] sm:$0xff] }
 0x339   :  { %1241 = vmatmul.f32.vlgmr.msrb.gmra.mxu2 %v973_v6  ;;  %1598 = vmatpush.msrb.mxu1 %v7575_v5  ;;  %v7608_v6 = vld [vmem:[#allocation22_spill] sm:$0xff] }
 0x33a   :  { %1441 = vmatpush.msra.mxu2 %v7604_v32  ;;  %1498 = vmatpush.msra.mxu3 %v7583_v43  ;;  %v7609_v32 = vld [vmem:[#allocation37_spill] sm:$0xff] }
 0x33b   :  { %1547 = vmatpush.msrb.mxu0 %v7605_v0  ;;  %1600 = vmatpush.msrb.mxu1 %v7577_v9  ;;  %v1320_v0 = vsub.f32 %v1318_v23, %v1319_v31 }
 0x33c   :  { %1444 = vmatpush.msra.mxu2 %v7606_v7  ;;  %1500 = vmatpush.msra.mxu3 %v7585_v50  ;;  %v7611_v7 = vld [vmem:[#allocation40_spill] sm:$0xff] }
 0x33d   :  { %1551 = vmatpush.msrb.mxu0 %v7607_v27  ;;  %1602 = vmatpush.msrb.mxu1 %v7579_v52  ;;  %v7612_v27 = vld [vmem:[#allocation31_spill] sm:$0xff] }
 0x33e   :  { %1447 = vmatpush.msra.mxu2 %v7608_v6  ;;  %1502 = vmatpush.msra.mxu3 %v5145_v46  ;;  %v7613_v6 = vld [vmem:[#allocation44_spill] sm:$0xff] }
 0x33f   :  { %1555 = vmatpush.msrb.mxu0 %v7609_v32  ;;  %1604 = vmatpush.msrb.mxu1 %v7581_v63  ;;  %v1321_v32 = vand.u32 4294901760, %v1320_v0  ;;  %v7618_v0 = vld [vmem:[#allocation48_spill] sm:$0xff] }
 0x340   :  { %1450 = vmatpush.msra.mxu2 %v7610_v17  ;;  %1504 = vmatpush.msra.mxu3 %v7588_v42  ;;  %v7615_v17 = vld [vmem:[#allocation47_spill] sm:$0xff] }
 0x341   :  { %1559 = vmatpush.msrb.mxu0 %v7611_v7  ;;  %1606 = vmatpush.msrb.mxu1 %v7583_v43  ;;  %v7616_v7 = vld [vmem:[#allocation38_spill] sm:$0xff] }
 0x342   :  { %1453 = vmatpush.msra.mxu2 %v7612_v27  ;;  %1506 = vmatpush.msra.mxu3 %v5169_v54  ;;  %v7617_v27 = vld [vmem:[#allocation41_spill] sm:$0xff] }
 0x343   :  { %1563 = vmatpush.msrb.mxu0 %v7613_v6  ;;  %1608 = vmatpush.msrb.mxu1 %v7585_v50  ;;  %v7623_v6 = vld [vmem:[#allocation55_spill] sm:$0xff] }
 0x344   :  { %1456 = vmatpush.msra.mxu2 %v7614_v53  ;;  %1508 = vmatpush.msra.mxu3 %v5187_v60  ;;  %v7619_v53 = vld [vmem:[#allocation42_spill] sm:$0xff] }
 0x345   :  { %1567 = vmatpush.msrb.mxu0 %v7615_v17  ;;  %1610 = vmatpush.msrb.mxu1 %v5145_v46  ;;  %v7620_v17 = vld [vmem:[#allocation52_spill] sm:$0xff] }
 0x346   :  { %1459 = vmatpush.msra.mxu2 %v7616_v7  ;;  %1510 = vmatpush.msra.mxu3 %v5221_v12  ;;  %v7621_v7 = vld [vmem:[#allocation46_spill] sm:$0xff] }
 0x347   :  { %1322 = vmatmul.f32.vlgmr.msra.gmra.mxu0 %v1321_v32  ;;  %1612 = vmatpush.msrb.mxu1 %v7588_v42  ;;  %v7622_v32 = vld [vmem:[#allocation81_spill] sm:$0xff] }
 0x348   :  { %1462 = vmatpush.msra.mxu2 %v7617_v27  ;;  %1512 = vmatpush.msra.mxu3 %v5240_v34  ;;  %v7624_v27 = vld [vmem:[#allocation50_spill] sm:$0xff] }
 0x349   :  { %1516 = vmatmul.f32.vlgmr.msra.gmra.mxu3 %v1319_v31  ;;  %1571 = vmatpush.msrb.mxu0 %v7618_v0  ;;  %v7625_v31 = vld [vmem:[#allocation83_spill] sm:$0xff]  ;;  %v7626_v0 = vld [vmem:[#allocation57_spill] sm:$0xff] }
 0x34a   :  { %1465 = vmatpush.msra.mxu2 %v7619_v53  ;;  %1423 = vmatmul.f32.vlgmr.msra.gmra.mxu1 %v6120_v37  ;;  %v7627_v53 = vld [vmem:[#allocation53_spill] sm:$0xff] }
 0x34b   :  { %1575 = vmatpush.msrb.mxu0 %v7620_v17  ;;  %1614 = vmatpush.msrb.mxu1 %v5169_v54 }
 0x34c   :  { %1468 = vmatpush.msra.mxu2 %v7621_v7  ;;  %1673 = vmatpush.msrb.mxu3 %v7622_v32  ;;  %v7628_v32 = vld [vmem:[#allocation88_spill] sm:$0xff] }
 0x34d   :  { %1579 = vmatpush.msrb.mxu0 %v7623_v6  ;;  %1616 = vmatpush.msrb.mxu1 %v5187_v60 }
 0x34e   :  { %1471 = vmatpush.msra.mxu2 %v7624_v27  ;;  %1679 = vmatpush.msrb.mxu3 %v7625_v31  ;;  %v7629_v31 = vld [vmem:[#allocation92_spill] sm:$0xff] }
 0x34f   :  { %1583 = vmatpush.msrb.mxu0 %v7626_v0  ;;  %1618 = vmatpush.msrb.mxu1 %v5221_v12 }
 0x350   :  { %1474 = vmatpush.msra.mxu2 %v7627_v53  ;;  %1585 = vmatmul.f32.vlgmr.msrb.gmra.mxu0 %v6120_v37  ;;  %v7630_v53 = vld [vmem:[#allocation95_spill] sm:$0xff] }
 0x351   :  { %1477 = vmatmul.f32.vlgmr.msra.gmra.mxu2 %v1318_v23  ;;  %1620 = vmatpush.msrb.mxu1 %v5240_v34  ;;  %v7632_v23 = vld [vmem:[#allocation99_spill] sm:$0xff] }
 0x352   :  { %1622 = vmatmul.f32.vlgmr.msrb.gmra.mxu1 %v6120_v37  ;;  %1685 = vmatpush.msrb.mxu3 %v7628_v32  ;;  %v7631_v37 = vld [vmem:[#allocation69_spill] sm:$0xff]  ;;  %v7634_v32 = vld [vmem:[#allocation103_spill] sm:$0xff] }
 0x353   :  { %1628 = vmatpush.msrb.mxu2 %v5337_v51  ;;  %1771 = vmatpush.msra.mxu0 %v5368_v15  ;;  %v7662_v15 = vld [vmem:[#allocation75_spill] sm:$0xff] }
 0x354   :  { %1691 = vmatpush.msrb.mxu3 %v7629_v31  ;;  %1824 = vmatpush.msra.mxu1 %v5337_v51  ;;  %v7633_v31 = vld [vmem:[#allocation71_spill] sm:$0xff] }
 0x355   :  { %1630 = vmatpush.msrb.mxu2 %v5339_v21  ;;  %1774 = vmatpush.msra.mxu0 %v5371_v26  ;;  %v7658_v26 = vld [vmem:[#allocation116_spill] sm:$0xff] }
 0x356   :  { %1697 = vmatpush.msrb.mxu3 %v7630_v53  ;;  %1826 = vmatpush.msra.mxu1 %v5339_v21  ;;  %v7635_v53 = vld [vmem:[#allocation107_spill] sm:$0xff] }
 0x357   :  { %1632 = vmatpush.msrb.mxu2 %v5341_v29  ;;  %1777 = vmatpush.msra.mxu0 %v7631_v37  ;;  %v7651_v37 = vld [vmem:[#allocation124_spill] sm:$0xff] }
 0x358   :  { %1703 = vmatpush.msrb.mxu3 %v7632_v23  ;;  %1828 = vmatpush.msra.mxu1 %v5341_v29  ;;  %v7636_v23 = vld [vmem:[#allocation111_spill] sm:$0xff] }
 0x359   :  { %1634 = vmatpush.msrb.mxu2 %v5353_v25  ;;  %1780 = vmatpush.msra.mxu0 %v7633_v31  ;;  %v7648_v31 = vld [vmem:[#allocation123_spill] sm:$0xff] }
 0x35a   :  { %1709 = vmatpush.msrb.mxu3 %v7634_v32  ;;  %1830 = vmatpush.msra.mxu1 %v5353_v25  ;;  %v7637_v32 = vld [vmem:[#allocation114_spill] sm:$0xff] }
 0x35b   :  { %1636 = vmatpush.msrb.mxu2 %v5355_v19  ;;  %1783 = vmatpush.msra.mxu0 %v5383_v22  ;;  %v7645_v22 = vld [vmem:[#allocation122_spill] sm:$0xff] }
 0x35c   :  { %1715 = vmatpush.msrb.mxu3 %v7635_v53  ;;  %1832 = vmatpush.msra.mxu1 %v5355_v19  ;;  %v7639_v53 = vld [vmem:[#allocation119_spill] sm:$0xff] }
 0x35d   :  { %1638 = vmatpush.msrb.mxu2 %v5357_v18  ;;  %1786 = vmatpush.msra.mxu0 %v5403_v47  ;;  %v7642_v47 = vld [vmem:[#allocation121_spill] sm:$0xff] }
 0x35e   :  { %1721 = vmatpush.msrb.mxu3 %v7636_v23  ;;  %1834 = vmatpush.msra.mxu1 %v5357_v18  ;;  %v7638_v23 = vld [vmem:[#allocation91_spill] sm:$0xff] }
 0x35f   :  { %1640 = vmatpush.msrb.mxu2 %v5376_v24  ;;  %1789 = vmatpush.msra.mxu0 %v5412_v1  ;;  %v7640_v1 = vld [vmem:[#allocation87_spill] sm:$0xff] }
 0x360   :  { %1727 = vmatpush.msrb.mxu3 %v7637_v32  ;;  %1836 = vmatpush.msra.mxu1 %v5376_v24  ;;  %v7641_v32 = vld [vmem:[#allocation93_spill] sm:$0xff] }
 0x361   :  { %1642 = vmatpush.msrb.mxu2 %v5396_v61  ;;  %1792 = vmatpush.msra.mxu0 %v5431_v2  ;;  %v7643_v2 = vld [vmem:[#allocation89_spill] sm:$0xff] }
 0x362   :  { %1733 = vmatpush.msrb.mxu3 %v5590_v62  ;;  %1838 = vmatpush.msra.mxu1 %v5396_v61  ;;  %v7644_v62 = vld [vmem:[#allocation97_spill] sm:$0xff] }
 0x363   :  { %1644 = vmatpush.msrb.mxu2 %v5449_v41  ;;  %1795 = vmatpush.msra.mxu0 %v7638_v23  ;;  %v7646_v23 = vld [vmem:[#allocation94_spill] sm:$0xff] }
 0x364   :  { %1739 = vmatpush.msrb.mxu3 %v7639_v53  ;;  %1840 = vmatpush.msra.mxu1 %v5449_v41  ;;  %v7647_v53 = vld [vmem:[#allocation101_spill] sm:$0xff] }
 0x365   :  { %1646 = vmatpush.msrb.mxu2 %v7640_v1  ;;  %1798 = vmatpush.msra.mxu0 %v7641_v32  ;;  %v7649_v32 = vld [vmem:[#allocation98_spill] sm:$0xff] }
 0x366   :  { %1745 = vmatpush.msrb.mxu3 %v7642_v47  ;;  %1842 = vmatpush.msra.mxu1 %v7640_v1  ;;  %v7650_v47 = vld [vmem:[#allocation105_spill] sm:$0xff] }
 0x367   :  { %1648 = vmatpush.msrb.mxu2 %v7643_v2  ;;  %1801 = vmatpush.msra.mxu0 %v7644_v62  ;;  %v7653_v62 = vld [vmem:[#allocation109_spill] sm:$0xff] }
 0x368   :  { %1751 = vmatpush.msrb.mxu3 %v7645_v22  ;;  %1844 = vmatpush.msra.mxu1 %v7643_v2  ;;  %v7652_v22 = vld [vmem:[#allocation102_spill] sm:$0xff] }
 0x369   :  { %1650 = vmatpush.msrb.mxu2 %v7646_v23  ;;  %1804 = vmatpush.msra.mxu0 %v7647_v53  ;;  %v7655_v53 = vld [vmem:[#allocation113_spill] sm:$0xff] }
 0x36a   :  { %1757 = vmatpush.msrb.mxu3 %v7648_v31  ;;  %1846 = vmatpush.msra.mxu1 %v7646_v23  ;;  %v7654_v31 = vld [vmem:[#allocation106_spill] sm:$0xff] }
 0x36b   :  { %1652 = vmatpush.msrb.mxu2 %v7649_v32  ;;  %1807 = vmatpush.msra.mxu0 %v7650_v47  ;;  %v7657_v47 = vld [vmem:[#allocation73_spill] sm:$0xff] }
 0x36c   :  { %1763 = vmatpush.msrb.mxu3 %v7651_v37  ;;  %1848 = vmatpush.msra.mxu1 %v7649_v32  ;;  %v7656_v37 = vld [vmem:[#allocation110_spill] sm:$0xff] }
 0x36d   :  { %1654 = vmatpush.msrb.mxu2 %v7652_v22  ;;  %1810 = vmatpush.msra.mxu0 %v7653_v62  ;;  %v7659_v62 = vld [vmem:[#allocation74_spill] sm:$0xff] }
 0x36e   :  { %1932 = vmatpush.msra.mxu3 %v5337_v51  ;;  %1850 = vmatpush.msra.mxu1 %v7652_v22 }
 0x36f   :  { %1656 = vmatpush.msrb.mxu2 %v7654_v31  ;;  %1813 = vmatpush.msra.mxu0 %v7655_v53  ;;  %v7661_v53 = vld [vmem:[#allocation125_spill] sm:$0xff] }
 0x370   :  { %1934 = vmatpush.msra.mxu3 %v5339_v21  ;;  %1852 = vmatpush.msra.mxu1 %v7654_v31  ;;  %v7660_v21 = vld [vmem:[#allocation128_spill] sm:$0xff] }
 0x371   :  { %1658 = vmatpush.msrb.mxu2 %v7656_v37  ;;  %1816 = vmatpush.msra.mxu0 %v7658_v26  ;;  %v7664_v26 = vld [vmem:[#allocation80_spill] sm:$0xff] }
 0x372   :  { %1936 = vmatpush.msra.mxu3 %v5341_v29  ;;  %1854 = vmatpush.msra.mxu1 %v7656_v37  ;;  %v7663_v29 = vld [vmem:[#allocation77_spill] sm:$0xff] }
 0x373   :  { %1865 = vmatpush.msra.mxu2 %v7657_v47  ;;  %2011 = vmatpush.msrb.mxu0 %v7661_v53  ;;  %v7665_v47 = vld [vmem:[#allocation84_spill] sm:$0xff] }
 0x374   :  { %1938 = vmatpush.msra.mxu3 %v5353_v25  ;;  %2041 = vmatpush.msrb.mxu1 %v7660_v21  ;;  %v7666_v21 = vld [vmem:[#allocation85_spill] sm:$0xff] }
 0x375   :  { %1869 = vmatpush.msra.mxu2 %v7659_v62  ;;  %v7667_v62 = vld [vmem:[#allocation90_spill] sm:$0xff] }
 0x376   :  { %1940 = vmatpush.msra.mxu3 %v5355_v19 }
 0x377   :  { %1873 = vmatpush.msra.mxu2 %v7662_v15  ;;  %v7668_v15 = vld [vmem:[#allocation96_spill] sm:$0xff] }
 0x378   :  { %1942 = vmatpush.msra.mxu3 %v5357_v18 }
 0x379   :  { %1877 = vmatpush.msra.mxu2 %v7663_v29  ;;  %v7669_v29 = vld [vmem:[#allocation100_spill] sm:$0xff] }
 0x37a   :  { %1944 = vmatpush.msra.mxu3 %v5376_v24 }
 0x37b   :  { %1881 = vmatpush.msra.mxu2 %v7664_v26  ;;  %v7670_v26 = vld [vmem:[#allocation104_spill] sm:$0xff] }
 0x37c   :  { %1946 = vmatpush.msra.mxu3 %v5396_v61 }
 0x37d   :  { %1885 = vmatpush.msra.mxu2 %v7665_v47  ;;  %v7671_v47 = vld [vmem:[#allocation108_spill] sm:$0xff] }
 0x37e   :  { %1948 = vmatpush.msra.mxu3 %v5449_v41 }
 0x37f   :  { %1889 = vmatpush.msra.mxu2 %v7666_v21  ;;  %v7672_v21 = vld [vmem:[#allocation112_spill] sm:$0xff] }
 0x380   :  { %1950 = vmatpush.msra.mxu3 %v7640_v1 }
 0x381   :  { %1893 = vmatpush.msra.mxu2 %v7667_v62  ;;  %v7673_v62 = vld [vmem:[#allocation115_spill] sm:$0xff] }
 0x382   :  { %1952 = vmatpush.msra.mxu3 %v7643_v2 }
 0x383   :  { %1897 = vmatpush.msra.mxu2 %v7668_v15  ;;  %v7674_v15 = vld [vmem:[#allocation118_spill] sm:$0xff] }
 0x384   :  { %1954 = vmatpush.msra.mxu3 %v7646_v23  ;;  %v7675_v23 = vld [vmem:[#allocation120_spill] sm:$0xff] }
 0x385   :  { %1901 = vmatpush.msra.mxu2 %v7669_v29 }
 0x386   :  { %1956 = vmatpush.msra.mxu3 %v7649_v32 }
 0x387   :  { %1905 = vmatpush.msra.mxu2 %v7670_v26 }
 0x388   :  { %1958 = vmatpush.msra.mxu3 %v7652_v22 }
 0x389   :  { %1909 = vmatpush.msra.mxu2 %v7671_v47 }
 0x38a   :  { %1960 = vmatpush.msra.mxu3 %v7654_v31 }
 0x38b   :  { %1913 = vmatpush.msra.mxu2 %v7672_v21 }
 0x38c   :  { %1962 = vmatpush.msra.mxu3 %v7656_v37 }
 0x38d   :  { %1917 = vmatpush.msra.mxu2 %v7673_v62 }
 0x38f   :  { %1921 = vmatpush.msra.mxu2 %v7674_v15  ;;  %v6280_v15 = vld [vmem:[%s7024_s2] ss:$0 sm:$0xff] }
 0x390   :  { %7676 = vst [vmem:[#allocation5_spill] sm:$0xff] %v6280_v15 }
 0x391   :  { %1925 = vmatpush.msra.mxu2 %v7675_v23 }
 0x3a8   :  { %v1134_v26 = vpop.f32.mrf.mxu0 }
 0x3aa   :  { %v1173_v22 = vpop.f32.mrf.mxu1 }
 0x3ac   :  { %v1080_v29 = vpop.f32.mrf.mxu3 }
 0x3b4   :  { %v979_v32 = vpop.f32.mrf.mxu2  ;;  %v1279_v31 = vpop.f32.mrf.mxu3 }
 0x3b5   :  { %v1081_v2 = vadd.f32 %v1080_v29, %v979_v32 }
 0x3b7   :  { %v1135_v1 = vadd.f32 %v1134_v26, %v1081_v2 }
 0x3b9   :  { %v1174_v41 = vadd.f32 %v1173_v22, %v1135_v1 }
 0x3bc   :  { %v1242_v47 = vpop.f32.mrf.mxu2 }
 0x3bd   :  { %v1243_v61 = vadd.f32 %v1242_v47, %v1174_v41 }
 0x3bf   :  { %v1280_v21 = vadd.f32 %v1279_v31, %v1243_v61 }
 0x3c1   :  { %1283 = vst.msk [vmem:[#allocation2] sm:$0xf] %vm1282_vm7, %v1280_v21 }
 0x3c4   :  { %v1323_v37 = vpop.f32.mrf.mxu0 }
 0x3c5   :  { %v1324_v23 = vadd.f32 %v6280_v15, %v1323_v37  ;;  %v7677_v37 = vld [vmem:[#allocation126_spill] sm:$0xff] }
 0x3c7   :  { %v1424_v62 = vpop.f32.mrf.mxu1 }
 0x3c8   :  { %v1425_v29 = vadd.f32 %v1424_v62, %v1324_v23 }
 0x3cc   :  { %v1517_v26 = vpop.f32.mrf.mxu3 }
 0x3cd   :  { %v1586_v22 = vpop.f32.mrf.mxu0 }
 0x3cf   :  { %v1623_v47 = vpop.f32.mrf.mxu1 }
 0x3d4   :  { %v1478_v32 = vpop.f32.mrf.mxu2 }
 0x3d5   :  { %v1479_v2 = vadd.f32 %v1478_v32, %v1425_v29  ;;  %v7679_v29 = vld [vmem:[#allocation130_spill] sm:$0xff]  ;;  %v7680_v32 = vld [vmem:[#allocation132_spill] sm:$0xff] }
 0x3d7   :  { %v1518_v1 = vadd.f32 %v1517_v26, %v1479_v2  ;;  %v7682_v26 = vld [vmem:[#allocation135_spill] sm:$0xff]  ;;  %v7683_v2 = vld [vmem:[#allocation137_spill] sm:$0xff] }
 0x3d9   :  { %v1587_v41 = vadd.f32 %v1586_v22, %v1518_v1  ;;  %v7684_v22 = vld [vmem:[#allocation141_spill] sm:$0xff]  ;;  %v7685_v1 = vld [vmem:[#allocation144_spill] sm:$0xff] }
 0x3db   :  { %v1624_v24 = vadd.f32 %v1623_v47, %v1587_v41  ;;  %v7686_v47 = vld [vmem:[#allocation147_spill] sm:$0xff]  ;;  %v7687_v41 = vld [vmem:[#allocation150_spill] sm:$0xff] }
 0x3dd   :  { %4926 = vtanh.f32 %v1624_v24  ;;  %v7678_v24 = vld [vmem:[#allocation129_spill] sm:$0xff] }
 0x3e3   :  { %v4927_v21 = vpop.eup %4926 }
 0x3e4   :  { %v1659_v61 = vand.u32 4294901760, %v4927_v21 }
 0x3e6   :  { %1765 = vmatmul.f32.vlgmr.msrb.gmra.mxu3 %v1659_v61  ;;  %v1660_v31 = vsub.f32 %v4927_v21, %v1659_v61  ;;  %v7688_v21 = vld [vmem:[#allocation153_spill] sm:$0xff] }
 0x3e7   :  { %2339 = vmatpush.msrb.mxu3 %v5726_v28 }
 0x3e8   :  { %1819 = vmatmul.f32.vlgmr.msra.gmra.mxu0 %v1660_v31  ;;  %v1661_v18 = vand.u32 4294901760, %v1660_v31 }
 0x3e9   :  { %2064 = vmatpush.msra.mxu0 %v7677_v37  ;;  %2341 = vmatpush.msrb.mxu3 %v5728_v11 }
 0x3ea   :  { %1858 = vmatmul.f32.vlgmr.msra.gmra.mxu1 %v1661_v18  ;;  %v1662_v62 = vsub.f32 %v1660_v31, %v1661_v18  ;;  %v7681_v18 = vld [vmem:[#allocation134_spill] sm:$0xff]  ;;  %v7690_v31 = vld [vmem:[#allocation25_spill] sm:$0xff] }
 0x3eb   :  { %2087 = vmatpush.msra.mxu1 %v7661_v53  ;;  %2343 = vmatpush.msrb.mxu3 %v5730_v49 }
 0x3ec   :  { %v1663_v23 = vand.u32 4294901760, %v1662_v62  ;;  %v7691_v62 = vld [vmem:[#allocation164_spill] sm:$0xff] }
 0x3ed   :  { %2345 = vmatpush.msrb.mxu3 %v5744_v56 }
 0x3ee   :  { %1664 = vmatmul.f32.vlgmr.msrb.gmra.mxu2 %v1663_v23  ;;  %1964 = vmatmul.f32.vlgmr.msra.gmra.mxu3 %v1659_v61  ;;  %v7692_v23 = vld [vmem:[#allocation26_spill] sm:$0xff] }
 0x3ef   :  { %2286 = vmatpush.msrb.mxu2 %v7678_v24  ;;  %2347 = vmatpush.msrb.mxu3 %v5750_v45 }
 0x3f1   :  { %2289 = vmatpush.msrb.mxu2 %v7679_v29  ;;  %2349 = vmatpush.msrb.mxu3 %v5763_v48 }
 0x3f3   :  { %2292 = vmatpush.msrb.mxu2 %v7680_v32  ;;  %2351 = vmatpush.msrb.mxu3 %v5791_v38 }
 0x3f5   :  { %2295 = vmatpush.msrb.mxu2 %v7681_v18  ;;  %2353 = vmatpush.msrb.mxu3 %v5807_v44 }
 0x3f6   :  { %1927 = vmatmul.f32.vlgmr.msra.gmra.mxu2 %v1659_v61  ;;  %v7689_v61 = vld [vmem:[#allocation162_spill] sm:$0xff] }
 0x3f7   :  { %2298 = vmatpush.msrb.mxu2 %v7682_v26  ;;  %2355 = vmatpush.msrb.mxu3 %v5825_v58 }
 0x3f9   :  { %2301 = vmatpush.msrb.mxu2 %v7683_v2  ;;  %2357 = vmatpush.msrb.mxu3 %v5842_v8 }
 0x3fb   :  { %2304 = vmatpush.msrb.mxu2 %v7684_v22  ;;  %2359 = vmatpush.msrb.mxu3 %v5857_v57  ;;  %v7696_v22 = vld [vmem:[#allocation33_spill] sm:$0xff] }
 0x3fd   :  { %2307 = vmatpush.msrb.mxu2 %v7685_v1  ;;  %2361 = vmatpush.msrb.mxu3 %v5943_v59  ;;  %v7694_v1 = vld [vmem:[#allocation29_spill] sm:$0xff] }
 0x3ff   :  { %2310 = vmatpush.msrb.mxu2 %v7686_v47  ;;  %2363 = vmatpush.msrb.mxu3 %v5952_v14  ;;  %v7693_v47 = vld [vmem:[#allocation166_spill] sm:$0xff] }
 0x401   :  { %2313 = vmatpush.msrb.mxu2 %v7687_v41  ;;  %2365 = vmatpush.msrb.mxu3 %v5965_v35  ;;  %v7695_v41 = vld [vmem:[#allocation169_spill] sm:$0xff] }
 0x403   :  { %2316 = vmatpush.msrb.mxu2 %v7688_v21  ;;  %2367 = vmatpush.msrb.mxu3 %v5981_v16  ;;  %v7697_v21 = vld [vmem:[#allocation172_spill] sm:$0xff] }
 0x405   :  { %2319 = vmatpush.msrb.mxu2 %v7689_v61  ;;  %2369 = vmatpush.msrb.mxu3 %v6000_v10  ;;  %v7698_v61 = vld [vmem:[#allocation36_spill] sm:$0xff] }
 0x407   :  { %2536 = vmatpush.msra.mxu3 %v7690_v31  ;;  %2322 = vmatpush.msrb.mxu2 %v7691_v62  ;;  %v7699_v31 = vld [vmem:[#allocation39_spill] sm:$0xff] }
 0x409   :  { %2542 = vmatpush.msra.mxu3 %v7692_v23  ;;  %2325 = vmatpush.msrb.mxu2 %v7693_v47  ;;  %v7700_v23 = vld [vmem:[#allocation43_spill] sm:$0xff] }
 0x40b   :  { %2548 = vmatpush.msra.mxu3 %v7694_v1  ;;  %2328 = vmatpush.msrb.mxu2 %v7695_v41  ;;  %v7701_v1 = vld [vmem:[#allocation45_spill] sm:$0xff] }
 0x40d   :  { %2554 = vmatpush.msra.mxu3 %v7696_v22  ;;  %2331 = vmatpush.msrb.mxu2 %v7697_v21  ;;  %v7702_v22 = vld [vmem:[#allocation49_spill] sm:$0xff]  ;;  %v7703_v21 = vld [vmem:[#allocation51_spill] sm:$0xff] }
 0x40f   :  { %2491 = vmatpush.msra.mxu2 %v5021_v3  ;;  %2560 = vmatpush.msra.mxu3 %v7698_v61  ;;  %v7704_v61 = vld [vmem:[#allocation54_spill] sm:$0xff] }
 0x411   :  { %2493 = vmatpush.msra.mxu2 %v5023_v4  ;;  %2566 = vmatpush.msra.mxu3 %v7699_v31  ;;  %v7705_v31 = vld [vmem:[#allocation56_spill] sm:$0xff] }
 0x413   :  { %2495 = vmatpush.msra.mxu2 %v7572_v39  ;;  %2572 = vmatpush.msra.mxu3 %v7700_v23  ;;  %v7706_v23 = vld [vmem:[#allocation58_spill] sm:$0xff] }
 0x415   :  { %2497 = vmatpush.msra.mxu2 %v7573_v30  ;;  %2578 = vmatpush.msra.mxu3 %v7701_v1  ;;  %v7707_v1 = vld [vmem:[#allocation59_spill] sm:$0xff] }
 0x417   :  { %2499 = vmatpush.msra.mxu2 %v7575_v5  ;;  %2584 = vmatpush.msra.mxu3 %v7702_v22  ;;  %v7708_v22 = vld [vmem:[#allocation60_spill] sm:$0xff] }
 0x419   :  { %2501 = vmatpush.msra.mxu2 %v7577_v9  ;;  %2590 = vmatpush.msra.mxu3 %v7703_v21  ;;  %v7709_v21 = vld [vmem:[#allocation61_spill] sm:$0xff] }
 0x41b   :  { %2503 = vmatpush.msra.mxu2 %v7579_v52  ;;  %2596 = vmatpush.msra.mxu3 %v7704_v61 }
 0x41d   :  { %2505 = vmatpush.msra.mxu2 %v7581_v63  ;;  %2602 = vmatpush.msra.mxu3 %v7705_v31 }
 0x41f   :  { %2507 = vmatpush.msra.mxu2 %v7583_v43  ;;  %2608 = vmatpush.msra.mxu3 %v7706_v23 }
 0x421   :  { %2509 = vmatpush.msra.mxu2 %v7585_v50  ;;  %2614 = vmatpush.msra.mxu3 %v7707_v1 }
 0x423   :  { %2511 = vmatpush.msra.mxu2 %v5145_v46  ;;  %2620 = vmatpush.msra.mxu3 %v7708_v22 }
 0x425   :  { %2513 = vmatpush.msra.mxu2 %v7588_v42  ;;  %2626 = vmatpush.msra.mxu3 %v7709_v21 }
 0x427   :  { %2515 = vmatpush.msra.mxu2 %v5169_v54 }
 0x429   :  { %2517 = vmatpush.msra.mxu2 %v5187_v60 }
 0x42b   :  { %2519 = vmatpush.msra.mxu2 %v5221_v12 }
 0x42d   :  { %2521 = vmatpush.msra.mxu2 %v5240_v34 }
 0x465   :  { %v1820_v1 = vpop.f32.mrf.mxu0 }
 0x467   :  { %v1859_v47 = vpop.f32.mrf.mxu1 }
 0x469   :  { %v1766_v23 = vpop.f32.mrf.mxu3 }
 0x471   :  { %v1665_v31 = vpop.f32.mrf.mxu2  ;;  %v1965_v26 = vpop.f32.mrf.mxu3 }
 0x472   :  { %v1767_v61 = vadd.f32 %v1766_v23, %v1665_v31 }
 0x474   :  { %v1821_v41 = vadd.f32 %v1820_v1, %v1767_v61 }
 0x476   :  { %v1860_v62 = vadd.f32 %v1859_v47, %v1821_v41 }
 0x479   :  { %v1928_v22 = vpop.f32.mrf.mxu2 }
 0x47a   :  { %v1929_v2 = vadd.f32 %v1928_v22, %v1860_v62 }
 0x47c   :  { %v1966_v18 = vadd.f32 %v1965_v26, %v1929_v2 }
 0x47e   :  { %v1968_v21 = vsel %vm761_vm0, %v1966_v18, -inf }
 0x47f   :  { %1969 = vmax.xlane.f32.xlu1 %v1968_v21 }
 0x4f2   :  { %v1970_v32 = vpop.xlane.xlu1 %1969 }
 0x4f3   :  { %v1971_v29 = vsub.f32 %v1966_v18, %v1970_v32 }
 0x4f5   :  { %v1972_v24 = vmul.f32 1.442695, %v1971_v29 }
 0x4f7   :  { %4928 = vpow2.f32 %v1972_v24 }
 0x4fd   :  { %v4929_v37 = vpop.eup %4928 }
 0x4fe   :  { %v1974_v15 = vsel %vm761_vm0, %v4929_v37, 0.0 }
 0x4ff   :  { %1975 = vadd.xlane.f32.xlu1 %v1974_v15 }
 0x572   :  { %v1976_v31 = vpop.xlane.xlu1 %1975 }
 0x573   :  { %4930 = vrcp.f32 %v1976_v31  ;;  %v1988_v41 = vand.u32 2147483648, %v1976_v31  ;;  %v1986_v26 = vand.u32 2147483647, %v1976_v31  ;;  %vm1982_vm9 = vweird.f32 %v1976_v31 }
 0x575   :  { %v1989_v21 = vor.u32 1.1754944e-38, %v1988_v41  ;;  %vm1987_vm11 = vcmp.eq.f32.partialorder %v1986_v26, 8.507059e+37  ;;  %v7713_v41 = vld [vmem:[#allocation145_spill] sm:$0xff]  ;;  %v7715_v26 = vld [vmem:[#allocation151_spill] sm:$0xff] }
 0x579   :  { %v4931_v1 = vpop.eup %4930 }
 0x57a   :  { %v1978_v61 = vmul.f32 %v4931_v1, %v1976_v31  ;;  %vm1983_vm8 = vweird.f32 %v4931_v1  ;;  %v7711_v31 = vld [vmem:[#allocation140_spill] sm:$0xff] }
 0x57b   :  { %vm1984_vm10 = vmor %vm1982_vm9, %vm1983_vm8 }
 0x57c   :  { %v1979_v47 = vsub.f32 1.0, %v1978_v61 }
 0x57e   :  { %v1980_v22 = vmul.f32 %v4931_v1, %v1979_v47 }
 0x580   :  { %v1981_v2 = vadd.f32 %v4931_v1, %v1980_v22  ;;  %v7710_v22 = vld [vmem:[#allocation127_spill] sm:$0xff] }
 0x582   :  { %v1985_v32 = vsel %vm1984_vm10, %v4931_v1, %v1981_v2  ;;  %v7712_v1 = vld [vmem:[#allocation143_spill] sm:$0xff]  ;;  %v7716_v2 = vld [vmem:[#allocation154_spill] sm:$0xff] }
 0x583   :  { %v1990_v24 = vsel %vm1987_vm11, %v1989_v21, %v1985_v32  ;;  %v7717_v21 = vld [vmem:[#allocation156_spill] sm:$0xff]  ;;  %v7718_v32 = vld [vmem:[#allocation158_spill] sm:$0xff] }
 0x584   :  { %v1991_v29 = vmul.f32 %v4929_v37, %v1990_v24  ;;  %v7714_v37 = vld [vmem:[#allocation148_spill] sm:$0xff]  ;;  %v7719_v24 = vld [vmem:[#allocation159_spill] sm:$0xff] }
 0x586   :  { %v1993_v18 = vsel %vm786_vm6, %v1991_v29, 0  ;;  %v7720_v29 = vld [vmem:[#allocation160_spill] sm:$0xff] }
 0x587   :  { %v2012_v15 = vand.u32 4294901760, %v1993_v18 }
 0x589   :  { %v2013_v62 = vsub.f32 %v1993_v18, %v2012_v15  ;;  %2043 = vmatmul.f32.vlgmr.msrb.gmra.mxu1 %v2012_v15  ;;  %v7721_v18 = vld [vmem:[#allocation161_spill] sm:$0xff] }
 0x58a   :  { %2135 = vmatpush.msrb.mxu1 %v7661_v53 }
 0x58b   :  { %v2014_v23 = vand.u32 4294901760, %v2013_v62 }
 0x58d   :  { %v2015_v61 = vsub.f32 %v2013_v62, %v2014_v23 }
 0x58f   :  { %v2016_v47 = vand.u32 4294901760, %v2015_v61  ;;  %v7725_v61 = vld [vmem:[#allocation175_spill] sm:$0xff] }
 0x591   :  { %2017 = vmatmul.f32.vlgmr.msrb.gmra.mxu0 %v2016_v47  ;;  %2091 = vmatmul.f32.vlgmr.msra.gmra.mxu1 %v2014_v23  ;;  %v7723_v23 = vld [vmem:[#allocation170_spill] sm:$0xff]  ;;  %v7726_v47 = vld [vmem:[#allocation176_spill] sm:$0xff] }
 0x592   :  { %2113 = vmatpush.msrb.mxu0 %v7710_v22  ;;  %2188 = vmatpush.msra.mxu1 %v7711_v31 }
 0x594   :  { %2194 = vmatpush.msra.mxu1 %v7712_v1 }
 0x596   :  { %2200 = vmatpush.msra.mxu1 %v7713_v41 }
 0x598   :  { %2206 = vmatpush.msra.mxu1 %v7714_v37 }
 0x599   :  { %2067 = vmatmul.f32.vlgmr.msra.gmra.mxu0 %v2013_v62  ;;  %2137 = vmatmul.f32.vlgmr.msrb.gmra.mxu1 %v2012_v15  ;;  %v7722_v62 = vld [vmem:[#allocation167_spill] sm:$0xff] }
 0x59a   :  { %2143 = vmatpush.msra.mxu0 %v5726_v28  ;;  %2212 = vmatpush.msra.mxu1 %v7715_v26 }
 0x59c   :  { %2145 = vmatpush.msra.mxu0 %v5728_v11  ;;  %2218 = vmatpush.msra.mxu1 %v7716_v2 }
 0x59e   :  { %2147 = vmatpush.msra.mxu0 %v5730_v49  ;;  %2224 = vmatpush.msra.mxu1 %v7717_v21 }
 0x5a0   :  { %2149 = vmatpush.msra.mxu0 %v5744_v56  ;;  %2230 = vmatpush.msra.mxu1 %v7718_v32 }
 0x5a1   :  { %2115 = vmatmul.f32.vlgmr.msrb.gmra.mxu0 %v2012_v15  ;;  %v7724_v15 = vld [vmem:[#allocation173_spill] sm:$0xff] }
 0x5a2   :  { %2151 = vmatpush.msra.mxu0 %v5750_v45  ;;  %2236 = vmatpush.msra.mxu1 %v7719_v24 }
 0x5a4   :  { %2153 = vmatpush.msra.mxu0 %v5763_v48  ;;  %2242 = vmatpush.msra.mxu1 %v7720_v29  ;;  %v7741_v29 = vld [vmem:[#allocation171_spill] sm:$0xff] }
 0x5a6   :  { %2155 = vmatpush.msra.mxu0 %v5791_v38  ;;  %2248 = vmatpush.msra.mxu1 %v7721_v18  ;;  %v7732_v18 = vld [vmem:[#allocation142_spill] sm:$0xff] }
 0x5a8   :  { %2157 = vmatpush.msra.mxu0 %v5807_v44  ;;  %2254 = vmatpush.msra.mxu1 %v7722_v62  ;;  %v7731_v62 = vld [vmem:[#allocation139_spill] sm:$0xff] }
 0x5aa   :  { %2159 = vmatpush.msra.mxu0 %v5825_v58  ;;  %2260 = vmatpush.msra.mxu1 %v7723_v23  ;;  %v7730_v23 = vld [vmem:[#allocation138_spill] sm:$0xff] }
 0x5ac   :  { %2161 = vmatpush.msra.mxu0 %v5842_v8  ;;  %2266 = vmatpush.msra.mxu1 %v7724_v15  ;;  %v7729_v15 = vld [vmem:[#allocation136_spill] sm:$0xff] }
 0x5ae   :  { %2163 = vmatpush.msra.mxu0 %v5857_v57  ;;  %2272 = vmatpush.msra.mxu1 %v7725_v61  ;;  %v7727_v61 = vld [vmem:[#allocation131_spill] sm:$0xff] }
 0x5b0   :  { %2165 = vmatpush.msra.mxu0 %v5943_v59  ;;  %2278 = vmatpush.msra.mxu1 %v7726_v47  ;;  %v7728_v47 = vld [vmem:[#allocation133_spill] sm:$0xff] }
 0x5b2   :  { %2447 = vmatpush.msrb.mxu1 %v5726_v28  ;;  %2167 = vmatpush.msra.mxu0 %v5952_v14 }
 0x5b4   :  { %2449 = vmatpush.msrb.mxu1 %v5728_v11  ;;  %2169 = vmatpush.msra.mxu0 %v5965_v35 }
 0x5b6   :  { %2451 = vmatpush.msrb.mxu1 %v5730_v49  ;;  %2171 = vmatpush.msra.mxu0 %v5981_v16 }
 0x5b8   :  { %2453 = vmatpush.msrb.mxu1 %v5744_v56  ;;  %2173 = vmatpush.msra.mxu0 %v6000_v10 }
 0x5ba   :  { %2380 = vmatpush.msrb.mxu0 %v7727_v61  ;;  %2455 = vmatpush.msrb.mxu1 %v5750_v45  ;;  %v7733_v61 = vld [vmem:[#allocation146_spill] sm:$0xff] }
 0x5bc   :  { %2384 = vmatpush.msrb.mxu0 %v7728_v47  ;;  %2457 = vmatpush.msrb.mxu1 %v5763_v48  ;;  %v7734_v47 = vld [vmem:[#allocation149_spill] sm:$0xff] }
 0x5be   :  { %2388 = vmatpush.msrb.mxu0 %v7729_v15  ;;  %2459 = vmatpush.msrb.mxu1 %v5791_v38  ;;  %v7735_v15 = vld [vmem:[#allocation152_spill] sm:$0xff] }
 0x5c0   :  { %2392 = vmatpush.msrb.mxu0 %v7730_v23  ;;  %2461 = vmatpush.msrb.mxu1 %v5807_v44  ;;  %v7736_v23 = vld [vmem:[#allocation155_spill] sm:$0xff] }
 0x5c2   :  { %2396 = vmatpush.msrb.mxu0 %v7731_v62  ;;  %2463 = vmatpush.msrb.mxu1 %v5825_v58  ;;  %v7737_v62 = vld [vmem:[#allocation157_spill] sm:$0xff] }
 0x5c4   :  { %2400 = vmatpush.msrb.mxu0 %v7732_v18  ;;  %2465 = vmatpush.msrb.mxu1 %v5842_v8  ;;  %v7738_v18 = vld [vmem:[#allocation163_spill] sm:$0xff] }
 0x5c6   :  { %2404 = vmatpush.msrb.mxu0 %v7733_v61  ;;  %2467 = vmatpush.msrb.mxu1 %v5857_v57  ;;  %v7739_v61 = vld [vmem:[#allocation165_spill] sm:$0xff] }
 0x5c8   :  { %2408 = vmatpush.msrb.mxu0 %v7734_v47  ;;  %2469 = vmatpush.msrb.mxu1 %v5943_v59  ;;  %v7740_v47 = vld [vmem:[#allocation168_spill] sm:$0xff] }
 0x5ca   :  { %2412 = vmatpush.msrb.mxu0 %v7735_v15  ;;  %2471 = vmatpush.msrb.mxu1 %v5952_v14  ;;  %v7742_v15 = vld [vmem:[#allocation174_spill] sm:$0xff] }
 0x5cc   :  { %2416 = vmatpush.msrb.mxu0 %v7736_v23  ;;  %2473 = vmatpush.msrb.mxu1 %v5965_v35 }
 0x5ce   :  { %2420 = vmatpush.msrb.mxu0 %v7737_v62  ;;  %2475 = vmatpush.msrb.mxu1 %v5981_v16 }
 0x5d0   :  { %2424 = vmatpush.msrb.mxu0 %v7738_v18  ;;  %2477 = vmatpush.msrb.mxu1 %v6000_v10 }
 0x5d2   :  { %2428 = vmatpush.msrb.mxu0 %v7739_v61 }
 0x5d4   :  { %2432 = vmatpush.msrb.mxu0 %v7740_v47 }
 0x5d6   :  { %2436 = vmatpush.msrb.mxu0 %v7741_v29 }
 0x5d8   :  { %2440 = vmatpush.msrb.mxu0 %v7742_v15 }
 0x606   :  { %v2044_v24 = vpop.f32.mrf.mxu1 }
 0x60e   :  { %v2018_v23 = vpop.f32.mrf.mxu0  ;;  %v2092_v32 = vpop.f32.mrf.mxu1 }
 0x60f   :  { %v2045_v2 = vadd.f32 %v2044_v24, %v2018_v23  ;;  %v7747_v24 = vld [vmem:[#allocation13_spill] sm:$0xff]  ;;  %v7750_v23 = vld [vmem:[#allocation32_spill] sm:$0xff] }
 0x616   :  { %v2068_v21 = vpop.f32.mrf.mxu0  ;;  %v2138_v18 = vpop.f32.mrf.mxu1 }
 0x617   :  { %v2069_v62 = vadd.f32 %v2068_v21, %v2045_v2  ;;  %v6425_v2 = vld [vmem:[%s7022_s0 + $0x8] sm:$0xf]  ;;  %v7746_v21 = vld [vmem:[#allocation27_spill] sm:$0xff] }
 0x619   :  { %v2093_v26 = vadd.f32 %v2092_v32, %v2069_v62  ;;  %v7749_v62 = vld [vmem:[#allocation14_spill] sm:$0xff] }
 0x61e   :  { %v2116_v37 = vpop.f32.mrf.mxu0 }
 0x61f   :  { %v2117_v41 = vadd.f32 %v2116_v37, %v2093_v26  ;;  %v7744_v37 = vld [vmem:[#allocation21_spill] sm:$0xff]  ;;  %v7745_v26 = vld [vmem:[#allocation11_spill] sm:$0xff] }
 0x621   :  { %v2139_v1 = vadd.f32 %v2138_v18, %v2117_v41  ;;  %v7748_v18 = vld [vmem:[#allocation28_spill] sm:$0xff] }
 0x623   :  { %v2141_v31 = vmul.f32 %v2139_v1, %v6113_v13  ;;  %v7743_v1 = vld [vmem:[#allocation10_spill] sm:$0xff] }
 0x625   :  { %v2174_v61 = vand.u32 4294901760, %v2141_v31 }
 0x627   :  { %v2175_v22 = vsub.f32 %v2141_v31, %v2174_v61  ;;  %2280 = vmatmul.f32.vlgmr.msra.gmra.mxu1 %v2174_v61  ;;  %v6431_v31 = vand.u32 4294901760, %v6425_v2 }
 0x628   :  { %2687 = vmatpush.msra.mxu1 %v5021_v3 }
 0x629   :  { %2334 = vmatmul.f32.vlgmr.msrb.gmra.mxu2 %v2175_v22  ;;  %v2176_v15 = vand.u32 4294901760, %v2175_v22 }
 0x62a   :  { %2728 = vmatpush.msrb.mxu2 %v7594_v55  ;;  %2689 = vmatpush.msra.mxu1 %v5023_v4 }
 0x62b   :  { %2373 = vmatmul.f32.vlgmr.msrb.gmra.mxu3 %v2176_v15  ;;  %v2177_v41 = vsub.f32 %v2175_v22, %v2176_v15  ;;  %v2523_v22 = vsub.f32 %v6425_v2, %v6431_v31 }
 0x62c   :  { %2732 = vmatpush.msrb.mxu2 %v7595_v33  ;;  %2795 = vmatpush.msrb.mxu3 %v5021_v3 }
 0x62d   :  { %v2178_v13 = vand.u32 4294901760, %v2177_v41  ;;  %2691 = vmatpush.msra.mxu1 %v7572_v39  ;;  %v2524_v32 = vand.u32 4294901760, %v2523_v22  ;;  %v7751_v41 = vld [vmem:[#allocation19_spill] sm:$0xff] }
 0x62e   :  { %2736 = vmatpush.msrb.mxu2 %v7596_v40  ;;  %2797 = vmatpush.msrb.mxu3 %v5023_v4 }
 0x62f   :  { %2179 = vmatmul.f32.vlgmr.msra.gmra.mxu0 %v2178_v13  ;;  %2479 = vmatmul.f32.vlgmr.msrb.gmra.mxu1 %v2174_v61  ;;  %v2525_v15 = vsub.f32 %v2523_v22, %v2524_v32  ;;  %v7752_v13 = vld [vmem:[#allocation37_spill] sm:$0xff] }
 0x630   :  { %2634 = vmatpush.msra.mxu0 %v7597_v20  ;;  %2740 = vmatpush.msrb.mxu2 %v7598_v36 }
 0x631   :  { %2799 = vmatpush.msrb.mxu3 %v7572_v39  ;;  %2693 = vmatpush.msra.mxu1 %v7573_v30 }
 0x632   :  { %2637 = vmatpush.msra.mxu0 %v7743_v1  ;;  %2744 = vmatpush.msrb.mxu2 %v7744_v37  ;;  %v7810_v37 = vld [vmem:[#allocation116_spill] sm:$0xff] }
 0x633   :  { %2801 = vmatpush.msrb.mxu3 %v7573_v30  ;;  %2695 = vmatpush.msra.mxu1 %v7575_v5 }
 0x634   :  { %2640 = vmatpush.msra.mxu0 %v7745_v26  ;;  %2748 = vmatpush.msrb.mxu2 %v7746_v21  ;;  %v7804_v21 = vld [vmem:[#allocation123_spill] sm:$0xff]  ;;  %v7807_v26 = vld [vmem:[#allocation124_spill] sm:$0xff] }
 0x635   :  { %2803 = vmatpush.msrb.mxu3 %v7575_v5  ;;  %2697 = vmatpush.msra.mxu1 %v7577_v9 }
 0x636   :  { %2643 = vmatpush.msra.mxu0 %v7747_v24  ;;  %2752 = vmatpush.msrb.mxu2 %v7748_v18  ;;  %v7754_v18 = vld [vmem:[#allocation40_spill] sm:$0xff] }
 0x637   :  { %2442 = vmatmul.f32.vlgmr.msrb.gmra.mxu0 %v2174_v61  ;;  %2805 = vmatpush.msrb.mxu3 %v7577_v9  ;;  %v7753_v61 = vld [vmem:[#allocation22_spill] sm:$0xff]  ;;  %v7756_v24 = vld [vmem:[#allocation44_spill] sm:$0xff] }
 0x638   :  { %2646 = vmatpush.msra.mxu0 %v7749_v62  ;;  %2756 = vmatpush.msrb.mxu2 %v7750_v23  ;;  %v2526_v23 = vand.u32 4294901760, %v2525_v15  ;;  %v7755_v62 = vld [vmem:[#allocation24_spill] sm:$0xff] }
 0x639   :  { %2807 = vmatpush.msrb.mxu3 %v7579_v52  ;;  %2699 = vmatpush.msra.mxu1 %v7579_v52  ;;  %v7760_v15 = vld [vmem:[#allocation48_spill] sm:$0xff] }
 0x63a   :  { %2649 = vmatpush.msra.mxu0 %v7751_v41  ;;  %2760 = vmatpush.msrb.mxu2 %v7752_v13  ;;  %v7757_v13 = vld [vmem:[#allocation31_spill] sm:$0xff] }
 0x63b   :  { %2809 = vmatpush.msrb.mxu3 %v7581_v63  ;;  %2701 = vmatpush.msra.mxu1 %v7581_v63  ;;  %v7758_v41 = vld [vmem:[#allocation47_spill] sm:$0xff] }
 0x63c   :  { %2652 = vmatpush.msra.mxu0 %v7753_v61  ;;  %2764 = vmatpush.msrb.mxu2 %v7754_v18  ;;  %v7759_v18 = vld [vmem:[#allocation34_spill] sm:$0xff] }
 0x63d   :  { %2811 = vmatpush.msrb.mxu3 %v7583_v43  ;;  %2703 = vmatpush.msra.mxu1 %v7583_v43  ;;  %v7801_v61 = vld [vmem:[#allocation122_spill] sm:$0xff] }
 0x63e   :  { %2655 = vmatpush.msra.mxu0 %v7755_v62  ;;  %2768 = vmatpush.msrb.mxu2 %v7756_v24  ;;  %v7761_v24 = vld [vmem:[#allocation38_spill] sm:$0xff]  ;;  %v7798_v62 = vld [vmem:[#allocation121_spill] sm:$0xff] }
 0x63f   :  { %2813 = vmatpush.msrb.mxu3 %v7585_v50  ;;  %2705 = vmatpush.msra.mxu1 %v7585_v50 }
 0x640   :  { %2658 = vmatpush.msra.mxu0 %v7757_v13  ;;  %2772 = vmatpush.msrb.mxu2 %v7758_v41  ;;  %v7762_v41 = vld [vmem:[#allocation41_spill] sm:$0xff]  ;;  %v7795_v13 = vld [vmem:[#allocation119_spill] sm:$0xff] }
 0x641   :  { %2815 = vmatpush.msrb.mxu3 %v5145_v46  ;;  %2527 = vmatmul.f32.vlgmr.msra.gmra.mxu2 %v2526_v23  ;;  %v7763_v23 = vld [vmem:[#allocation42_spill] sm:$0xff] }
 0x642   :  { %2661 = vmatpush.msra.mxu0 %v7759_v18  ;;  %2707 = vmatpush.msra.mxu1 %v5145_v46  ;;  %v7792_v18 = vld [vmem:[#allocation117_spill] sm:$0xff] }
 0x643   :  { %2776 = vmatpush.msrb.mxu2 %v7760_v15  ;;  %2817 = vmatpush.msrb.mxu3 %v7588_v42  ;;  %v7783_v15 = vld [vmem:[#allocation107_spill] sm:$0xff] }
 0x644   :  { %2664 = vmatpush.msra.mxu0 %v7761_v24  ;;  %2628 = vmatmul.f32.vlgmr.msra.gmra.mxu3 %v6431_v31  ;;  %v7789_v24 = vld [vmem:[#allocation114_spill] sm:$0xff] }
 0x645   :  { %2709 = vmatpush.msra.mxu1 %v7588_v42  ;;  %2780 = vmatpush.msrb.mxu2 %v7620_v17  ;;  %v7767_v17 = vld [vmem:[#allocation83_spill] sm:$0xff] }
 0x646   :  { %2667 = vmatpush.msra.mxu0 %v7762_v41  ;;  %2819 = vmatpush.msrb.mxu3 %v5169_v54  ;;  %v7786_v41 = vld [vmem:[#allocation111_spill] sm:$0xff] }
 0x647   :  { %2711 = vmatpush.msra.mxu1 %v5169_v54  ;;  %2784 = vmatpush.msrb.mxu2 %v7623_v6  ;;  %v7764_v6 = vld [vmem:[#allocation53_spill] sm:$0xff] }
 0x648   :  { %2670 = vmatpush.msra.mxu0 %v7763_v23  ;;  %2821 = vmatpush.msrb.mxu3 %v5187_v60  ;;  %v7769_v23 = vld [vmem:[#allocation68_spill] sm:$0xff] }
 0x649   :  { %2713 = vmatpush.msra.mxu1 %v5187_v60  ;;  %2788 = vmatpush.msrb.mxu2 %v7626_v0  ;;  %v7765_v0 = vld [vmem:[#allocation81_spill] sm:$0xff] }
 0x64a   :  { %2673 = vmatpush.msra.mxu0 %v7621_v7  ;;  %2823 = vmatpush.msrb.mxu3 %v5221_v12  ;;  %v7766_v7 = vld [vmem:[#allocation67_spill] sm:$0xff] }
 0x64b   :  { %2790 = vmatmul.f32.vlgmr.msrb.gmra.mxu2 %v6431_v31  ;;  %2715 = vmatpush.msra.mxu1 %v5221_v12 }
 0x64c   :  { %2676 = vmatpush.msra.mxu0 %v7624_v27  ;;  %2825 = vmatpush.msrb.mxu3 %v5240_v34  ;;  %v7768_v27 = vld [vmem:[#allocation62_spill] sm:$0xff] }
 0x64d   :  { %2827 = vmatmul.f32.vlgmr.msrb.gmra.mxu3 %v6431_v31  ;;  %2717 = vmatpush.msra.mxu1 %v5240_v34  ;;  %v7770_v31 = vld [vmem:[#allocation88_spill] sm:$0xff] }
 0x64e   :  { %2679 = vmatpush.msra.mxu0 %v7764_v6  ;;  %2721 = vmatmul.f32.vlgmr.msra.gmra.mxu1 %v2524_v32  ;;  %v7771_v32 = vld [vmem:[#allocation63_spill] sm:$0xff]  ;;  %v7773_v6 = vld [vmem:[#allocation92_spill] sm:$0xff] }
 0x64f   :  { %2682 = vmatmul.f32.vlgmr.msra.gmra.mxu0 %v2523_v22  ;;  %2878 = vmatpush.msrb.mxu1 %v7765_v0  ;;  %v7772_v22 = vld [vmem:[#allocation69_spill] sm:$0xff]  ;;  %v7780_v0 = vld [vmem:[#allocation103_spill] sm:$0xff] }
 0x650   :  { %2833 = vmatpush.msrb.mxu0 %v5337_v51  ;;  %2976 = vmatpush.msra.mxu2 %v7766_v7  ;;  %v7774_v7 = vld [vmem:[#allocation71_spill] sm:$0xff] }
 0x651   :  { %2884 = vmatpush.msrb.mxu1 %v7767_v17  ;;  %3029 = vmatpush.msra.mxu3 %v5337_v51  ;;  %v7775_v17 = vld [vmem:[#allocation95_spill] sm:$0xff] }
 0x652   :  { %2835 = vmatpush.msrb.mxu0 %v7768_v27  ;;  %2979 = vmatpush.msra.mxu2 %v7769_v23  ;;  %v7776_v23 = vld [vmem:[#allocation72_spill] sm:$0xff] }
 0x653   :  { %2890 = vmatpush.msrb.mxu1 %v7770_v31  ;;  %3031 = vmatpush.msra.mxu3 %v7768_v27  ;;  %v7777_v31 = vld [vmem:[#allocation99_spill] sm:$0xff] }
 0x654   :  { %2837 = vmatpush.msrb.mxu0 %v7771_v32  ;;  %2982 = vmatpush.msra.mxu2 %v7772_v22  ;;  %v7778_v22 = vld [vmem:[#allocation66_spill] sm:$0xff] }
 0x655   :  { %2896 = vmatpush.msrb.mxu1 %v7773_v6  ;;  %3033 = vmatpush.msra.mxu3 %v7771_v32  ;;  %v7779_v6 = vld [vmem:[#allocation78_spill] sm:$0xff] }
 0x656   :  { %2839 = vmatpush.msrb.mxu0 %v5353_v25  ;;  %2985 = vmatpush.msra.mxu2 %v7774_v7  ;;  %v7781_v7 = vld [vmem:[#allocation70_spill] sm:$0xff] }
 0x657   :  { %2902 = vmatpush.msrb.mxu1 %v7775_v17  ;;  %3035 = vmatpush.msra.mxu3 %v5353_v25  ;;  %v7782_v17 = vld [vmem:[#allocation79_spill] sm:$0xff] }
 0x658   :  { %2841 = vmatpush.msrb.mxu0 %v5355_v19  ;;  %2988 = vmatpush.msra.mxu2 %v7776_v23  ;;  %v7784_v23 = vld [vmem:[#allocation76_spill] sm:$0xff] }
 0x659   :  { %2908 = vmatpush.msrb.mxu1 %v7777_v31  ;;  %3037 = vmatpush.msra.mxu3 %v5355_v19  ;;  %v7785_v31 = vld [vmem:[#allocation82_spill] sm:$0xff] }
 0x65a   :  { %2843 = vmatpush.msrb.mxu0 %v7778_v22  ;;  %2991 = vmatpush.msra.mxu2 %v7779_v6  ;;  %v7787_v6 = vld [vmem:[#allocation86_spill] sm:$0xff] }
 0x65b   :  { %2914 = vmatpush.msrb.mxu1 %v7780_v0  ;;  %3039 = vmatpush.msra.mxu3 %v7778_v22  ;;  %v7788_v0 = vld [vmem:[#allocation91_spill] sm:$0xff] }
 0x65c   :  { %2845 = vmatpush.msrb.mxu0 %v7781_v7  ;;  %2994 = vmatpush.msra.mxu2 %v7782_v17  ;;  %v7790_v17 = vld [vmem:[#allocation87_spill] sm:$0xff] }
 0x65d   :  { %2920 = vmatpush.msrb.mxu1 %v7783_v15  ;;  %3041 = vmatpush.msra.mxu3 %v7781_v7  ;;  %v7791_v15 = vld [vmem:[#allocation93_spill] sm:$0xff] }
 0x65e   :  { %2847 = vmatpush.msrb.mxu0 %v7784_v23  ;;  %2997 = vmatpush.msra.mxu2 %v7785_v31  ;;  %v7793_v31 = vld [vmem:[#allocation89_spill] sm:$0xff] }
 0x65f   :  { %2926 = vmatpush.msrb.mxu1 %v7786_v41  ;;  %3043 = vmatpush.msra.mxu3 %v7784_v23  ;;  %v7794_v41 = vld [vmem:[#allocation97_spill] sm:$0xff] }
 0x660   :  { %2849 = vmatpush.msrb.mxu0 %v7787_v6  ;;  %3000 = vmatpush.msra.mxu2 %v7788_v0  ;;  %v7796_v0 = vld [vmem:[#allocation94_spill] sm:$0xff] }
 0x661   :  { %2932 = vmatpush.msrb.mxu1 %v7789_v24  ;;  %3045 = vmatpush.msra.mxu3 %v7787_v6  ;;  %v7797_v24 = vld [vmem:[#allocation101_spill] sm:$0xff] }
 0x662   :  { %2851 = vmatpush.msrb.mxu0 %v7790_v17  ;;  %3003 = vmatpush.msra.mxu2 %v7791_v15  ;;  %v7799_v15 = vld [vmem:[#allocation98_spill] sm:$0xff] }
 0x663   :  { %2938 = vmatpush.msrb.mxu1 %v7792_v18  ;;  %3047 = vmatpush.msra.mxu3 %v7790_v17  ;;  %v7800_v18 = vld [vmem:[#allocation105_spill] sm:$0xff] }
 0x664   :  { %2853 = vmatpush.msrb.mxu0 %v7793_v31  ;;  %3006 = vmatpush.msra.mxu2 %v7794_v41  ;;  %v7802_v41 = vld [vmem:[#allocation102_spill] sm:$0xff] }
 0x665   :  { %2944 = vmatpush.msrb.mxu1 %v7795_v13  ;;  %3049 = vmatpush.msra.mxu3 %v7793_v31  ;;  %v7803_v13 = vld [vmem:[#allocation109_spill] sm:$0xff] }
 0x666   :  { %2855 = vmatpush.msrb.mxu0 %v7796_v0  ;;  %3009 = vmatpush.msra.mxu2 %v7797_v24  ;;  %v7805_v24 = vld [vmem:[#allocation106_spill] sm:$0xff] }
 0x667   :  { %2950 = vmatpush.msrb.mxu1 %v7798_v62  ;;  %3051 = vmatpush.msra.mxu3 %v7796_v0  ;;  %v7806_v62 = vld [vmem:[#allocation113_spill] sm:$0xff] }
 0x668   :  { %2857 = vmatpush.msrb.mxu0 %v7799_v15  ;;  %3012 = vmatpush.msra.mxu2 %v7800_v18  ;;  %v7808_v18 = vld [vmem:[#allocation110_spill] sm:$0xff] }
 0x669   :  { %2956 = vmatpush.msrb.mxu1 %v7801_v61  ;;  %3053 = vmatpush.msra.mxu3 %v7799_v15  ;;  %v7809_v61 = vld [vmem:[#allocation73_spill] sm:$0xff] }
 0x66a   :  { %2859 = vmatpush.msrb.mxu0 %v7802_v41  ;;  %3015 = vmatpush.msra.mxu2 %v7803_v13  ;;  %v7811_v13 = vld [vmem:[#allocation74_spill] sm:$0xff] }
 0x66b   :  { %2962 = vmatpush.msrb.mxu1 %v7804_v21  ;;  %3055 = vmatpush.msra.mxu3 %v7802_v41  ;;  %v7812_v21 = vld [vmem:[#allocation128_spill] sm:$0xff] }
 0x66c   :  { %2861 = vmatpush.msrb.mxu0 %v7805_v24  ;;  %3018 = vmatpush.msra.mxu2 %v7806_v62  ;;  %v7813_v62 = vld [vmem:[#allocation75_spill] sm:$0xff] }
 0x66d   :  { %2968 = vmatpush.msrb.mxu1 %v7807_v26  ;;  %3057 = vmatpush.msra.mxu3 %v7805_v24  ;;  %v7814_v26 = vld [vmem:[#allocation77_spill] sm:$0xff] }
 0x66e   :  { %2863 = vmatpush.msrb.mxu0 %v7808_v18  ;;  %3021 = vmatpush.msra.mxu2 %v7810_v37  ;;  %v7815_v37 = vld [vmem:[#allocation80_spill] sm:$0xff] }
 0x66f   :  { %3137 = vmatpush.msra.mxu1 %v5337_v51  ;;  %3059 = vmatpush.msra.mxu3 %v7808_v18 }
 0x670   :  { %3070 = vmatpush.msra.mxu0 %v7809_v61  ;;  %3216 = vmatpush.msrb.mxu2 %v7661_v53  ;;  %v7816_v61 = vld [vmem:[#allocation84_spill] sm:$0xff] }
 0x671   :  { %3139 = vmatpush.msra.mxu1 %v7768_v27  ;;  %3246 = vmatpush.msrb.mxu3 %v7812_v21  ;;  %v7817_v21 = vld [vmem:[#allocation85_spill] sm:$0xff] }
 0x672   :  { %3074 = vmatpush.msra.mxu0 %v7811_v13  ;;  %v7818_v13 = vld [vmem:[#allocation90_spill] sm:$0xff] }
 0x673   :  { %3141 = vmatpush.msra.mxu1 %v7771_v32 }
 0x674   :  { %3078 = vmatpush.msra.mxu0 %v7813_v62  ;;  %v7819_v62 = vld [vmem:[#allocation96_spill] sm:$0xff] }
 0x675   :  { %3143 = vmatpush.msra.mxu1 %v5353_v25 }
 0x676   :  { %3082 = vmatpush.msra.mxu0 %v7814_v26  ;;  %v7820_v26 = vld [vmem:[#allocation100_spill] sm:$0xff] }
 0x677   :  { %3145 = vmatpush.msra.mxu1 %v5355_v19 }
 0x678   :  { %3086 = vmatpush.msra.mxu0 %v7815_v37  ;;  %v7821_v37 = vld [vmem:[#allocation104_spill] sm:$0xff] }
 0x679   :  { %3147 = vmatpush.msra.mxu1 %v7778_v22 }
 0x67a   :  { %3090 = vmatpush.msra.mxu0 %v7816_v61  ;;  %v7822_v61 = vld [vmem:[#allocation108_spill] sm:$0xff] }
 0x67b   :  { %3149 = vmatpush.msra.mxu1 %v7781_v7 }
 0x67c   :  { %3094 = vmatpush.msra.mxu0 %v7817_v21  ;;  %v7823_v21 = vld [vmem:[#allocation112_spill] sm:$0xff] }
 0x67d   :  { %3151 = vmatpush.msra.mxu1 %v7784_v23 }
 0x67e   :  { %3098 = vmatpush.msra.mxu0 %v7818_v13  ;;  %v7824_v13 = vld [vmem:[#allocation115_spill] sm:$0xff] }
 0x67f   :  { %3153 = vmatpush.msra.mxu1 %v7787_v6 }
 0x680   :  { %3102 = vmatpush.msra.mxu0 %v7819_v62  ;;  %v7825_v62 = vld [vmem:[#allocation118_spill] sm:$0xff] }
 0x681   :  { %3155 = vmatpush.msra.mxu1 %v7790_v17 }
 0x682   :  { %3106 = vmatpush.msra.mxu0 %v7820_v26  ;;  %v7826_v26 = vld [vmem:[#allocation120_spill] sm:$0xff] }
 0x683   :  { %3157 = vmatpush.msra.mxu1 %v7793_v31 }
 0x684   :  { %3110 = vmatpush.msra.mxu0 %v7821_v37 }
 0x685   :  { %3159 = vmatpush.msra.mxu1 %v7796_v0 }
 0x686   :  { %3114 = vmatpush.msra.mxu0 %v7822_v61 }
 0x687   :  { %3161 = vmatpush.msra.mxu1 %v7799_v15 }
 0x688   :  { %3118 = vmatpush.msra.mxu0 %v7823_v21 }
 0x689   :  { %3163 = vmatpush.msra.mxu1 %v7802_v41 }
 0x68a   :  { %3122 = vmatpush.msra.mxu0 %v7824_v13 }
 0x68b   :  { %3165 = vmatpush.msra.mxu1 %v7805_v24  ;;  %v7827_v24 = vld [vmem:[#allocation5_spill] sm:$0xff] }
 0x68c   :  { %3126 = vmatpush.msra.mxu0 %v7825_v62 }
 0x68d   :  { %3167 = vmatpush.msra.mxu1 %v7808_v18 }
 0x68e   :  { %3130 = vmatpush.msra.mxu0 %v7826_v26 }
 0x6a4   :  { %v2281_v37 = vpop.f32.mrf.mxu1 }
 0x6ac   :  { %v2180_v0 = vpop.f32.mrf.mxu0  ;;  %v2335_v61 = vpop.f32.mrf.mxu2 }
 0x6ad   :  { %v2282_v31 = vadd.f32 %v2281_v37, %v2180_v0  ;;  %v2480_v41 = vpop.f32.mrf.mxu1 }
 0x6ae   :  { %v2374_v15 = vpop.f32.mrf.mxu3 }
 0x6af   :  { %v2336_v17 = vadd.f32 %v2335_v61, %v2282_v31  ;;  %v7836_v31 = vld [vmem:[#allocation144_spill] sm:$0xff] }
 0x6b1   :  { %v2375_v6 = vadd.f32 %v2374_v15, %v2336_v17 }
 0x6b4   :  { %v2443_v21 = vpop.f32.mrf.mxu0 }
 0x6b5   :  { %v2444_v23 = vadd.f32 %v2443_v21, %v2375_v6 }
 0x6b7   :  { %v6594_v7 = vadd.f32 %v2480_v41, %v2444_v23  ;;  %v7833_v41 = vld [vmem:[#allocation135_spill] sm:$0xff]  ;;  %v7835_v23 = vld [vmem:[#allocation141_spill] sm:$0xff] }
 0x6c4   :  { %v2528_v13 = vpop.f32.mrf.mxu2 }
 0x6c5   :  { %v2529_v22 = vadd.f32 %v7827_v24, %v2528_v13  ;;  %v7828_v24 = vld [vmem:[#allocation126_spill] sm:$0xff]  ;;  %v7834_v13 = vld [vmem:[#allocation137_spill] sm:$0xff] }
 0x6c7   :  { %v2629_v62 = vpop.f32.mrf.mxu3 }
 0x6c8   :  { %v2630_v19 = vadd.f32 %v2629_v62, %v2529_v22  ;;  %v7832_v62 = vld [vmem:[#allocation134_spill] sm:$0xff] }
 0x6c9   :  { %v7838_v22 = vld [vmem:[#allocation150_spill] sm:$0xff] }
 0x6cb   :  { %v2722_v25 = vpop.f32.mrf.mxu1 }
 0x6cc   :  { %v2683_v18 = vpop.f32.mrf.mxu0 }
 0x6cd   :  { %v2684_v26 = vadd.f32 %v2683_v18, %v2630_v19  ;;  %v7831_v18 = vld [vmem:[#allocation132_spill] sm:$0xff] }
 0x6ce   :  { %v2791_v32 = vpop.f32.mrf.mxu2 }
 0x6cf   :  { %v2723_v27 = vadd.f32 %v2722_v25, %v2684_v26  ;;  %v7830_v26 = vld [vmem:[#allocation130_spill] sm:$0xff] }
 0x6d0   :  { %v2828_v0 = vpop.f32.mrf.mxu3 }
 0x6d1   :  { %v2792_v37 = vadd.f32 %v2791_v32, %v2723_v27  ;;  %v7829_v27 = vld [vmem:[#allocation129_spill] sm:$0xff]  ;;  %v7837_v32 = vld [vmem:[#allocation147_spill] sm:$0xff] }
 0x6d3   :  { %v2829_v61 = vadd.f32 %v2828_v0, %v2792_v37  ;;  %v7839_v0 = vld [vmem:[#allocation153_spill] sm:$0xff]  ;;  %v7840_v37 = vld [vmem:[#allocation162_spill] sm:$0xff] }
 0x6d5   :  { %4932 = vtanh.f32 %v2829_v61  ;;  %v7841_v61 = vld [vmem:[#allocation25_spill] sm:$0xff] }
 0x6db   :  { %v4933_v17 = vpop.eup %4932 }
 0x6dc   :  { %v2864_v15 = vand.u32 4294901760, %v4933_v17 }
 0x6de   :  { %2970 = vmatmul.f32.vlgmr.msrb.gmra.mxu1 %v2864_v15  ;;  %v2865_v6 = vsub.f32 %v4933_v17, %v2864_v15  ;;  %v7842_v17 = vld [vmem:[#allocation164_spill] sm:$0xff] }
 0x6df   :  { %3544 = vmatpush.msrb.mxu1 %v5726_v28 }
 0x6e0   :  { %3024 = vmatmul.f32.vlgmr.msra.gmra.mxu2 %v2865_v6  ;;  %v2866_v21 = vand.u32 4294901760, %v2865_v6 }
 0x6e1   :  { %3269 = vmatpush.msra.mxu2 %v7828_v24  ;;  %3546 = vmatpush.msrb.mxu1 %v5728_v11 }
 0x6e2   :  { %3063 = vmatmul.f32.vlgmr.msra.gmra.mxu3 %v2866_v21  ;;  %v2867_v19 = vsub.f32 %v2865_v6, %v2866_v21  ;;  %v7844_v6 = vld [vmem:[#allocation166_spill] sm:$0xff]  ;;  %v7845_v21 = vld [vmem:[#allocation29_spill] sm:$0xff] }
 0x6e3   :  { %3292 = vmatpush.msra.mxu3 %v7661_v53  ;;  %3548 = vmatpush.msrb.mxu1 %v5730_v49 }
 0x6e4   :  { %v2868_v25 = vand.u32 4294901760, %v2867_v19  ;;  %v7846_v19 = vld [vmem:[#allocation169_spill] sm:$0xff] }
 0x6e5   :  { %3550 = vmatpush.msrb.mxu1 %v5744_v56 }
 0x6e6   :  { %2869 = vmatmul.f32.vlgmr.msrb.gmra.mxu0 %v2868_v25  ;;  %3169 = vmatmul.f32.vlgmr.msra.gmra.mxu1 %v2864_v15  ;;  %v7847_v25 = vld [vmem:[#allocation33_spill] sm:$0xff] }
 0x6e7   :  { %3491 = vmatpush.msrb.mxu0 %v7829_v27  ;;  %3552 = vmatpush.msrb.mxu1 %v5750_v45 }
 0x6e9   :  { %3494 = vmatpush.msrb.mxu0 %v7830_v26  ;;  %3554 = vmatpush.msrb.mxu1 %v5763_v48 }
 0x6eb   :  { %3497 = vmatpush.msrb.mxu0 %v7831_v18  ;;  %3556 = vmatpush.msrb.mxu1 %v5791_v38 }
 0x6ed   :  { %3500 = vmatpush.msrb.mxu0 %v7832_v62  ;;  %3558 = vmatpush.msrb.mxu1 %v5807_v44 }
 0x6ee   :  { %3132 = vmatmul.f32.vlgmr.msra.gmra.mxu0 %v2864_v15  ;;  %v7843_v15 = vld [vmem:[#allocation26_spill] sm:$0xff] }
 0x6ef   :  { %3503 = vmatpush.msrb.mxu0 %v7833_v41  ;;  %3560 = vmatpush.msrb.mxu1 %v5825_v58 }
 0x6f1   :  { %3506 = vmatpush.msrb.mxu0 %v7834_v13  ;;  %3562 = vmatpush.msrb.mxu1 %v5842_v8 }
 0x6f3   :  { %3509 = vmatpush.msrb.mxu0 %v7835_v23  ;;  %3564 = vmatpush.msrb.mxu1 %v5857_v57 }
 0x6f5   :  { %3512 = vmatpush.msrb.mxu0 %v7836_v31  ;;  %3566 = vmatpush.msrb.mxu1 %v5943_v59 }
 0x6f7   :  { %3515 = vmatpush.msrb.mxu0 %v7837_v32  ;;  %3568 = vmatpush.msrb.mxu1 %v5952_v14 }
 0x6f9   :  { %3518 = vmatpush.msrb.mxu0 %v7838_v22  ;;  %3570 = vmatpush.msrb.mxu1 %v5965_v35 }
 0x6fb   :  { %3521 = vmatpush.msrb.mxu0 %v7839_v0  ;;  %3572 = vmatpush.msrb.mxu1 %v5981_v16  ;;  %v7848_v0 = vld [vmem:[#allocation172_spill] sm:$0xff] }
 0x6fd   :  { %3524 = vmatpush.msrb.mxu0 %v7840_v37  ;;  %3574 = vmatpush.msrb.mxu1 %v6000_v10  ;;  %v7849_v37 = vld [vmem:[#allocation36_spill] sm:$0xff] }
 0x6ff   :  { %3741 = vmatpush.msra.mxu1 %v7841_v61  ;;  %3527 = vmatpush.msrb.mxu0 %v7842_v17  ;;  %v7850_v61 = vld [vmem:[#allocation39_spill] sm:$0xff] }
 0x701   :  { %3747 = vmatpush.msra.mxu1 %v7843_v15  ;;  %3530 = vmatpush.msrb.mxu0 %v7844_v6  ;;  %v7851_v15 = vld [vmem:[#allocation43_spill] sm:$0xff] }
 0x703   :  { %3753 = vmatpush.msra.mxu1 %v7845_v21  ;;  %3533 = vmatpush.msrb.mxu0 %v7846_v19  ;;  %v7852_v21 = vld [vmem:[#allocation45_spill] sm:$0xff] }
 0x705   :  { %3759 = vmatpush.msra.mxu1 %v7847_v25  ;;  %3536 = vmatpush.msrb.mxu0 %v7848_v0  ;;  %v7853_v25 = vld [vmem:[#allocation49_spill] sm:$0xff]  ;;  %v7854_v0 = vld [vmem:[#allocation51_spill] sm:$0xff] }
 0x707   :  { %3696 = vmatpush.msra.mxu0 %v5021_v3  ;;  %3765 = vmatpush.msra.mxu1 %v7849_v37  ;;  %v7855_v37 = vld [vmem:[#allocation54_spill] sm:$0xff] }
 0x709   :  { %3698 = vmatpush.msra.mxu0 %v5023_v4  ;;  %3771 = vmatpush.msra.mxu1 %v7850_v61  ;;  %v7856_v61 = vld [vmem:[#allocation56_spill] sm:$0xff] }
 0x70b   :  { %3700 = vmatpush.msra.mxu0 %v7572_v39  ;;  %3777 = vmatpush.msra.mxu1 %v7851_v15  ;;  %v7857_v15 = vld [vmem:[#allocation58_spill] sm:$0xff] }
 0x70d   :  { %3702 = vmatpush.msra.mxu0 %v7573_v30  ;;  %3783 = vmatpush.msra.mxu1 %v7852_v21  ;;  %v7858_v21 = vld [vmem:[#allocation59_spill] sm:$0xff] }
 0x70f   :  { %3704 = vmatpush.msra.mxu0 %v7575_v5  ;;  %3789 = vmatpush.msra.mxu1 %v7853_v25  ;;  %v7859_v25 = vld [vmem:[#allocation60_spill] sm:$0xff] }
 0x711   :  { %3706 = vmatpush.msra.mxu0 %v7577_v9  ;;  %3795 = vmatpush.msra.mxu1 %v7854_v0  ;;  %v7860_v0 = vld [vmem:[#allocation61_spill] sm:$0xff] }
 0x713   :  { %3708 = vmatpush.msra.mxu0 %v7579_v52  ;;  %3801 = vmatpush.msra.mxu1 %v7855_v37 }
 0x715   :  { %3710 = vmatpush.msra.mxu0 %v7581_v63  ;;  %3807 = vmatpush.msra.mxu1 %v7856_v61 }
 0x717   :  { %3712 = vmatpush.msra.mxu0 %v7583_v43  ;;  %3813 = vmatpush.msra.mxu1 %v7857_v15 }
 0x719   :  { %3714 = vmatpush.msra.mxu0 %v7585_v50  ;;  %3819 = vmatpush.msra.mxu1 %v7858_v21 }
 0x71b   :  { %3716 = vmatpush.msra.mxu0 %v5145_v46  ;;  %3825 = vmatpush.msra.mxu1 %v7859_v25 }
 0x71d   :  { %3718 = vmatpush.msra.mxu0 %v7588_v42  ;;  %3831 = vmatpush.msra.mxu1 %v7860_v0 }
 0x71f   :  { %3720 = vmatpush.msra.mxu0 %v5169_v54 }
 0x721   :  { %3722 = vmatpush.msra.mxu0 %v5187_v60 }
 0x723   :  { %3724 = vmatpush.msra.mxu0 %v5221_v12 }
 0x725   :  { %3726 = vmatpush.msra.mxu0 %v5240_v34 }
 0x75b   :  { %v2971_v37 = vpop.f32.mrf.mxu1 }
 0x763   :  { %v2870_v61 = vpop.f32.mrf.mxu0  ;;  %v3025_v21 = vpop.f32.mrf.mxu2 }
 0x764   :  { %v2972_v15 = vadd.f32 %v2971_v37, %v2870_v61  ;;  %v3170_v32 = vpop.f32.mrf.mxu1 }
 0x765   :  { %v3064_v6 = vpop.f32.mrf.mxu3 }
 0x766   :  { %v3026_v19 = vadd.f32 %v3025_v21, %v2972_v15 }
 0x768   :  { %v3065_v17 = vadd.f32 %v3064_v6, %v3026_v19 }
 0x76b   :  { %v3133_v25 = vpop.f32.mrf.mxu0 }
 0x76c   :  { %v3134_v22 = vadd.f32 %v3133_v25, %v3065_v17 }
 0x76e   :  { %v3171_v31 = vadd.f32 %v3170_v32, %v3134_v22 }
 0x770   :  { %v3173_v0 = vsel %vm761_vm0, %v3171_v31, -inf }
 0x771   :  { %3174 = vmax.xlane.f32.xlu2 %v3173_v0 }
 0x7e4   :  { %v3175_v23 = vpop.xlane.xlu2 %3174 }
 0x7e5   :  { %v3176_v13 = vsub.f32 %v3171_v31, %v3175_v23 }
 0x7e7   :  { %v3177_v41 = vmul.f32 1.442695, %v3176_v13 }
 0x7e9   :  { %4934 = vpow2.f32 %v3177_v41 }
 0x7ef   :  { %v4935_v62 = vpop.eup %4934 }
 0x7f0   :  { %v3179_v18 = vsel %vm761_vm0, %v4935_v62, 0.0 }
 0x7f1   :  { %3180 = vadd.xlane.f32.xlu2 %v3179_v18 }
 0x809   :  { %2484 = vrot.lane.b32.xlu2 %v6594_v7, %s4973_s27 }
 0x864   :  { %v3181_v37 = vpop.xlane.xlu2 %3180 }
 0x865   :  { %4936 = vrcp.f32 %v3181_v37  ;;  %v3193_v19 = vand.u32 2147483648, %v3181_v37  ;;  %v3191_v13 = vand.u32 2147483647, %v3181_v37  ;;  %vm3187_vm14 = vweird.f32 %v3181_v37 }
 0x867   :  { %v3194_v23 = vor.u32 1.1754944e-38, %v3193_v19  ;;  %vm3192_vm1 = vcmp.eq.f32.partialorder %v3191_v13, 8.507059e+37  ;;  %v7864_v19 = vld [vmem:[#allocation145_spill] sm:$0xff]  ;;  %v7867_v13 = vld [vmem:[#allocation154_spill] sm:$0xff] }
 0x86b   :  { %v4937_v17 = vpop.eup %4936 }
 0x86c   :  { %v3183_v6 = vmul.f32 %v4937_v17, %v3181_v37  ;;  %v2485_v32 = vpop.permute.xlu2 %2484  ;;  %vm3188_vm13 = vweird.f32 %v4937_v17  ;;  %v7862_v37 = vld [vmem:[#allocation140_spill] sm:$0xff] }
 0x86d   :  { %2488 = vst.msk [vmem:[#allocation2] sm:$0xf] %vm2487_vm12, %v2485_v32  ;;  %vm3189_vm15 = vmor %vm3187_vm14, %vm3188_vm13 }
 0x86e   :  { %v3184_v22 = vsub.f32 1.0, %v3183_v6 }
 0x870   :  { %v3185_v61 = vmul.f32 %v4937_v17, %v3184_v22  ;;  %v7861_v22 = vld [vmem:[#allocation127_spill] sm:$0xff] }
 0x872   :  { %v3186_v41 = vadd.f32 %v4937_v17, %v3185_v61  ;;  %v7866_v61 = vld [vmem:[#allocation151_spill] sm:$0xff] }
 0x874   :  { %v3190_v18 = vsel %vm3189_vm15, %v4937_v17, %v3186_v41  ;;  %v7863_v17 = vld [vmem:[#allocation143_spill] sm:$0xff]  ;;  %v7868_v41 = vld [vmem:[#allocation156_spill] sm:$0xff] }
 0x875   :  { %v3195_v31 = vsel %vm3192_vm1, %v3194_v23, %v3190_v18  ;;  %v7869_v23 = vld [vmem:[#allocation158_spill] sm:$0xff]  ;;  %v7870_v18 = vld [vmem:[#allocation159_spill] sm:$0xff] }
 0x876   :  { %v3196_v7 = vmul.f32 %v4935_v62, %v3195_v31  ;;  %v7865_v62 = vld [vmem:[#allocation148_spill] sm:$0xff] }
 0x877   :  { %v7871_v31 = vld [vmem:[#allocation160_spill] sm:$0xff] }
 0x878   :  { %v3198_v15 = vsel %vm786_vm6, %v3196_v7, 0  ;;  %v7872_v7 = vld [vmem:[#allocation161_spill] sm:$0xff] }
 0x879   :  { %v3217_v21 = vand.u32 4294901760, %v3198_v15 }
 0x87b   :  { %v3218_v25 = vsub.f32 %v3198_v15, %v3217_v21  ;;  %3248 = vmatmul.f32.vlgmr.msrb.gmra.mxu3 %v3217_v21  ;;  %v7873_v15 = vld [vmem:[#allocation167_spill] sm:$0xff] }
 0x87c   :  { %3340 = vmatpush.msrb.mxu3 %v7661_v53 }
 0x87d   :  { %v3219_v0 = vand.u32 4294901760, %v3218_v25 }
 0x87f   :  { %v3220_v6 = vsub.f32 %v3218_v25, %v3219_v0 }
 0x881   :  { %v3221_v32 = vand.u32 4294901760, %v3220_v6  ;;  %v7877_v6 = vld [vmem:[#allocation176_spill] sm:$0xff] }
 0x883   :  { %3222 = vmatmul.f32.vlgmr.msrb.gmra.mxu2 %v3221_v32  ;;  %3296 = vmatmul.f32.vlgmr.msra.gmra.mxu3 %v3219_v0  ;;  %v7876_v0 = vld [vmem:[#allocation175_spill] sm:$0xff] }
 0x884   :  { %3318 = vmatpush.msrb.mxu2 %v7861_v22  ;;  %3393 = vmatpush.msra.mxu3 %v7862_v37  ;;  %v7878_v32 = vld [vmem:[#allocation131_spill] sm:$0xff] }
 0x886   :  { %3399 = vmatpush.msra.mxu3 %v7863_v17 }
 0x888   :  { %3405 = vmatpush.msra.mxu3 %v7864_v19 }
 0x88a   :  { %3411 = vmatpush.msra.mxu3 %v7865_v62 }
 0x88b   :  { %3272 = vmatmul.f32.vlgmr.msra.gmra.mxu2 %v3218_v25  ;;  %3342 = vmatmul.f32.vlgmr.msrb.gmra.mxu3 %v3217_v21  ;;  %v7874_v25 = vld [vmem:[#allocation170_spill] sm:$0xff] }
 0x88c   :  { %3348 = vmatpush.msra.mxu2 %v5726_v28  ;;  %3417 = vmatpush.msra.mxu3 %v7866_v61 }
 0x88e   :  { %3350 = vmatpush.msra.mxu2 %v5728_v11  ;;  %3423 = vmatpush.msra.mxu3 %v7867_v13 }
 0x890   :  { %3352 = vmatpush.msra.mxu2 %v5730_v49  ;;  %3429 = vmatpush.msra.mxu3 %v7868_v41 }
 0x892   :  { %3354 = vmatpush.msra.mxu2 %v5744_v56  ;;  %3435 = vmatpush.msra.mxu3 %v7869_v23 }
 0x893   :  { %3320 = vmatmul.f32.vlgmr.msrb.gmra.mxu2 %v3217_v21  ;;  %v7875_v21 = vld [vmem:[#allocation173_spill] sm:$0xff] }
 0x894   :  { %3356 = vmatpush.msra.mxu2 %v5750_v45  ;;  %3441 = vmatpush.msra.mxu3 %v7870_v18 }
 0x896   :  { %3358 = vmatpush.msra.mxu2 %v5763_v48  ;;  %3447 = vmatpush.msra.mxu3 %v7871_v31 }
 0x898   :  { %3360 = vmatpush.msra.mxu2 %v5791_v38  ;;  %3453 = vmatpush.msra.mxu3 %v7872_v7 }
 0x89a   :  { %3362 = vmatpush.msra.mxu2 %v5807_v44  ;;  %3459 = vmatpush.msra.mxu3 %v7873_v15  ;;  %v7883_v15 = vld [vmem:[#allocation142_spill] sm:$0xff] }
 0x89c   :  { %3364 = vmatpush.msra.mxu2 %v5825_v58  ;;  %3465 = vmatpush.msra.mxu3 %v7874_v25  ;;  %v7882_v25 = vld [vmem:[#allocation139_spill] sm:$0xff] }
 0x89e   :  { %3366 = vmatpush.msra.mxu2 %v5842_v8  ;;  %3471 = vmatpush.msra.mxu3 %v7875_v21  ;;  %v7881_v21 = vld [vmem:[#allocation138_spill] sm:$0xff] }
 0x8a0   :  { %3368 = vmatpush.msra.mxu2 %v5857_v57  ;;  %3477 = vmatpush.msra.mxu3 %v7876_v0  ;;  %v7880_v0 = vld [vmem:[#allocation136_spill] sm:$0xff] }
 0x8a2   :  { %3370 = vmatpush.msra.mxu2 %v5943_v59  ;;  %3483 = vmatpush.msra.mxu3 %v7877_v6  ;;  %v7879_v6 = vld [vmem:[#allocation133_spill] sm:$0xff] }
 0x8a4   :  { %3652 = vmatpush.msrb.mxu3 %v5726_v28  ;;  %3372 = vmatpush.msra.mxu2 %v5952_v14 }
 0x8a6   :  { %3654 = vmatpush.msrb.mxu3 %v5728_v11  ;;  %3374 = vmatpush.msra.mxu2 %v5965_v35 }
 0x8a8   :  { %3656 = vmatpush.msrb.mxu3 %v5730_v49  ;;  %3376 = vmatpush.msra.mxu2 %v5981_v16 }
 0x8aa   :  { %3658 = vmatpush.msrb.mxu3 %v5744_v56  ;;  %3378 = vmatpush.msra.mxu2 %v6000_v10 }
 0x8ac   :  { %3585 = vmatpush.msrb.mxu2 %v7878_v32  ;;  %3660 = vmatpush.msrb.mxu3 %v5750_v45  ;;  %v7884_v32 = vld [vmem:[#allocation146_spill] sm:$0xff] }
 0x8ae   :  { %3589 = vmatpush.msrb.mxu2 %v7879_v6  ;;  %3662 = vmatpush.msrb.mxu3 %v5763_v48  ;;  %v7885_v6 = vld [vmem:[#allocation149_spill] sm:$0xff] }
 0x8b0   :  { %3593 = vmatpush.msrb.mxu2 %v7880_v0  ;;  %3664 = vmatpush.msrb.mxu3 %v5791_v38  ;;  %v7886_v0 = vld [vmem:[#allocation152_spill] sm:$0xff] }
 0x8b2   :  { %3597 = vmatpush.msrb.mxu2 %v7881_v21  ;;  %3666 = vmatpush.msrb.mxu3 %v5807_v44  ;;  %v7887_v21 = vld [vmem:[#allocation155_spill] sm:$0xff] }
 0x8b4   :  { %3601 = vmatpush.msrb.mxu2 %v7882_v25  ;;  %3668 = vmatpush.msrb.mxu3 %v5825_v58  ;;  %v7888_v25 = vld [vmem:[#allocation157_spill] sm:$0xff] }
 0x8b6   :  { %3605 = vmatpush.msrb.mxu2 %v7883_v15  ;;  %3670 = vmatpush.msrb.mxu3 %v5842_v8  ;;  %v7889_v15 = vld [vmem:[#allocation163_spill] sm:$0xff] }
 0x8b8   :  { %3609 = vmatpush.msrb.mxu2 %v7884_v32  ;;  %3672 = vmatpush.msrb.mxu3 %v5857_v57  ;;  %v7890_v32 = vld [vmem:[#allocation165_spill] sm:$0xff] }
 0x8ba   :  { %3613 = vmatpush.msrb.mxu2 %v7885_v6  ;;  %3674 = vmatpush.msrb.mxu3 %v5943_v59 }
 0x8bc   :  { %3617 = vmatpush.msrb.mxu2 %v7886_v0  ;;  %3676 = vmatpush.msrb.mxu3 %v5952_v14  ;;  %v7891_v0 = vld [vmem:[#allocation174_spill] sm:$0xff] }
 0x8be   :  { %3621 = vmatpush.msrb.mxu2 %v7887_v21  ;;  %3678 = vmatpush.msrb.mxu3 %v5965_v35 }
 0x8c0   :  { %3625 = vmatpush.msrb.mxu2 %v7888_v25  ;;  %3680 = vmatpush.msrb.mxu3 %v5981_v16 }
 0x8c2   :  { %3629 = vmatpush.msrb.mxu2 %v7889_v15  ;;  %3682 = vmatpush.msrb.mxu3 %v6000_v10 }
 0x8c4   :  { %3633 = vmatpush.msrb.mxu2 %v7890_v32 }
 0x8c6   :  { %3637 = vmatpush.msrb.mxu2 %v7740_v47 }
 0x8c8   :  { %3641 = vmatpush.msrb.mxu2 %v7741_v29 }
 0x8ca   :  { %3645 = vmatpush.msrb.mxu2 %v7891_v0 }
 0x8fe   :  { %v3249_v6 = vpop.f32.mrf.mxu3 }
 0x906   :  { %v3223_v21 = vpop.f32.mrf.mxu2  ;;  %v3297_v7 = vpop.f32.mrf.mxu3 }
 0x907   :  { %v3250_v18 = vadd.f32 %v3249_v6, %v3223_v21  ;;  %v7912_v21 = vld [vmem:[#allocation52_spill] sm:$0xff]  ;;  %v7916_v6 = vld [vmem:[#allocation50_spill] sm:$0xff] }
 0x90e   :  { %v3273_v31 = vpop.f32.mrf.mxu2  ;;  %v3343_v15 = vpop.f32.mrf.mxu3 }
 0x90f   :  { %v3274_v25 = vadd.f32 %v3273_v31, %v3250_v18 }
 0x911   :  { %v3298_v23 = vadd.f32 %v3297_v7, %v3274_v25  ;;  %v7906_v7 = vld [vmem:[#allocation34_spill] sm:$0xff] }
 0x912   :  { %v7911_v25 = vld [vmem:[#allocation42_spill] sm:$0xff] }
 0x916   :  { %v3321_v41 = vpop.f32.mrf.mxu2 }
 0x917   :  { %v3322_v13 = vadd.f32 %v3321_v41, %v3298_v23  ;;  %v7902_v41 = vld [vmem:[#allocation24_spill] sm:$0xff]  ;;  %v7904_v23 = vld [vmem:[#allocation31_spill] sm:$0xff] }
 0x919   :  { %v3344_v61 = vadd.f32 %v3343_v15, %v3322_v13  ;;  %v7908_v15 = vld [vmem:[#allocation38_spill] sm:$0xff] }
 0x91b   :  { %v3346_v62 = vmul.f32 %v3344_v61, %v6425_v2  ;;  %v6745_v2 = vld [vmem:[%s7022_s0 + $0xc] sm:$0xf] }
 0x91d   :  { %v3379_v32 = vand.u32 4294901760, %v3346_v62 }
 0x91f   :  { %v3380_v19 = vsub.f32 %v3346_v62, %v3379_v32  ;;  %3485 = vmatmul.f32.vlgmr.msra.gmra.mxu3 %v3379_v32  ;;  %v7900_v62 = vld [vmem:[#allocation22_spill] sm:$0xff] }
 0x920   :  { %3892 = vmatpush.msra.mxu3 %v5021_v3 }
 0x921   :  { %3539 = vmatmul.f32.vlgmr.msrb.gmra.mxu0 %v3380_v19  ;;  %v3381_v0 = vand.u32 4294901760, %v3380_v19 }
 0x922   :  { %3894 = vmatpush.msra.mxu3 %v5023_v4  ;;  %3933 = vmatpush.msrb.mxu0 %v7594_v55  ;;  %v7892_v55 = vld [vmem:[#allocation21_spill] sm:$0xff] }
 0x923   :  { %3578 = vmatmul.f32.vlgmr.msrb.gmra.mxu1 %v3381_v0  ;;  %v3382_v18 = vsub.f32 %v3380_v19, %v3381_v0  ;;  %v7899_v19 = vld [vmem:[#allocation32_spill] sm:$0xff]  ;;  %v7914_v0 = vld [vmem:[#allocation81_spill] sm:$0xff] }
 0x924   :  { %3896 = vmatpush.msra.mxu3 %v7572_v39  ;;  %3937 = vmatpush.msrb.mxu0 %v7595_v33  ;;  %v7893_v33 = vld [vmem:[#allocation11_spill] sm:$0xff] }
 0x925   :  { %v3383_v13 = vand.u32 4294901760, %v3382_v18  ;;  %4000 = vmatpush.msrb.mxu1 %v5021_v3  ;;  %v6752_v3 = vand.u32 4294901760, %v6745_v2  ;;  %v7918_v18 = vld [vmem:[#allocation57_spill] sm:$0xff] }
 0x926   :  { %3898 = vmatpush.msra.mxu3 %v7573_v30  ;;  %3941 = vmatpush.msrb.mxu0 %v7596_v40 }
 0x927   :  { %3384 = vmatmul.f32.vlgmr.msra.gmra.mxu2 %v3383_v13  ;;  %3684 = vmatmul.f32.vlgmr.msrb.gmra.mxu3 %v3379_v32  ;;  %v3728_v40 = vsub.f32 %v6745_v2, %v6752_v3  ;;  %v7919_v13 = vld [vmem:[#allocation53_spill] sm:$0xff] }
 0x928   :  { %3839 = vmatpush.msra.mxu2 %v7597_v20  ;;  %3900 = vmatpush.msra.mxu3 %v7575_v5  ;;  %v7895_v20 = vld [vmem:[#allocation13_spill] sm:$0xff] }
 0x929   :  { %4002 = vmatpush.msrb.mxu1 %v5023_v4  ;;  %3945 = vmatpush.msrb.mxu0 %v7598_v36  ;;  %v7894_v4 = vld [vmem:[#allocation27_spill] sm:$0xff]  ;;  %v7897_v36 = vld [vmem:[#allocation28_spill] sm:$0xff] }
 0x92a   :  { %3842 = vmatpush.msra.mxu2 %v7743_v1  ;;  %3902 = vmatpush.msra.mxu3 %v7577_v9  ;;  %v7898_v1 = vld [vmem:[#allocation19_spill] sm:$0xff] }
 0x92b   :  { %4004 = vmatpush.msrb.mxu1 %v7572_v39  ;;  %3949 = vmatpush.msrb.mxu0 %v7892_v55  ;;  %v7896_v39 = vld [vmem:[#allocation14_spill] sm:$0xff]  ;;  %v7922_v55 = vld [vmem:[#allocation92_spill] sm:$0xff] }
 0x92c   :  { %3845 = vmatpush.msra.mxu2 %v7893_v33  ;;  %3904 = vmatpush.msra.mxu3 %v7579_v52  ;;  %v7924_v33 = vld [vmem:[#allocation68_spill] sm:$0xff] }
 0x92d   :  { %4006 = vmatpush.msrb.mxu1 %v7573_v30  ;;  %3953 = vmatpush.msrb.mxu0 %v7894_v4  ;;  %v3729_v30 = vand.u32 4294901760, %v3728_v40  ;;  %v7925_v4 = vld [vmem:[#allocation95_spill] sm:$0xff] }
 0x92e   :  { %3848 = vmatpush.msra.mxu2 %v7895_v20  ;;  %3906 = vmatpush.msra.mxu3 %v7581_v63  ;;  %v7929_v20 = vld [vmem:[#allocation64_spill] sm:$0xff] }
 0x92f   :  { %3647 = vmatmul.f32.vlgmr.msrb.gmra.mxu2 %v3379_v32  ;;  %4008 = vmatpush.msrb.mxu1 %v7575_v5  ;;  %v7901_v5 = vld [vmem:[#allocation37_spill] sm:$0xff]  ;;  %v3730_v61 = vsub.f32 %v3728_v40, %v3729_v30  ;;  %v7917_v32 = vld [vmem:[#allocation83_spill] sm:$0xff] }
 0x930   :  { %3851 = vmatpush.msra.mxu2 %v7896_v39  ;;  %3908 = vmatpush.msra.mxu3 %v7583_v43  ;;  %v7930_v39 = vld [vmem:[#allocation71_spill] sm:$0xff] }
 0x931   :  { %3957 = vmatpush.msrb.mxu0 %v7897_v36  ;;  %4010 = vmatpush.msrb.mxu1 %v7577_v9  ;;  %v7903_v9 = vld [vmem:[#allocation40_spill] sm:$0xff]  ;;  %v3731_v31 = vand.u32 4294901760, %v3730_v61  ;;  %v7931_v36 = vld [vmem:[#allocation103_spill] sm:$0xff] }
 0x932   :  { %3854 = vmatpush.msra.mxu2 %v7898_v1  ;;  %3910 = vmatpush.msra.mxu3 %v7585_v50  ;;  %v7933_v1 = vld [vmem:[#allocation72_spill] sm:$0xff]  ;;  %v7937_v61 = vld [vmem:[#allocation111_spill] sm:$0xff] }
 0x933   :  { %3961 = vmatpush.msrb.mxu0 %v7899_v19  ;;  %4012 = vmatpush.msrb.mxu1 %v7579_v52  ;;  %v7905_v52 = vld [vmem:[#allocation44_spill] sm:$0xff]  ;;  %v7934_v19 = vld [vmem:[#allocation107_spill] sm:$0xff] }
 0x934   :  { %3857 = vmatpush.msra.mxu2 %v7900_v62  ;;  %3912 = vmatpush.msra.mxu3 %v5145_v46  ;;  %v7935_v62 = vld [vmem:[#allocation66_spill] sm:$0xff] }
 0x935   :  { %3965 = vmatpush.msrb.mxu0 %v7901_v5  ;;  %4014 = vmatpush.msrb.mxu1 %v7581_v63  ;;  %v7907_v63 = vld [vmem:[#allocation47_spill] sm:$0xff]  ;;  %v7936_v5 = vld [vmem:[#allocation78_spill] sm:$0xff] }
 0x936   :  { %3860 = vmatpush.msra.mxu2 %v7902_v41  ;;  %3914 = vmatpush.msra.mxu3 %v7588_v42  ;;  %v7938_v41 = vld [vmem:[#allocation70_spill] sm:$0xff] }
 0x937   :  { %3969 = vmatpush.msrb.mxu0 %v7903_v9  ;;  %4016 = vmatpush.msrb.mxu1 %v7583_v43  ;;  %v7909_v43 = vld [vmem:[#allocation41_spill] sm:$0xff]  ;;  %v7939_v9 = vld [vmem:[#allocation79_spill] sm:$0xff] }
 0x938   :  { %3863 = vmatpush.msra.mxu2 %v7904_v23  ;;  %3916 = vmatpush.msra.mxu3 %v5169_v54  ;;  %v7940_v23 = vld [vmem:[#allocation114_spill] sm:$0xff] }
 0x939   :  { %3973 = vmatpush.msrb.mxu0 %v7905_v52  ;;  %4018 = vmatpush.msrb.mxu1 %v7585_v50  ;;  %v7910_v50 = vld [vmem:[#allocation48_spill] sm:$0xff] }
 0x93a   :  { %3866 = vmatpush.msra.mxu2 %v7906_v7  ;;  %3918 = vmatpush.msra.mxu3 %v5187_v60  ;;  %v7941_v52 = vld [vmem:[#allocation76_spill] sm:$0xff]  ;;  %v7943_v7 = vld [vmem:[#allocation117_spill] sm:$0xff] }
 0x93b   :  { %3977 = vmatpush.msrb.mxu0 %v7907_v63  ;;  %4020 = vmatpush.msrb.mxu1 %v5145_v46  ;;  %v7913_v46 = vld [vmem:[#allocation46_spill] sm:$0xff] }
 0x93c   :  { %3869 = vmatpush.msra.mxu2 %v7908_v15  ;;  %3920 = vmatpush.msra.mxu3 %v5221_v12  ;;  %v7944_v63 = vld [vmem:[#allocation86_spill] sm:$0xff]  ;;  %v7945_v15 = vld [vmem:[#allocation91_spill] sm:$0xff] }
 0x93d   :  { %3732 = vmatmul.f32.vlgmr.msra.gmra.mxu0 %v3731_v31  ;;  %4022 = vmatpush.msrb.mxu1 %v7588_v42  ;;  %v7915_v42 = vld [vmem:[#allocation55_spill] sm:$0xff]  ;;  %v7942_v31 = vld [vmem:[#allocation82_spill] sm:$0xff] }
 0x93e   :  { %3872 = vmatpush.msra.mxu2 %v7909_v43  ;;  %3922 = vmatpush.msra.mxu3 %v5240_v34  ;;  %v7946_v43 = vld [vmem:[#allocation119_spill] sm:$0xff] }
 0x93f   :  { %3926 = vmatmul.f32.vlgmr.msra.gmra.mxu3 %v3729_v30  ;;  %3981 = vmatpush.msrb.mxu0 %v7910_v50  ;;  %v7932_v30 = vld [vmem:[#allocation65_spill] sm:$0xff]  ;;  %v7947_v50 = vld [vmem:[#allocation87_spill] sm:$0xff] }
 0x940   :  { %3875 = vmatpush.msra.mxu2 %v7911_v25  ;;  %3833 = vmatmul.f32.vlgmr.msra.gmra.mxu1 %v6752_v3  ;;  %v7948_v25 = vld [vmem:[#allocation93_spill] sm:$0xff] }
 0x941   :  { %3985 = vmatpush.msrb.mxu0 %v7912_v21  ;;  %4024 = vmatpush.msrb.mxu1 %v5169_v54  ;;  %v7920_v54 = vld [vmem:[#allocation88_spill] sm:$0xff]  ;;  %v7949_v21 = vld [vmem:[#allocation121_spill] sm:$0xff] }
 0x942   :  { %3878 = vmatpush.msra.mxu2 %v7913_v46  ;;  %4083 = vmatpush.msrb.mxu3 %v7914_v0  ;;  %v7950_v46 = vld [vmem:[#allocation89_spill] sm:$0xff] }
 0x943   :  { %3989 = vmatpush.msrb.mxu0 %v7915_v42  ;;  %4026 = vmatpush.msrb.mxu1 %v5187_v60  ;;  %v7921_v60 = vld [vmem:[#allocation67_spill] sm:$0xff]  ;;  %v7951_v0 = vld [vmem:[#allocation97_spill] sm:$0xff]  ;;  %v7952_v42 = vld [vmem:[#allocation122_spill] sm:$0xff] }
 0x944   :  { %3881 = vmatpush.msra.mxu2 %v7916_v6  ;;  %4089 = vmatpush.msrb.mxu3 %v7917_v32  ;;  %v7953_v6 = vld [vmem:[#allocation94_spill] sm:$0xff]  ;;  %v7954_v32 = vld [vmem:[#allocation101_spill] sm:$0xff] }
 0x945   :  { %3993 = vmatpush.msrb.mxu0 %v7918_v18  ;;  %4028 = vmatpush.msrb.mxu1 %v5221_v12  ;;  %v7923_v12 = vld [vmem:[#allocation62_spill] sm:$0xff]  ;;  %v7955_v18 = vld [vmem:[#allocation123_spill] sm:$0xff] }
 0x946   :  { %3884 = vmatpush.msra.mxu2 %v7919_v13  ;;  %3995 = vmatmul.f32.vlgmr.msrb.gmra.mxu0 %v6752_v3  ;;  %v7956_v13 = vld [vmem:[#allocation98_spill] sm:$0xff] }
 0x947   :  { %3887 = vmatmul.f32.vlgmr.msra.gmra.mxu2 %v3728_v40  ;;  %4030 = vmatpush.msrb.mxu1 %v5240_v34  ;;  %v7926_v34 = vld [vmem:[#allocation63_spill] sm:$0xff] }
 0x948   :  { %4032 = vmatmul.f32.vlgmr.msrb.gmra.mxu1 %v6752_v3  ;;  %4095 = vmatpush.msrb.mxu3 %v7920_v54  ;;  %v7927_v3 = vld [vmem:[#allocation69_spill] sm:$0xff]  ;;  %v7928_v40 = vld [vmem:[#allocation99_spill] sm:$0xff] }
 0x949   :  { %4038 = vmatpush.msrb.mxu2 %v5337_v51  ;;  %4181 = vmatpush.msra.mxu0 %v7921_v60  ;;  %v7957_v54 = vld [vmem:[#allocation105_spill] sm:$0xff]  ;;  %v7958_v60 = vld [vmem:[#allocation124_spill] sm:$0xff] }
 0x94a   :  { %4101 = vmatpush.msrb.mxu3 %v7922_v55  ;;  %4234 = vmatpush.msra.mxu1 %v5337_v51  ;;  %v7959_v55 = vld [vmem:[#allocation102_spill] sm:$0xff] }
 0x94b   :  { %4040 = vmatpush.msrb.mxu2 %v7923_v12  ;;  %4184 = vmatpush.msra.mxu0 %v7924_v33  ;;  %v7960_v33 = vld [vmem:[#allocation109_spill] sm:$0xff] }
 0x94c   :  { %4107 = vmatpush.msrb.mxu3 %v7925_v4  ;;  %4236 = vmatpush.msra.mxu1 %v7923_v12  ;;  %v7961_v4 = vld [vmem:[#allocation106_spill] sm:$0xff] }
 0x94d   :  { %4042 = vmatpush.msrb.mxu2 %v7926_v34  ;;  %4187 = vmatpush.msra.mxu0 %v7927_v3  ;;  %v7962_v3 = vld [vmem:[#allocation113_spill] sm:$0xff] }
 0x94e   :  { %4113 = vmatpush.msrb.mxu3 %v7928_v40  ;;  %4238 = vmatpush.msra.mxu1 %v7926_v34  ;;  %v7963_v40 = vld [vmem:[#allocation110_spill] sm:$0xff] }
 0x94f   :  { %4044 = vmatpush.msrb.mxu2 %v7929_v20  ;;  %4190 = vmatpush.msra.mxu0 %v7930_v39  ;;  %v7964_v39 = vld [vmem:[#allocation73_spill] sm:$0xff] }
 0x950   :  { %4119 = vmatpush.msrb.mxu3 %v7931_v36  ;;  %4240 = vmatpush.msra.mxu1 %v7929_v20  ;;  %v7966_v36 = vld [vmem:[#allocation74_spill] sm:$0xff] }
 0x951   :  { %4046 = vmatpush.msrb.mxu2 %v7932_v30  ;;  %4193 = vmatpush.msra.mxu0 %v7933_v1  ;;  %v7968_v1 = vld [vmem:[#allocation75_spill] sm:$0xff] }
 0x952   :  { %4125 = vmatpush.msrb.mxu3 %v7934_v19  ;;  %4242 = vmatpush.msra.mxu1 %v7932_v30  ;;  %v7970_v19 = vld [vmem:[#allocation80_spill] sm:$0xff] }
 0x953   :  { %4048 = vmatpush.msrb.mxu2 %v7935_v62  ;;  %4196 = vmatpush.msra.mxu0 %v7936_v5  ;;  %v7972_v5 = vld [vmem:[#allocation85_spill] sm:$0xff] }
 0x954   :  { %4131 = vmatpush.msrb.mxu3 %v7937_v61  ;;  %4244 = vmatpush.msra.mxu1 %v7935_v62  ;;  %v7975_v61 = vld [vmem:[#allocation100_spill] sm:$0xff] }
 0x955   :  { %4050 = vmatpush.msrb.mxu2 %v7938_v41  ;;  %4199 = vmatpush.msra.mxu0 %v7939_v9  ;;  %v7977_v9 = vld [vmem:[#allocation108_spill] sm:$0xff] }
 0x956   :  { %4137 = vmatpush.msrb.mxu3 %v7940_v23  ;;  %4246 = vmatpush.msra.mxu1 %v7938_v41  ;;  %v7978_v23 = vld [vmem:[#allocation112_spill] sm:$0xff] }
 0x957   :  { %4052 = vmatpush.msrb.mxu2 %v7941_v52  ;;  %4202 = vmatpush.msra.mxu0 %v7942_v31  ;;  %v7980_v31 = vld [vmem:[#allocation118_spill] sm:$0xff] }
 0x958   :  { %4143 = vmatpush.msrb.mxu3 %v7943_v7  ;;  %4248 = vmatpush.msra.mxu1 %v7941_v52  ;;  %v7981_v7 = vld [vmem:[#allocation120_spill] sm:$0xff] }
 0x959   :  { %4054 = vmatpush.msrb.mxu2 %v7944_v63  ;;  %4205 = vmatpush.msra.mxu0 %v7945_v15 }
 0x95a   :  { %4149 = vmatpush.msrb.mxu3 %v7946_v43  ;;  %4250 = vmatpush.msra.mxu1 %v7944_v63 }
 0x95b   :  { %4056 = vmatpush.msrb.mxu2 %v7947_v50  ;;  %4208 = vmatpush.msra.mxu0 %v7948_v25 }
 0x95c   :  { %4155 = vmatpush.msrb.mxu3 %v7949_v21  ;;  %4252 = vmatpush.msra.mxu1 %v7947_v50 }
 0x95d   :  { %4058 = vmatpush.msrb.mxu2 %v7950_v46  ;;  %4211 = vmatpush.msra.mxu0 %v7951_v0 }
 0x95e   :  { %4161 = vmatpush.msrb.mxu3 %v7952_v42  ;;  %4254 = vmatpush.msra.mxu1 %v7950_v46 }
 0x95f   :  { %4060 = vmatpush.msrb.mxu2 %v7953_v6  ;;  %4214 = vmatpush.msra.mxu0 %v7954_v32 }
 0x960   :  { %4167 = vmatpush.msrb.mxu3 %v7955_v18  ;;  %4256 = vmatpush.msra.mxu1 %v7953_v6 }
 0x961   :  { %4062 = vmatpush.msrb.mxu2 %v7956_v13  ;;  %4217 = vmatpush.msra.mxu0 %v7957_v54 }
 0x962   :  { %4173 = vmatpush.msrb.mxu3 %v7958_v60  ;;  %4258 = vmatpush.msra.mxu1 %v7956_v13 }
 0x963   :  { %4064 = vmatpush.msrb.mxu2 %v7959_v55  ;;  %4220 = vmatpush.msra.mxu0 %v7960_v33 }
 0x964   :  { %4342 = vmatpush.msra.mxu3 %v5337_v51  ;;  %4260 = vmatpush.msra.mxu1 %v7959_v55  ;;  %v7965_v51 = vld [vmem:[#allocation116_spill] sm:$0xff] }
 0x965   :  { %4066 = vmatpush.msrb.mxu2 %v7961_v4  ;;  %4223 = vmatpush.msra.mxu0 %v7962_v3 }
 0x966   :  { %4344 = vmatpush.msra.mxu3 %v7923_v12  ;;  %4262 = vmatpush.msra.mxu1 %v7961_v4  ;;  %v7967_v12 = vld [vmem:[#allocation128_spill] sm:$0xff] }
 0x967   :  { %4068 = vmatpush.msrb.mxu2 %v7963_v40  ;;  %4226 = vmatpush.msra.mxu0 %v7965_v51 }
 0x968   :  { %4346 = vmatpush.msra.mxu3 %v7926_v34  ;;  %4264 = vmatpush.msra.mxu1 %v7963_v40  ;;  %v7969_v34 = vld [vmem:[#allocation77_spill] sm:$0xff] }
 0x969   :  { %4275 = vmatpush.msra.mxu2 %v7964_v39  ;;  %4421 = vmatpush.msrb.mxu0 %v7661_v53 }
 0x96a   :  { %4348 = vmatpush.msra.mxu3 %v7929_v20  ;;  %4451 = vmatpush.msrb.mxu1 %v7967_v12  ;;  %v7971_v20 = vld [vmem:[#allocation84_spill] sm:$0xff] }
 0x96b   :  { %4279 = vmatpush.msra.mxu2 %v7966_v36 }
 0x96c   :  { %4350 = vmatpush.msra.mxu3 %v7932_v30  ;;  %v7973_v30 = vld [vmem:[#allocation90_spill] sm:$0xff] }
 0x96d   :  { %4283 = vmatpush.msra.mxu2 %v7968_v1 }
 0x96e   :  { %4352 = vmatpush.msra.mxu3 %v7935_v62  ;;  %v7974_v62 = vld [vmem:[#allocation96_spill] sm:$0xff] }
 0x96f   :  { %4287 = vmatpush.msra.mxu2 %v7969_v34 }
 0x970   :  { %4354 = vmatpush.msra.mxu3 %v7938_v41  ;;  %v7976_v41 = vld [vmem:[#allocation104_spill] sm:$0xff] }
 0x971   :  { %4291 = vmatpush.msra.mxu2 %v7970_v19 }
 0x972   :  { %4356 = vmatpush.msra.mxu3 %v7941_v52  ;;  %v7979_v52 = vld [vmem:[#allocation115_spill] sm:$0xff] }
 0x973   :  { %4295 = vmatpush.msra.mxu2 %v7971_v20 }
 0x974   :  { %4358 = vmatpush.msra.mxu3 %v7944_v63 }
 0x975   :  { %4299 = vmatpush.msra.mxu2 %v7972_v5 }
 0x976   :  { %4360 = vmatpush.msra.mxu3 %v7947_v50 }
 0x977   :  { %4303 = vmatpush.msra.mxu2 %v7973_v30 }
 0x978   :  { %4362 = vmatpush.msra.mxu3 %v7950_v46 }
 0x979   :  { %4307 = vmatpush.msra.mxu2 %v7974_v62  ;;  %v7983_v62 = vld [vmem:[#allocation134_spill] sm:$0xff] }
 0x97a   :  { %4364 = vmatpush.msra.mxu3 %v7953_v6 }
 0x97b   :  { %4311 = vmatpush.msra.mxu2 %v7975_v61  ;;  %v7984_v61 = vld [vmem:[#allocation135_spill] sm:$0xff] }
 0x97c   :  { %4366 = vmatpush.msra.mxu3 %v7956_v13  ;;  %v4946_v13 = vld [vmem:[%s7024_s2] ss:$0 sm:$0xff]  ;;  %s4974_s2 = smov 64  }
 0x97d   :  { %4315 = vmatpush.msra.mxu2 %v7976_v41  ;;  %v7987_v41 = vld [vmem:[#allocation144_spill] sm:$0xff] }
 0x97e   :  { %4368 = vmatpush.msra.mxu3 %v7959_v55 }
 0x97f   :  { %4319 = vmatpush.msra.mxu2 %v7977_v9  ;;  %v7988_v9 = vld [vmem:[#allocation147_spill] sm:$0xff] }
 0x980   :  { %4370 = vmatpush.msra.mxu3 %v7961_v4 }
 0x981   :  { %4323 = vmatpush.msra.mxu2 %v7978_v23  ;;  %v7989_v23 = vld [vmem:[#allocation150_spill] sm:$0xff] }
 0x982   :  { %4372 = vmatpush.msra.mxu3 %v7963_v40 }
 0x983   :  { %4327 = vmatpush.msra.mxu2 %v7979_v52  ;;  %v7990_v52 = vld [vmem:[#allocation153_spill] sm:$0xff] }
 0x985   :  { %4331 = vmatpush.msra.mxu2 %v7980_v31  ;;  %v7991_v31 = vld [vmem:[#allocation162_spill] sm:$0xff] }
 0x987   :  { %4335 = vmatpush.msra.mxu2 %v7981_v7  ;;  %v7992_v7 = vld [vmem:[#allocation164_spill] sm:$0xff] }
 0x99e   :  { %v3540_v50 = vpop.f32.mrf.mxu0 }
 0x9a0   :  { %v3579_v21 = vpop.f32.mrf.mxu1 }
 0x9a2   :  { %v3486_v63 = vpop.f32.mrf.mxu3 }
 0x9aa   :  { %v3385_v15 = vpop.f32.mrf.mxu2  ;;  %v3685_v6 = vpop.f32.mrf.mxu3 }
 0x9ab   :  { %v3487_v43 = vadd.f32 %v3486_v63, %v3385_v15  ;;  %v7993_v63 = vld [vmem:[#allocation166_spill] sm:$0xff]  ;;  %v7994_v15 = vld [vmem:[#allocation169_spill] sm:$0xff] }
 0x9ad   :  { %v3541_v25 = vadd.f32 %v3540_v50, %v3487_v43  ;;  %v7995_v43 = vld [vmem:[#allocation172_spill] sm:$0xff] }
 0x9af   :  { %v3580_v46 = vadd.f32 %v3579_v21, %v3541_v25 }
 0x9b2   :  { %v3648_v0 = vpop.f32.mrf.mxu2 }
 0x9b3   :  { %v3649_v42 = vadd.f32 %v3648_v0, %v3580_v46 }
 0x9b5   :  { %v6909_v32 = vadd.f32 %v3685_v6, %v3649_v42 }
 0x9ba   :  { %v3733_v18 = vpop.f32.mrf.mxu0 }
 0x9bb   :  { %v3734_v54 = vadd.f32 %v4946_v13, %v3733_v18 }
 0x9bd   :  { %v3834_v60 = vpop.f32.mrf.mxu1 }
 0x9be   :  { %v3835_v55 = vadd.f32 %v3834_v60, %v3734_v54 }
 0x9c2   :  { %v3927_v4 = vpop.f32.mrf.mxu3 }
 0x9c3   :  { %v3996_v40 = vpop.f32.mrf.mxu0 }
 0x9c5   :  { %v4033_v51 = vpop.f32.mrf.mxu1 }
 0x9ca   :  { %v3888_v33 = vpop.f32.mrf.mxu2 }
 0x9cb   :  { %v3889_v3 = vadd.f32 %v3888_v33, %v3835_v55 }
 0x9cd   :  { %v3928_v39 = vadd.f32 %v3927_v4, %v3889_v3 }
 0x9cf   :  { %v3997_v36 = vadd.f32 %v3996_v40, %v3928_v39 }
 0x9d1   :  { %v4034_v12 = vadd.f32 %v4033_v51, %v3997_v36 }
 0x9d3   :  { %4938 = vtanh.f32 %v4034_v12 }
 0x9d9   :  { %v4939_v1 = vpop.eup %4938 }
 0x9da   :  { %v4069_v34 = vand.u32 4294901760, %v4939_v1 }
 0x9dc   :  { %4175 = vmatmul.f32.vlgmr.msrb.gmra.mxu3 %v4069_v34  ;;  %v4070_v19 = vsub.f32 %v4939_v1, %v4069_v34 }
 0x9dd   :  { %4749 = vmatpush.msrb.mxu3 %v5726_v28 }
 0x9de   :  { %4229 = vmatmul.f32.vlgmr.msra.gmra.mxu0 %v4070_v19  ;;  %v4071_v20 = vand.u32 4294901760, %v4070_v19 }
 0x9df   :  { %4474 = vmatpush.msra.mxu0 %v7828_v24  ;;  %4751 = vmatpush.msrb.mxu3 %v5728_v11  ;;  %v7982_v24 = vld [vmem:[#allocation132_spill] sm:$0xff] }
 0x9e0   :  { %4268 = vmatmul.f32.vlgmr.msra.gmra.mxu1 %v4071_v20  ;;  %v4072_v5 = vsub.f32 %v4070_v19, %v4071_v20 }
 0x9e1   :  { %4497 = vmatpush.msra.mxu1 %v7661_v53  ;;  %4753 = vmatpush.msrb.mxu3 %v5730_v49 }
 0x9e2   :  { %v4073_v30 = vand.u32 4294901760, %v4072_v5 }
 0x9e3   :  { %4755 = vmatpush.msrb.mxu3 %v5744_v56 }
 0x9e4   :  { %4074 = vmatmul.f32.vlgmr.msrb.gmra.mxu2 %v4073_v30  ;;  %4374 = vmatmul.f32.vlgmr.msra.gmra.mxu3 %v4069_v34 }
 0x9e5   :  { %4696 = vmatpush.msrb.mxu2 %v7829_v27  ;;  %4757 = vmatpush.msrb.mxu3 %v5750_v45  ;;  %v7985_v27 = vld [vmem:[#allocation137_spill] sm:$0xff] }
 0x9e7   :  { %4699 = vmatpush.msrb.mxu2 %v7830_v26  ;;  %4759 = vmatpush.msrb.mxu3 %v5763_v48  ;;  %v7986_v26 = vld [vmem:[#allocation141_spill] sm:$0xff] }
 0x9e9   :  { %4702 = vmatpush.msrb.mxu2 %v7982_v24  ;;  %4761 = vmatpush.msrb.mxu3 %v5791_v38 }
 0x9eb   :  { %4705 = vmatpush.msrb.mxu2 %v7983_v62  ;;  %4763 = vmatpush.msrb.mxu3 %v5807_v44 }
 0x9ec   :  { %4337 = vmatmul.f32.vlgmr.msra.gmra.mxu2 %v4069_v34 }
 0x9ed   :  { %4708 = vmatpush.msrb.mxu2 %v7984_v61  ;;  %4765 = vmatpush.msrb.mxu3 %v5825_v58 }
 0x9ef   :  { %4711 = vmatpush.msrb.mxu2 %v7985_v27  ;;  %4767 = vmatpush.msrb.mxu3 %v5842_v8 }
 0x9f1   :  { %4714 = vmatpush.msrb.mxu2 %v7986_v26  ;;  %4769 = vmatpush.msrb.mxu3 %v5857_v57 }
 0x9f3   :  { %4717 = vmatpush.msrb.mxu2 %v7987_v41  ;;  %4771 = vmatpush.msrb.mxu3 %v5943_v59 }
 0x9f5   :  { %4720 = vmatpush.msrb.mxu2 %v7988_v9  ;;  %4773 = vmatpush.msrb.mxu3 %v5952_v14 }
 0x9f7   :  { %4723 = vmatpush.msrb.mxu2 %v7989_v23  ;;  %4775 = vmatpush.msrb.mxu3 %v5965_v35 }
 0x9f9   :  { %4726 = vmatpush.msrb.mxu2 %v7990_v52  ;;  %4777 = vmatpush.msrb.mxu3 %v5981_v16 }
 0x9fb   :  { %4729 = vmatpush.msrb.mxu2 %v7991_v31  ;;  %4779 = vmatpush.msrb.mxu3 %v6000_v10  ;;  %v7996_v31 = vld [vmem:[#allocation145_spill] sm:$0xff] }
 0x9fd   :  { %4732 = vmatpush.msrb.mxu2 %v7992_v7  ;;  %v7997_v7 = vld [vmem:[#allocation148_spill] sm:$0xff] }
 0x9ff   :  { %4735 = vmatpush.msrb.mxu2 %v7993_v63  ;;  %v7999_v63 = vld [vmem:[#allocation154_spill] sm:$0xff] }
 0xa01   :  { %4738 = vmatpush.msrb.mxu2 %v7994_v15  ;;  %v8003_v15 = vld [vmem:[#allocation160_spill] sm:$0xff] }
 0xa03   :  { %4741 = vmatpush.msrb.mxu2 %v7995_v43  ;;  %v8004_v43 = vld [vmem:[#allocation161_spill] sm:$0xff] }
 0xa5b   :  { %v4230_v46 = vpop.f32.mrf.mxu0 }
 0xa5d   :  { %v4269_v42 = vpop.f32.mrf.mxu1 }
 0xa5f   :  { %v4176_v50 = vpop.f32.mrf.mxu3 }
 0xa67   :  { %v4075_v25 = vpop.f32.mrf.mxu2  ;;  %v4375_v54 = vpop.f32.mrf.mxu3 }
 0xa68   :  { %v4177_v21 = vadd.f32 %v4176_v50, %v4075_v25  ;;  %v8005_v50 = vld [vmem:[#allocation167_spill] sm:$0xff]  ;;  %v8006_v25 = vld [vmem:[#allocation170_spill] sm:$0xff] }
 0xa6a   :  { %v4231_v0 = vadd.f32 %v4230_v46, %v4177_v21  ;;  %v8007_v21 = vld [vmem:[#allocation173_spill] sm:$0xff]  ;;  %v8008_v46 = vld [vmem:[#allocation175_spill] sm:$0xff] }
 0xa6c   :  { %v4270_v6 = vadd.f32 %v4269_v42, %v4231_v0  ;;  %v8009_v0 = vld [vmem:[#allocation176_spill] sm:$0xff]  ;;  %v8010_v42 = vld [vmem:[#allocation131_spill] sm:$0xff] }
 0xa6f   :  { %v4338_v18 = vpop.f32.mrf.mxu2 }
 0xa70   :  { %v4339_v13 = vadd.f32 %v4338_v18, %v4270_v6  ;;  %v8011_v6 = vld [vmem:[#allocation133_spill] sm:$0xff] }
 0xa72   :  { %v4376_v60 = vadd.f32 %v4375_v54, %v4339_v13 }
 0xa74   :  { %v4378_v55 = vsel %vm761_vm0, %v4376_v60, -inf }
 0xa75   :  { %4379 = vmax.xlane.f32.xlu0 %v4378_v55 }
 0xa89   :  { %3689 = vrot.lane.b32.xlu0 %v6909_v32, %s4974_s2 }
 0xae8   :  { %v4380_v33 = vpop.xlane.xlu0 %4379 }
 0xae9   :  { %v4381_v4 = vsub.f32 %v4376_v60, %v4380_v33 }
 0xaeb   :  { %v4382_v3 = vmul.f32 1.442695, %v4381_v4 }
 0xaed   :  { %4940 = vpow2.f32 %v4382_v3 }
 0xaf3   :  { %v4941_v40 = vpop.eup %4940 }
 0xaf4   :  { %v4384_v39 = vsel %vm761_vm0, %v4941_v40, 0.0  ;;  %vm4897_vm0 = vcmask 1044224  }
 0xaf5   :  { %4385 = vadd.xlane.f32.xlu1 %v4384_v39 }
 0xafb   :  { %v3690_v51 = vpop.permute.xlu0 %3689 }
 0xafc   :  { %3693 = vst.msk [vmem:[#allocation2] sm:$0xf] %vm3692_vm2, %v3690_v51 }
 0xb68   :  { %v4386_v36 = vpop.xlane.xlu1 %4385 }
 0xb69   :  { %4942 = vrcp.f32 %v4386_v36  ;;  %v4398_v19 = vand.u32 2147483648, %v4386_v36  ;;  %v4396_v32 = vand.u32 2147483647, %v4386_v36  ;;  %vm4392_vm4 = vweird.f32 %v4386_v36 }
 0xb6b   :  { %v4399_v30 = vor.u32 1.1754944e-38, %v4398_v19  ;;  %vm4397_vm7 = vcmp.eq.f32.partialorder %v4396_v32, 8.507059e+37 }
 0xb6f   :  { %v4943_v12 = vpop.eup %4942 }
 0xb70   :  { %v4388_v1 = vmul.f32 %v4943_v12, %v4386_v36  ;;  %vm4393_vm3 = vweird.f32 %v4943_v12 }
 0xb71   :  { %vm4394_vm5 = vmor %vm4392_vm4, %vm4393_vm3 }
 0xb72   :  { %v4389_v34 = vsub.f32 1.0, %v4388_v1 }
 0xb74   :  { %v4390_v20 = vmul.f32 %v4943_v12, %v4389_v34 }
 0xb76   :  { %v4391_v5 = vadd.f32 %v4943_v12, %v4390_v20 }
 0xb78   :  { %v4395_v24 = vsel %vm4394_vm5, %v4943_v12, %v4391_v5 }
 0xb79   :  { %v4400_v62 = vsel %vm4397_vm7, %v4399_v30, %v4395_v24 }
 0xb7a   :  { %v4401_v61 = vmul.f32 %v4941_v40, %v4400_v62 }
 0xb7c   :  { %v4403_v27 = vsel %vm786_vm6, %v4401_v61, 0 }
 0xb7d   :  { %v4422_v26 = vand.u32 4294901760, %v4403_v27 }
 0xb7f   :  { %v4423_v41 = vsub.f32 %v4403_v27, %v4422_v26  ;;  %4453 = vmatmul.f32.vlgmr.msrb.gmra.mxu1 %v4422_v26 }
 0xb80   :  { %4545 = vmatpush.msrb.mxu1 %v7661_v53  ;;  %v7998_v53 = vld [vmem:[#allocation151_spill] sm:$0xff] }
 0xb81   :  { %v4424_v9 = vand.u32 4294901760, %v4423_v41 }
 0xb83   :  { %v4425_v23 = vsub.f32 %v4423_v41, %v4424_v9 }
 0xb85   :  { %v4426_v52 = vand.u32 4294901760, %v4425_v23 }
 0xb87   :  { %4427 = vmatmul.f32.vlgmr.msrb.gmra.mxu0 %v4426_v52  ;;  %4501 = vmatmul.f32.vlgmr.msra.gmra.mxu1 %v4424_v9 }
 0xb88   :  { %4523 = vmatpush.msrb.mxu0 %v7861_v22  ;;  %4598 = vmatpush.msra.mxu1 %v7862_v37  ;;  %v8000_v22 = vld [vmem:[#allocation156_spill] sm:$0xff]  ;;  %v8001_v37 = vld [vmem:[#allocation158_spill] sm:$0xff] }
 0xb8a   :  { %4604 = vmatpush.msra.mxu1 %v7863_v17  ;;  %v8002_v17 = vld [vmem:[#allocation159_spill] sm:$0xff] }
 0xb8c   :  { %4610 = vmatpush.msra.mxu1 %v7996_v31 }
 0xb8e   :  { %4616 = vmatpush.msra.mxu1 %v7997_v7 }
 0xb8f   :  { %4477 = vmatmul.f32.vlgmr.msra.gmra.mxu0 %v4423_v41  ;;  %4547 = vmatmul.f32.vlgmr.msrb.gmra.mxu1 %v4422_v26 }
 0xb90   :  { %4553 = vmatpush.msra.mxu0 %v5726_v28  ;;  %4622 = vmatpush.msra.mxu1 %v7998_v53 }
 0xb92   :  { %4555 = vmatpush.msra.mxu0 %v5728_v11  ;;  %4628 = vmatpush.msra.mxu1 %v7999_v63 }
 0xb94   :  { %4557 = vmatpush.msra.mxu0 %v5730_v49  ;;  %4634 = vmatpush.msra.mxu1 %v8000_v22 }
 0xb96   :  { %4559 = vmatpush.msra.mxu0 %v5744_v56  ;;  %4640 = vmatpush.msra.mxu1 %v8001_v37 }
 0xb97   :  { %4525 = vmatmul.f32.vlgmr.msrb.gmra.mxu0 %v4422_v26 }
 0xb98   :  { %4561 = vmatpush.msra.mxu0 %v5750_v45  ;;  %4646 = vmatpush.msra.mxu1 %v8002_v17 }
 0xb9a   :  { %4563 = vmatpush.msra.mxu0 %v5763_v48  ;;  %4652 = vmatpush.msra.mxu1 %v8003_v15 }
 0xb9c   :  { %4565 = vmatpush.msra.mxu0 %v5791_v38  ;;  %4658 = vmatpush.msra.mxu1 %v8004_v43 }
 0xb9e   :  { %4567 = vmatpush.msra.mxu0 %v5807_v44  ;;  %4664 = vmatpush.msra.mxu1 %v8005_v50 }
 0xba0   :  { %4569 = vmatpush.msra.mxu0 %v5825_v58  ;;  %4670 = vmatpush.msra.mxu1 %v8006_v25 }
 0xba2   :  { %4571 = vmatpush.msra.mxu0 %v5842_v8  ;;  %4676 = vmatpush.msra.mxu1 %v8007_v21 }
 0xba4   :  { %4573 = vmatpush.msra.mxu0 %v5857_v57  ;;  %4682 = vmatpush.msra.mxu1 %v8008_v46 }
 0xba6   :  { %4575 = vmatpush.msra.mxu0 %v5943_v59  ;;  %4688 = vmatpush.msra.mxu1 %v8009_v0 }
 0xba8   :  { %4857 = vmatpush.msrb.mxu1 %v5726_v28  ;;  %4577 = vmatpush.msra.mxu0 %v5952_v14  ;;  %v8012_v28 = vld [vmem:[#allocation136_spill] sm:$0xff] }
 0xbaa   :  { %4859 = vmatpush.msrb.mxu1 %v5728_v11  ;;  %4579 = vmatpush.msra.mxu0 %v5965_v35  ;;  %v8013_v11 = vld [vmem:[#allocation138_spill] sm:$0xff] }
 0xbac   :  { %4861 = vmatpush.msrb.mxu1 %v5730_v49  ;;  %4581 = vmatpush.msra.mxu0 %v5981_v16  ;;  %v8014_v49 = vld [vmem:[#allocation139_spill] sm:$0xff] }
 0xbae   :  { %4863 = vmatpush.msrb.mxu1 %v5744_v56  ;;  %4583 = vmatpush.msra.mxu0 %v6000_v10  ;;  %v8015_v56 = vld [vmem:[#allocation142_spill] sm:$0xff] }
 0xbb0   :  { %4790 = vmatpush.msrb.mxu0 %v8010_v42  ;;  %4865 = vmatpush.msrb.mxu1 %v5750_v45  ;;  %v8016_v45 = vld [vmem:[#allocation146_spill] sm:$0xff] }
 0xbb2   :  { %4794 = vmatpush.msrb.mxu0 %v8011_v6  ;;  %4867 = vmatpush.msrb.mxu1 %v5763_v48  ;;  %v8017_v48 = vld [vmem:[#allocation149_spill] sm:$0xff] }
 0xbb4   :  { %4798 = vmatpush.msrb.mxu0 %v8012_v28  ;;  %4869 = vmatpush.msrb.mxu1 %v5791_v38  ;;  %v8018_v38 = vld [vmem:[#allocation152_spill] sm:$0xff] }
 0xbb6   :  { %4802 = vmatpush.msrb.mxu0 %v8013_v11  ;;  %4871 = vmatpush.msrb.mxu1 %v5807_v44  ;;  %v8019_v44 = vld [vmem:[#allocation155_spill] sm:$0xff] }
 0xbb8   :  { %4806 = vmatpush.msrb.mxu0 %v8014_v49  ;;  %4873 = vmatpush.msrb.mxu1 %v5825_v58  ;;  %v8020_v58 = vld [vmem:[#allocation157_spill] sm:$0xff] }
 0xbba   :  { %4810 = vmatpush.msrb.mxu0 %v8015_v56  ;;  %4875 = vmatpush.msrb.mxu1 %v5842_v8  ;;  %v8021_v8 = vld [vmem:[#allocation163_spill] sm:$0xff] }
 0xbbc   :  { %4814 = vmatpush.msrb.mxu0 %v8016_v45  ;;  %4877 = vmatpush.msrb.mxu1 %v5857_v57  ;;  %v8022_v57 = vld [vmem:[#allocation165_spill] sm:$0xff] }
 0xbbe   :  { %4818 = vmatpush.msrb.mxu0 %v8017_v48  ;;  %4879 = vmatpush.msrb.mxu1 %v5943_v59  ;;  %v8023_v59 = vld [vmem:[#allocation174_spill] sm:$0xff] }
 0xbc0   :  { %4822 = vmatpush.msrb.mxu0 %v8018_v38  ;;  %4881 = vmatpush.msrb.mxu1 %v5952_v14 }
 0xbc2   :  { %4826 = vmatpush.msrb.mxu0 %v8019_v44  ;;  %4883 = vmatpush.msrb.mxu1 %v5965_v35 }
 0xbc4   :  { %4830 = vmatpush.msrb.mxu0 %v8020_v58  ;;  %4885 = vmatpush.msrb.mxu1 %v5981_v16 }
 0xbc6   :  { %4834 = vmatpush.msrb.mxu0 %v8021_v8  ;;  %4887 = vmatpush.msrb.mxu1 %v6000_v10 }
 0xbc8   :  { %4838 = vmatpush.msrb.mxu0 %v8022_v57 }
 0xbca   :  { %4842 = vmatpush.msrb.mxu0 %v7740_v47 }
 0xbcc   :  { %4846 = vmatpush.msrb.mxu0 %v7741_v29 }
 0xbce   :  { %4850 = vmatpush.msrb.mxu0 %v8023_v59 }
 0xbfc   :  { %v4454_v14 = vpop.f32.mrf.mxu1 }
 0xc04   :  { %v4428_v18 = vpop.f32.mrf.mxu0  ;;  %v4502_v13 = vpop.f32.mrf.mxu1 }
 0xc05   :  { %v4455_v54 = vadd.f32 %v4454_v14, %v4428_v18 }
 0xc0c   :  { %v4478_v35 = vpop.f32.mrf.mxu0  ;;  %v4548_v4 = vpop.f32.mrf.mxu1 }
 0xc0d   :  { %v4479_v60 = vadd.f32 %v4478_v35, %v4455_v54 }
 0xc0f   :  { %v4503_v55 = vadd.f32 %v4502_v13, %v4479_v60 }
 0xc14   :  { %v4526_v16 = vpop.f32.mrf.mxu0 }
 0xc15   :  { %v4527_v33 = vadd.f32 %v4526_v16, %v4503_v55 }
 0xc17   :  { %v4549_v3 = vadd.f32 %v4548_v4, %v4527_v33 }
 0xc19   :  { %v4551_v10 = vmul.f32 %v4549_v3, %v6745_v2 }
 0xc1b   :  { %v4584_v40 = vand.u32 4294901760, %v4551_v10 }
 0xc1d   :  { %v4585_v39 = vsub.f32 %v4551_v10, %v4584_v40  ;;  %4690 = vmatmul.f32.vlgmr.msra.gmra.mxu1 %v4584_v40 }
 0xc1f   :  { %4744 = vmatmul.f32.vlgmr.msrb.gmra.mxu2 %v4585_v39  ;;  %v4586_v29 = vand.u32 4294901760, %v4585_v39 }
 0xc21   :  { %4783 = vmatmul.f32.vlgmr.msrb.gmra.mxu3 %v4586_v29  ;;  %v4587_v47 = vsub.f32 %v4585_v39, %v4586_v29 }
 0xc23   :  { %v4588_v51 = vand.u32 4294901760, %v4587_v47 }
 0xc25   :  { %4589 = vmatmul.f32.vlgmr.msra.gmra.mxu0 %v4588_v51  ;;  %4889 = vmatmul.f32.vlgmr.msrb.gmra.mxu1 %v4584_v40 }
 0xc2d   :  { %4852 = vmatmul.f32.vlgmr.msrb.gmra.mxu0 %v4584_v40 }
 0xc9a   :  { %v4691_v36 = vpop.f32.mrf.mxu1 }
 0xca2   :  { %v4590_v12 = vpop.f32.mrf.mxu0  ;;  %v4745_v34 = vpop.f32.mrf.mxu2 }
 0xca3   :  { %v4692_v1 = vadd.f32 %v4691_v36, %v4590_v12  ;;  %v4890_v30 = vpop.f32.mrf.mxu1 }
 0xca4   :  { %v4784_v20 = vpop.f32.mrf.mxu3 }
 0xca5   :  { %v4746_v19 = vadd.f32 %v4745_v34, %v4692_v1 }
 0xca7   :  { %v4785_v32 = vadd.f32 %v4784_v20, %v4746_v19 }
 0xcaa   :  { %v4853_v5 = vpop.f32.mrf.mxu0 }
 0xcab   :  { %v4854_v2 = vadd.f32 %v4853_v5, %v4785_v32 }
 0xcad   :  { %v4891_v24 = vadd.f32 %v4890_v30, %v4854_v2 }
 0xcaf   :  { %4894 = vrot.lane.b32.xlu1 %v4891_v24, %s4975_s30 }
 0xd21   :  { %v4895_v62 = vpop.permute.xlu1 %4894 }
 0xd22   :  { %4898 = vst.msk [vmem:[#allocation2] sm:$0xf] %vm4897_vm0, %v4895_v62 }
 0xd23   :  { %4909 = dma.vmem_to_hbm [thread:$0]  %s4905_s8, 64, %s4907_s11, [#allocation3]  }
 0xd24   :  { %4971 = dma.done.wait [#allocation3], 64  }
 0xd25   :  { %4972 = vsyncadd [#allocation3], 4294967232 }
 0xd26   :  { %4914 = vsyncpa [#allocation3], 1 }

</bundles_post_ra>
